<compile_context>
chip_gen: v7x
topology: tpu7x:2x2x1
jax: 0.10.0
libtpu: 0.0.40
codegen_flags: <defaults>
</compile_context>

<pallas_src>
import math
import numpy as np
import jax
import jax.numpy as jnp
from jax.experimental import pallas as pl
from jax.experimental.pallas import tpu as pltpu

# ---- model dims (small, consistent with the module) ----
B, S, D = 2, 8, 32       # batch, seq_len, d_model
H = 4                    # nhead
HD = D // H              # per-head dim
F = 4 * D                # feed-forward hidden dim (128 -> lane dense)
L = 2                    # n_layers per stack (encoder / decoder)
NL = 2 * L               # total layers (encoder layers followed by decoder layers)
BS = B * S               # folded batch*seq rows
EPS = 1e-5               # LayerNorm eps (PyTorch default)


def _layernorm(x, gamma, beta):
    mean = jnp.mean(x, axis=-1, keepdims=True)
    var = jnp.mean((x - mean) ** 2, axis=-1, keepdims=True)
    return (x - mean) * jax.lax.rsqrt(var + EPS) * gamma + beta


# ---------------- Pallas kernel ----------------
# Single grid step; everything (activations + all weights) lives in VMEM at once.
# Activations are kept flattened to (B*S, D).
def transformer_kernel(x_ref, pe_ref, wslab_ref, bslab_ref, w1_ref, b1_ref,
                       w2t_ref, lnv_ref, wout_ref, finv_ref, out_ref):
    pe = pe_ref[...]                                   # (BS, D), hoisted / reused twice

    def split_heads(t):
        # (B*S, H*HD) -> (B*H, S, HD), value-level (slices + stack, no scratch)
        return jnp.stack(
            [t[b * S:(b + 1) * S, hh * HD:(hh + 1) * HD]
             for b in range(B) for hh in range(H)], axis=0)

    def apply_layer(h, l):
        wslab = wslab_ref[l]                           # (D, 4D) bf16 = [Wq*scale|Wk|Wv|Wo]
        bsl = bslab_ref[l]                             # (1, 4D) f32  = [bq*scale|bk|bv|bo]

        # fused QKV(+O) projection: one lane-dense MXU matmul over all B*S rows
        proj = jnp.dot(h.astype(jnp.bfloat16), wslab,
                       preferred_element_type=jnp.float32) + bsl
        q = proj[:, 0:D]                               # already pre-scaled by 1/sqrt(HD)
        k = proj[:, D:2 * D]
        v = proj[:, 2 * D:3 * D]

        q3 = split_heads(q).astype(jnp.bfloat16)       # (B*H, S, HD)
        k3 = split_heads(k).astype(jnp.bfloat16)
        v3 = split_heads(v).astype(jnp.bfloat16)

        # one batched MXU matmul + one fused softmax over all (batch, head) pairs
        s = jnp.einsum('bsd,btd->bst', q3, k3,
                       preferred_element_type=jnp.float32)        # (B*H, S, S)
        s = s - jnp.max(s, axis=-1, keepdims=True)
        p = jnp.exp(s)
        p = p * pl.reciprocal(jnp.sum(p, axis=-1, keepdims=True), approx=True)
        ctx3 = jnp.einsum('bst,btd->bsd', p.astype(jnp.bfloat16), v3,
                          preferred_element_type=jnp.float32)     # (B*H, S, HD)

        # reassemble (B*H, S, HD) -> (B*S, H*HD) in registers (no VMEM scratch)
        ctx = jnp.concatenate(
            [jnp.concatenate([ctx3[b * H + hh] for hh in range(H)], axis=-1)
             for b in range(B)], axis=0)               # (BS, D)

        wo = wslab[:, 3 * D:4 * D]                     # (D, D) bf16
        bo = bsl[:, 3 * D:4 * D]                       # (1, D) f32
        attn = jnp.dot(ctx.astype(jnp.bfloat16), wo,
                       preferred_element_type=jnp.float32) + bo

        lnvl = lnv_ref[l]                              # (5, D) = [g1, be1, g2, be2, b2_ffn]
        y = _layernorm(h + attn, lnvl[0:1], lnvl[1:2])
        ff = jnp.maximum(
            jnp.dot(y.astype(jnp.bfloat16), w1_ref[l],
                    preferred_element_type=jnp.float32) + b1_ref[l], 0.0)
        # W2 stored transposed (D, F) -> contract on the lane-dense F dim
        ff2 = jax.lax.dot_general(ff.astype(jnp.bfloat16), w2t_ref[l],
                                  (((1,), (1,)), ((), ())),
                                  preferred_element_type=jnp.float32) + lnvl[4:5]
        return _layernorm(y + ff2, lnvl[2:3], lnvl[3:4])

    # ---- encoder ----
    h = x_ref[...] + pe
    for l in range(L):
        h = apply_layer(h, l)
    h = _layernorm(h, finv_ref[0:1, :], finv_ref[1:2, :])   # encoder final norm

    # ---- decoder (self-attention only: it receives just the encoder output) ----
    h = h + pe
    for l in range(L, NL):
        h = apply_layer(h, l)
    h = _layernorm(h, finv_ref[2:3, :], finv_ref[3:4, :])   # decoder final norm

    # ---- final Linear(d_model, d_model) ----
    out_ref[...] = (jnp.dot(h.astype(jnp.bfloat16), wout_ref[...],
                            preferred_element_type=jnp.float32) + finv_ref[4:5, :])


# ---------------- wrapper ----------------
def transformer_forward(x, pe, packed):
    wslab, bslab, w1, b1, w2t, lnv, wout, finv = packed
    x2d = x.reshape(BS, D)
    pe2d = jnp.tile(pe.reshape(S, D), (B, 1))        # layout plumbing only (broadcast of buffer)

    def full(shape):
        return pl.BlockSpec(shape, lambda i: (0,) * len(shape))

    grid_spec = pltpu.PrefetchScalarGridSpec(
        num_scalar_prefetch=0,
        grid=(1,),                                   # single step: whole model in VMEM
        in_specs=[
            full((BS, D)),                           # x (flattened)
            full((BS, D)),                           # pe (tiled over batch)
            full((NL, D, 4 * D)),                    # packed [Wq*scale|Wk|Wv|Wo]   (bf16)
            full((NL, 1, 4 * D)),                    # packed [bq*scale|bk|bv|bo]   (f32)
            full((NL, D, F)),                        # FFN W1                        (bf16)
            full((NL, 1, F)),                        # FFN b1                        (f32)
            full((NL, D, F)),                        # FFN W2^T                      (bf16)
            full((NL, 5, D)),                        # [g1, be1, g2, be2, b2_ffn]    (f32)
            full((D, D)),                            # out-linear W                  (bf16)
            full((5, D)),                            # [g_enc, b_enc, g_dec, b_dec, b_out]
        ],
        out_specs=full((BS, D)),
    )

    out2d = pl.pallas_call(
        transformer_kernel,
        out_shape=jax.ShapeDtypeStruct((BS, D), jnp.float32),
        grid_spec=grid_spec,
        compiler_params=pltpu.CompilerParams(dimension_semantics=("arbitrary",)),
    )(x2d, pe2d, wslab, bslab, w1, b1, w2t, lnv, wout, finv)
    return out2d.reshape(B, S, D)


# ---------------- pure-JAX reference (independent f32 formulation) ----------------
def ref_forward(x, pe, enc, dec, wout, bout):
    def layer(h, p, l):
        q = h @ p['wq'][l] + p['bq'][l]
        k = h @ p['wk'][l] + p['bk'][l]
        v = h @ p['wv'][l] + p['bv'][l]
        qh = q.reshape(B, S, H, HD).transpose(0, 2, 1, 3)
        kh = k.reshape(B, S, H, HD).transpose(0, 2, 1, 3)
        vh = v.reshape(B, S, H, HD).transpose(0, 2, 1, 3)
        s = jnp.einsum('bhsd,bhtd->bhst', qh, kh) / math.sqrt(HD)
        a = jax.nn.softmax(s, axis=-1)
        ctx = jnp.einsum('bhst,bhtd->bhsd', a, vh).transpose(0, 2, 1, 3).reshape(B, S, D)
        attn = ctx @ p['wo'][l] + p['bo'][l]
        y = _layernorm(h + attn, p['g1'][l], p['be1'][l])
        ff = jnp.maximum(y @ p['w1'][l] + p['b1'][l], 0.0) @ p['w2'][l] + p['b2'][l]
        return _layernorm(y + ff, p['g2'][l], p['be2'][l])

    h = x + pe
    for l in range(L):
        h = layer(h, enc, l)
    h = _layernorm(h, enc['gf'], enc['bf'])
    h = h + pe
    for l in range(L):
        h = layer(h, dec, l)
    h = _layernorm(h, dec['gf'], dec['bf'])
    return h @ wout + bout


# ---------------- deterministic parameter / input construction ----------------
def make_positional_encoding():
    # exact reproduction of the PyTorch PositionalEncoding buffer (note: the source
    # uses 10000**(2*(i+1)/d_model) for the cosine term; replicated verbatim)
    pe = np.zeros((S, D), dtype=np.float32)
    for pos in range(S):
        for i in range(0, D, 2):
            pe[pos, i] = np.sin(pos / 10000 ** (2 * i / D))
            pe[pos, i + 1] = np.cos(pos / 10000 ** (2 * (i + 1) / D))
    return jnp.asarray(pe)[None]          # (1, S, D)


def make_stack_params(key):
    ks = jax.random.split(key, 12)
    n = lambda k, shape, s=0.05: s * jax.random.normal(k, shape, jnp.float32)
    return dict(
        wq=n(ks[0], (L, D, D)), bq=n(ks[1], (L, D), 0.01),
        wk=n(ks[2], (L, D, D)), bk=n(ks[3], (L, D), 0.01),
        wv=n(ks[4], (L, D, D)), bv=n(ks[5], (L, D), 0.01),
        wo=n(ks[6], (L, D, D)), bo=n(ks[7], (L, D), 0.01),
        w1=n(ks[8], (L, D, F)), b1=n(ks[9], (L, F), 0.01),
        w2=n(ks[10], (L, F, D)), b2=n(ks[11], (L, D), 0.01),
        g1=jnp.ones((L, D), jnp.float32), be1=jnp.zeros((L, D), jnp.float32),
        g2=jnp.ones((L, D), jnp.float32), be2=jnp.zeros((L, D), jnp.float32),
        gf=jnp.ones((D,), jnp.float32), bf=jnp.zeros((D,), jnp.float32),
    )


def pack_params(enc, dec, wout, bout):
    scale = 1.0 / math.sqrt(HD)            # folded into Wq / bq (one-time weight transform)
    stack = lambda name: jnp.concatenate([enc[name], dec[name]], axis=0)  # (NL, ...)
    wslab = jnp.concatenate([stack('wq') * scale, stack('wk'),
                             stack('wv'), stack('wo')], axis=-1)          # (NL, D, 4D)
    bslab = jnp.concatenate([stack('bq') * scale, stack('bk'),
                             stack('bv'), stack('bo')], axis=-1)[:, None, :]  # (NL,1,4D)
    w1 = stack('w1')                                                      # (NL, D, F)
    b1 = stack('b1')[:, None, :]                                          # (NL, 1, F)
    w2t = jnp.transpose(stack('w2'), (0, 2, 1))                           # (NL, D, F)
    lnv = jnp.stack([stack('g1'), stack('be1'),
                     stack('g2'), stack('be2'), stack('b2')], axis=1)     # (NL, 5, D)
    finv = jnp.stack([enc['gf'], enc['bf'], dec['gf'], dec['bf'], bout], axis=0)  # (5, D)
    # matmul weights in bf16 (MXU-native, halves their DMA/VMEM bytes);
    # biases / LN vectors stay f32.
    return (wslab.astype(jnp.bfloat16), bslab, w1.astype(jnp.bfloat16), b1,
            w2t.astype(jnp.bfloat16), lnv, wout.astype(jnp.bfloat16), finv)


if __name__ == "__main__":
    key = jax.random.PRNGKey(0)
    kx, ke, kd, kw, kb = jax.random.split(key, 5)
    x = jax.random.normal(kx, (B, S, D), jnp.float32)
    pe = make_positional_encoding()
    enc = make_stack_params(ke)
    dec = make_stack_params(kd)
    wout = 0.05 * jax.random.normal(kw, (D, D), jnp.float32)
    bout = 0.01 * jax.random.normal(kb, (D,), jnp.float32)

    packed = pack_params(enc, dec, wout, bout)
    out = jax.block_until_ready(transformer_forward(x, pe, packed))
    ref = jax.block_until_ready(ref_forward(x, pe, enc, dec, wout, bout))

    assert out.shape == (B, S, D)
    # tolerance accounts for bf16 MXU weights/activations vs the pure-f32 reference
    np.testing.assert_allclose(np.asarray(out), np.asarray(ref), rtol=2e-2, atol=2e-2)
    print("KERNEL_OK")
</pallas_src>

<mosaic_0001>
module attributes {stable_mosaic.version = 11 : i64} {
  func.func @transformer_kernel(%arg0: i32, %arg1: memref<16x32xf32, #tpu.memory_space<vmem>>, %arg2: memref<16x32xf32, #tpu.memory_space<vmem>>, %arg3: memref<4x32x128xbf16, #tpu.memory_space<vmem>>, %arg4: memref<4x1x128xf32, #tpu.memory_space<vmem>>, %arg5: memref<4x32x128xbf16, #tpu.memory_space<vmem>>, %arg6: memref<4x1x128xf32, #tpu.memory_space<vmem>>, %arg7: memref<4x32x128xbf16, #tpu.memory_space<vmem>>, %arg8: memref<4x5x32xf32, #tpu.memory_space<vmem>>, %arg9: memref<32x32xbf16, #tpu.memory_space<vmem>>, %arg10: memref<5x32xf32, #tpu.memory_space<vmem>>, %arg11: memref<16x32xf32, #tpu.memory_space<vmem>>) attributes {dimension_semantics = [#tpu.dimension_semantics<arbitrary>], iteration_bounds = array<i64: 1>, scalar_prefetch = 0 : i64, scratch_operands = 0 : i64, tpu.core_type = #tpu.core_type<tc>, window_params = [{pipeline_mode = #tpu.pipeline_mode<synchronous>, transform_indices = @transform_0, window_bounds = array<i64: 16, 32>}, {pipeline_mode = #tpu.pipeline_mode<synchronous>, transform_indices = @transform_1, window_bounds = array<i64: 16, 32>}, {pipeline_mode = #tpu.pipeline_mode<synchronous>, transform_indices = @transform_2, window_bounds = array<i64: 4, 32, 128>}, {pipeline_mode = #tpu.pipeline_mode<synchronous>, transform_indices = @transform_3, window_bounds = array<i64: 4, 1, 128>}, {pipeline_mode = #tpu.pipeline_mode<synchronous>, transform_indices = @transform_4, window_bounds = array<i64: 4, 32, 128>}, {pipeline_mode = #tpu.pipeline_mode<synchronous>, transform_indices = @transform_5, window_bounds = array<i64: 4, 1, 128>}, {pipeline_mode = #tpu.pipeline_mode<synchronous>, transform_indices = @transform_6, window_bounds = array<i64: 4, 32, 128>}, {pipeline_mode = #tpu.pipeline_mode<synchronous>, transform_indices = @transform_7, window_bounds = array<i64: 4, 5, 32>}, {pipeline_mode = #tpu.pipeline_mode<synchronous>, transform_indices = @transform_8, window_bounds = array<i64: 32, 32>}, {pipeline_mode = #tpu.pipeline_mode<synchronous>, transform_indices = @transform_9, window_bounds = array<i64: 5, 32>}, {pipeline_mode = #tpu.pipeline_mode<synchronous>, transform_indices = @transform_10, window_bounds = array<i64: 16, 32>}]} {
    %c0 = arith.constant 0 : index
    %c0_0 = arith.constant 0 : index
    %0 = vector.load %arg2[%c0, %c0_0] : memref<16x32xf32, #tpu.memory_space<vmem>>, vector<16x32xf32>
    %c0_1 = arith.constant 0 : index
    %c0_2 = arith.constant 0 : index
    %1 = vector.load %arg1[%c0_1, %c0_2] : memref<16x32xf32, #tpu.memory_space<vmem>>, vector<16x32xf32>
    %2 = arith.addf %1, %0 : vector<16x32xf32>
    %c0_3 = arith.constant 0 : index
    %c0_4 = arith.constant 0 : index
    %c0_5 = arith.constant 0 : index
    %3 = vector.load %arg3[%c0_3, %c0_4, %c0_5] : memref<4x32x128xbf16, #tpu.memory_space<vmem>>, vector<1x32x128xbf16>
    %4 = vector.shape_cast %3 : vector<1x32x128xbf16> to vector<32x128xbf16>
    %c0_6 = arith.constant 0 : index
    %c0_7 = arith.constant 0 : index
    %c0_8 = arith.constant 0 : index
    %5 = vector.load %arg4[%c0_6, %c0_7, %c0_8] : memref<4x1x128xf32, #tpu.memory_space<vmem>>, vector<1x1x128xf32>
    %6 = vector.shape_cast %5 : vector<1x1x128xf32> to vector<1x128xf32>
    %7 = arith.truncf %2 : vector<16x32xf32> to vector<16x32xbf16>
    %cst = arith.constant dense<0.000000e+00> : vector<16x128xf32>
    %8 = tpu.matmul %7, %4, %cst {dimension_numbers = #tpu.dot_dimension_numbers<[1], [0], [0], [1], [0, 0, 1, 1], [], []>} : vector<16x32xbf16>, vector<32x128xbf16>, vector<16x128xf32> -> vector<16x128xf32>
    %9 = vector.broadcast %6 : vector<1x128xf32> to vector<16x128xf32>
    %10 = arith.addf %8, %9 : vector<16x128xf32>
    %11 = vector.extract_strided_slice %10 {offsets = [0, 0], sizes = [16, 32], strides = [1, 1]} : vector<16x128xf32> to vector<16x32xf32>
    %12 = vector.extract_strided_slice %10 {offsets = [0, 32], sizes = [16, 32], strides = [1, 1]} : vector<16x128xf32> to vector<16x32xf32>
    %13 = vector.extract_strided_slice %10 {offsets = [0, 64], sizes = [16, 32], strides = [1, 1]} : vector<16x128xf32> to vector<16x32xf32>
    %14 = vector.extract_strided_slice %11 {offsets = [0, 0], sizes = [8, 8], strides = [1, 1]} : vector<16x32xf32> to vector<8x8xf32>
    %15 = vector.extract_strided_slice %11 {offsets = [0, 8], sizes = [8, 8], strides = [1, 1]} : vector<16x32xf32> to vector<8x8xf32>
    %16 = vector.extract_strided_slice %11 {offsets = [0, 16], sizes = [8, 8], strides = [1, 1]} : vector<16x32xf32> to vector<8x8xf32>
    %17 = vector.extract_strided_slice %11 {offsets = [0, 24], sizes = [8, 8], strides = [1, 1]} : vector<16x32xf32> to vector<8x8xf32>
    %18 = vector.extract_strided_slice %11 {offsets = [8, 0], sizes = [8, 8], strides = [1, 1]} : vector<16x32xf32> to vector<8x8xf32>
    %19 = vector.extract_strided_slice %11 {offsets = [8, 8], sizes = [8, 8], strides = [1, 1]} : vector<16x32xf32> to vector<8x8xf32>
    %20 = vector.extract_strided_slice %11 {offsets = [8, 16], sizes = [8, 8], strides = [1, 1]} : vector<16x32xf32> to vector<8x8xf32>
    %21 = vector.extract_strided_slice %11 {offsets = [8, 24], sizes = [8, 8], strides = [1, 1]} : vector<16x32xf32> to vector<8x8xf32>
    %22 = vector.shape_cast %14 : vector<8x8xf32> to vector<1x8x8xf32>
    %23 = vector.shape_cast %15 : vector<8x8xf32> to vector<1x8x8xf32>
    %24 = vector.shape_cast %16 : vector<8x8xf32> to vector<1x8x8xf32>
    %25 = vector.shape_cast %17 : vector<8x8xf32> to vector<1x8x8xf32>
    %26 = vector.shape_cast %18 : vector<8x8xf32> to vector<1x8x8xf32>
    %27 = vector.shape_cast %19 : vector<8x8xf32> to vector<1x8x8xf32>
    %28 = vector.shape_cast %20 : vector<8x8xf32> to vector<1x8x8xf32>
    %29 = vector.shape_cast %21 : vector<8x8xf32> to vector<1x8x8xf32>
    %30 = tpu.concatenate %22, %23, %24, %25, %26, %27, %28, %29 in 0 : vector<1x8x8xf32>, vector<1x8x8xf32>, vector<1x8x8xf32>, vector<1x8x8xf32>, vector<1x8x8xf32>, vector<1x8x8xf32>, vector<1x8x8xf32>, vector<1x8x8xf32> -> vector<8x8x8xf32>
    %31 = arith.truncf %30 : vector<8x8x8xf32> to vector<8x8x8xbf16>
    %32 = vector.extract_strided_slice %12 {offsets = [0, 0], sizes = [8, 8], strides = [1, 1]} : vector<16x32xf32> to vector<8x8xf32>
    %33 = vector.extract_strided_slice %12 {offsets = [0, 8], sizes = [8, 8], strides = [1, 1]} : vector<16x32xf32> to vector<8x8xf32>
    %34 = vector.extract_strided_slice %12 {offsets = [0, 16], sizes = [8, 8], strides = [1, 1]} : vector<16x32xf32> to vector<8x8xf32>
    %35 = vector.extract_strided_slice %12 {offsets = [0, 24], sizes = [8, 8], strides = [1, 1]} : vector<16x32xf32> to vector<8x8xf32>
    %36 = vector.extract_strided_slice %12 {offsets = [8, 0], sizes = [8, 8], strides = [1, 1]} : vector<16x32xf32> to vector<8x8xf32>
    %37 = vector.extract_strided_slice %12 {offsets = [8, 8], sizes = [8, 8], strides = [1, 1]} : vector<16x32xf32> to vector<8x8xf32>
    %38 = vector.extract_strided_slice %12 {offsets = [8, 16], sizes = [8, 8], strides = [1, 1]} : vector<16x32xf32> to vector<8x8xf32>
    %39 = vector.extract_strided_slice %12 {offsets = [8, 24], sizes = [8, 8], strides = [1, 1]} : vector<16x32xf32> to vector<8x8xf32>
    %40 = vector.shape_cast %32 : vector<8x8xf32> to vector<1x8x8xf32>
    %41 = vector.shape_cast %33 : vector<8x8xf32> to vector<1x8x8xf32>
    %42 = vector.shape_cast %34 : vector<8x8xf32> to vector<1x8x8xf32>
    %43 = vector.shape_cast %35 : vector<8x8xf32> to vector<1x8x8xf32>
    %44 = vector.shape_cast %36 : vector<8x8xf32> to vector<1x8x8xf32>
    %45 = vector.shape_cast %37 : vector<8x8xf32> to vector<1x8x8xf32>
    %46 = vector.shape_cast %38 : vector<8x8xf32> to vector<1x8x8xf32>
    %47 = vector.shape_cast %39 : vector<8x8xf32> to vector<1x8x8xf32>
    %48 = tpu.concatenate %40, %41, %42, %43, %44, %45, %46, %47 in 0 : vector<1x8x8xf32>, vector<1x8x8xf32>, vector<1x8x8xf32>, vector<1x8x8xf32>, vector<1x8x8xf32>, vector<1x8x8xf32>, vector<1x8x8xf32>, vector<1x8x8xf32> -> vector<8x8x8xf32>
    %49 = arith.truncf %48 : vector<8x8x8xf32> to vector<8x8x8xbf16>
    %50 = vector.extract_strided_slice %13 {offsets = [0, 0], sizes = [8, 8], strides = [1, 1]} : vector<16x32xf32> to vector<8x8xf32>
    %51 = vector.extract_strided_slice %13 {offsets = [0, 8], sizes = [8, 8], strides = [1, 1]} : vector<16x32xf32> to vector<8x8xf32>
    %52 = vector.extract_strided_slice %13 {offsets = [0, 16], sizes = [8, 8], strides = [1, 1]} : vector<16x32xf32> to vector<8x8xf32>
    %53 = vector.extract_strided_slice %13 {offsets = [0, 24], sizes = [8, 8], strides = [1, 1]} : vector<16x32xf32> to vector<8x8xf32>
    %54 = vector.extract_strided_slice %13 {offsets = [8, 0], sizes = [8, 8], strides = [1, 1]} : vector<16x32xf32> to vector<8x8xf32>
    %55 = vector.extract_strided_slice %13 {offsets = [8, 8], sizes = [8, 8], strides = [1, 1]} : vector<16x32xf32> to vector<8x8xf32>
    %56 = vector.extract_strided_slice %13 {offsets = [8, 16], sizes = [8, 8], strides = [1, 1]} : vector<16x32xf32> to vector<8x8xf32>
    %57 = vector.extract_strided_slice %13 {offsets = [8, 24], sizes = [8, 8], strides = [1, 1]} : vector<16x32xf32> to vector<8x8xf32>
    %58 = vector.shape_cast %50 : vector<8x8xf32> to vector<1x8x8xf32>
    %59 = vector.shape_cast %51 : vector<8x8xf32> to vector<1x8x8xf32>
    %60 = vector.shape_cast %52 : vector<8x8xf32> to vector<1x8x8xf32>
    %61 = vector.shape_cast %53 : vector<8x8xf32> to vector<1x8x8xf32>
    %62 = vector.shape_cast %54 : vector<8x8xf32> to vector<1x8x8xf32>
    %63 = vector.shape_cast %55 : vector<8x8xf32> to vector<1x8x8xf32>
    %64 = vector.shape_cast %56 : vector<8x8xf32> to vector<1x8x8xf32>
    %65 = vector.shape_cast %57 : vector<8x8xf32> to vector<1x8x8xf32>
    %66 = tpu.concatenate %58, %59, %60, %61, %62, %63, %64, %65 in 0 : vector<1x8x8xf32>, vector<1x8x8xf32>, vector<1x8x8xf32>, vector<1x8x8xf32>, vector<1x8x8xf32>, vector<1x8x8xf32>, vector<1x8x8xf32>, vector<1x8x8xf32> -> vector<8x8x8xf32>
    %67 = arith.truncf %66 : vector<8x8x8xf32> to vector<8x8x8xbf16>
    "tpu.trace_start"() <{level = 10 : i32, message = "bsd,btd->bst"}> : () -> ()
    %cst_9 = arith.constant dense<0.000000e+00> : vector<8x8x8xf32>
    %68 = tpu.matmul %31, %49, %cst_9 {dimension_numbers = #tpu.dot_dimension_numbers<[2], [2], [1], [1], [0, 0, 0, 1, 1, 1], [0], [0]>} : vector<8x8x8xbf16>, vector<8x8x8xbf16>, vector<8x8x8xf32> -> vector<8x8x8xf32>
    "tpu.trace_stop"() : () -> ()
    %cst_10 = arith.constant dense<0xFF800000> : vector<8x8xf32>
    %69 = vector.multi_reduction <maximumf>, %68, %cst_10 [2] : vector<8x8x8xf32> to vector<8x8xf32>
    %70 = vector.shape_cast %69 : vector<8x8xf32> to vector<8x8x1xf32>
    %71 = vector.broadcast %70 : vector<8x8x1xf32> to vector<8x8x8xf32>
    %72 = arith.subf %68, %71 : vector<8x8x8xf32>
    %73 = math.exp %72 : vector<8x8x8xf32>
    %cst_11 = arith.constant dense<0.000000e+00> : vector<8x8xf32>
    %74 = vector.multi_reduction <add>, %73, %cst_11 [2] : vector<8x8x8xf32> to vector<8x8xf32>
    %75 = vector.shape_cast %74 : vector<8x8xf32> to vector<8x8x1xf32>
    %76 = tpu.reciprocal %75 {approx = true} : vector<8x8x1xf32> -> vector<8x8x1xf32>
    %77 = vector.broadcast %76 : vector<8x8x1xf32> to vector<8x8x8xf32>
    %78 = arith.mulf %73, %77 : vector<8x8x8xf32>
    %79 = arith.truncf %78 : vector<8x8x8xf32> to vector<8x8x8xbf16>
    "tpu.trace_start"() <{level = 10 : i32, message = "bst,btd->bsd"}> : () -> ()
    %cst_12 = arith.constant dense<0.000000e+00> : vector<8x8x8xf32>
    %80 = tpu.matmul %79, %67, %cst_12 {dimension_numbers = #tpu.dot_dimension_numbers<[2], [1], [1], [2], [0, 0, 0, 1, 1, 2], [0], [0]>} : vector<8x8x8xbf16>, vector<8x8x8xbf16>, vector<8x8x8xf32> -> vector<8x8x8xf32>
    "tpu.trace_stop"() : () -> ()
    %81 = vector.extract_strided_slice %80 {offsets = [0, 0, 0], sizes = [1, 8, 8], strides = [1, 1, 1]} : vector<8x8x8xf32> to vector<1x8x8xf32>
    %82 = vector.shape_cast %81 : vector<1x8x8xf32> to vector<8x8xf32>
    %83 = vector.extract_strided_slice %80 {offsets = [1, 0, 0], sizes = [1, 8, 8], strides = [1, 1, 1]} : vector<8x8x8xf32> to vector<1x8x8xf32>
    %84 = vector.shape_cast %83 : vector<1x8x8xf32> to vector<8x8xf32>
    %85 = vector.extract_strided_slice %80 {offsets = [2, 0, 0], sizes = [1, 8, 8], strides = [1, 1, 1]} : vector<8x8x8xf32> to vector<1x8x8xf32>
    %86 = vector.shape_cast %85 : vector<1x8x8xf32> to vector<8x8xf32>
    %87 = vector.extract_strided_slice %80 {offsets = [3, 0, 0], sizes = [1, 8, 8], strides = [1, 1, 1]} : vector<8x8x8xf32> to vector<1x8x8xf32>
    %88 = vector.shape_cast %87 : vector<1x8x8xf32> to vector<8x8xf32>
    %89 = tpu.concatenate %82, %84, %86, %88 in 1 : vector<8x8xf32>, vector<8x8xf32>, vector<8x8xf32>, vector<8x8xf32> -> vector<8x32xf32>
    %90 = vector.extract_strided_slice %80 {offsets = [4, 0, 0], sizes = [1, 8, 8], strides = [1, 1, 1]} : vector<8x8x8xf32> to vector<1x8x8xf32>
    %91 = vector.shape_cast %90 : vector<1x8x8xf32> to vector<8x8xf32>
    %92 = vector.extract_strided_slice %80 {offsets = [5, 0, 0], sizes = [1, 8, 8], strides = [1, 1, 1]} : vector<8x8x8xf32> to vector<1x8x8xf32>
    %93 = vector.shape_cast %92 : vector<1x8x8xf32> to vector<8x8xf32>
    %94 = vector.extract_strided_slice %80 {offsets = [6, 0, 0], sizes = [1, 8, 8], strides = [1, 1, 1]} : vector<8x8x8xf32> to vector<1x8x8xf32>
    %95 = vector.shape_cast %94 : vector<1x8x8xf32> to vector<8x8xf32>
    %96 = vector.extract_strided_slice %80 {offsets = [7, 0, 0], sizes = [1, 8, 8], strides = [1, 1, 1]} : vector<8x8x8xf32> to vector<1x8x8xf32>
    %97 = vector.shape_cast %96 : vector<1x8x8xf32> to vector<8x8xf32>
    %98 = tpu.concatenate %91, %93, %95, %97 in 1 : vector<8x8xf32>, vector<8x8xf32>, vector<8x8xf32>, vector<8x8xf32> -> vector<8x32xf32>
    %99 = tpu.concatenate %89, %98 in 0 : vector<8x32xf32>, vector<8x32xf32> -> vector<16x32xf32>
    %100 = vector.extract_strided_slice %4 {offsets = [0, 96], sizes = [32, 32], strides = [1, 1]} : vector<32x128xbf16> to vector<32x32xbf16>
    %101 = vector.extract_strided_slice %6 {offsets = [0, 96], sizes = [1, 32], strides = [1, 1]} : vector<1x128xf32> to vector<1x32xf32>
    %102 = arith.truncf %99 : vector<16x32xf32> to vector<16x32xbf16>
    %cst_13 = arith.constant dense<0.000000e+00> : vector<16x32xf32>
    %103 = tpu.matmul %102, %100, %cst_13 {dimension_numbers = #tpu.dot_dimension_numbers<[1], [0], [0], [1], [0, 0, 1, 1], [], []>} : vector<16x32xbf16>, vector<32x32xbf16>, vector<16x32xf32> -> vector<16x32xf32>
    %104 = vector.broadcast %101 : vector<1x32xf32> to vector<16x32xf32>
    %105 = arith.addf %103, %104 : vector<16x32xf32>
    %c0_14 = arith.constant 0 : index
    %c0_15 = arith.constant 0 : index
    %c0_16 = arith.constant 0 : index
    %106 = vector.load %arg8[%c0_14, %c0_15, %c0_16] : memref<4x5x32xf32, #tpu.memory_space<vmem>>, vector<1x5x32xf32>
    %107 = vector.shape_cast %106 : vector<1x5x32xf32> to vector<5x32xf32>
    %108 = arith.addf %2, %105 : vector<16x32xf32>
    %109 = vector.extract_strided_slice %107 {offsets = [0, 0], sizes = [1, 32], strides = [1, 1]} : vector<5x32xf32> to vector<1x32xf32>
    %110 = vector.extract_strided_slice %107 {offsets = [1, 0], sizes = [1, 32], strides = [1, 1]} : vector<5x32xf32> to vector<1x32xf32>
    %cst_17 = arith.constant dense<0.000000e+00> : vector<16xf32>
    %111 = vector.multi_reduction <add>, %108, %cst_17 [1] : vector<16x32xf32> to vector<16xf32>
    %112 = vector.shape_cast %111 : vector<16xf32> to vector<16x1xf32>
    %cst_18 = arith.constant 3.200000e+01 : f32
    %113 = vector.broadcast %cst_18 : f32 to vector<16x1xf32>
    %114 = arith.divf %112, %113 : vector<16x1xf32>
    %115 = vector.broadcast %114 : vector<16x1xf32> to vector<16x32xf32>
    %116 = arith.subf %108, %115 : vector<16x32xf32>
    %117 = arith.mulf %116, %116 : vector<16x32xf32>
    %cst_19 = arith.constant dense<0.000000e+00> : vector<16xf32>
    %118 = vector.multi_reduction <add>, %117, %cst_19 [1] : vector<16x32xf32> to vector<16xf32>
    %119 = vector.shape_cast %118 : vector<16xf32> to vector<16x1xf32>
    %cst_20 = arith.constant 3.200000e+01 : f32
    %120 = vector.broadcast %cst_20 : f32 to vector<16x1xf32>
    %121 = arith.divf %119, %120 : vector<16x1xf32>
    %122 = vector.broadcast %114 : vector<16x1xf32> to vector<16x32xf32>
    %123 = arith.subf %108, %122 : vector<16x32xf32>
    %cst_21 = arith.constant 9.99999974E-6 : f32
    %124 = vector.broadcast %cst_21 : f32 to vector<16x1xf32>
    %125 = arith.addf %121, %124 : vector<16x1xf32>
    %126 = math.rsqrt %125 : vector<16x1xf32>
    %127 = vector.broadcast %126 : vector<16x1xf32> to vector<16x32xf32>
    %128 = arith.mulf %123, %127 : vector<16x32xf32>
    %129 = vector.broadcast %109 : vector<1x32xf32> to vector<16x32xf32>
    %130 = arith.mulf %128, %129 : vector<16x32xf32>
    %131 = vector.broadcast %110 : vector<1x32xf32> to vector<16x32xf32>
    %132 = arith.addf %130, %131 : vector<16x32xf32>
    %133 = arith.truncf %132 : vector<16x32xf32> to vector<16x32xbf16>
    %c0_22 = arith.constant 0 : index
    %c0_23 = arith.constant 0 : index
    %c0_24 = arith.constant 0 : index
    %134 = vector.load %arg5[%c0_22, %c0_23, %c0_24] : memref<4x32x128xbf16, #tpu.memory_space<vmem>>, vector<1x32x128xbf16>
    %135 = vector.shape_cast %134 : vector<1x32x128xbf16> to vector<32x128xbf16>
    %cst_25 = arith.constant dense<0.000000e+00> : vector<16x128xf32>
    %136 = tpu.matmul %133, %135, %cst_25 {dimension_numbers = #tpu.dot_dimension_numbers<[1], [0], [0], [1], [0, 0, 1, 1], [], []>} : vector<16x32xbf16>, vector<32x128xbf16>, vector<16x128xf32> -> vector<16x128xf32>
    %c0_26 = arith.constant 0 : index
    %c0_27 = arith.constant 0 : index
    %c0_28 = arith.constant 0 : index
    %137 = vector.load %arg6[%c0_26, %c0_27, %c0_28] : memref<4x1x128xf32, #tpu.memory_space<vmem>>, vector<1x1x128xf32>
    %138 = vector.shape_cast %137 : vector<1x1x128xf32> to vector<1x128xf32>
    %139 = vector.broadcast %138 : vector<1x128xf32> to vector<16x128xf32>
    %140 = arith.addf %136, %139 : vector<16x128xf32>
    %cst_29 = arith.constant 0.000000e+00 : f32
    %141 = vector.broadcast %cst_29 : f32 to vector<16x128xf32>
    %142 = arith.maximumf %140, %141 : vector<16x128xf32>
    %143 = arith.truncf %142 : vector<16x128xf32> to vector<16x128xbf16>
    %c0_30 = arith.constant 0 : index
    %c0_31 = arith.constant 0 : index
    %c0_32 = arith.constant 0 : index
    %144 = vector.load %arg7[%c0_30, %c0_31, %c0_32] : memref<4x32x128xbf16, #tpu.memory_space<vmem>>, vector<1x32x128xbf16>
    %145 = vector.shape_cast %144 : vector<1x32x128xbf16> to vector<32x128xbf16>
    %cst_33 = arith.constant dense<0.000000e+00> : vector<16x32xf32>
    %146 = tpu.matmul %143, %145, %cst_33 {dimension_numbers = #tpu.dot_dimension_numbers<[1], [1], [0], [0], [0, 0, 1, 0], [], []>} : vector<16x128xbf16>, vector<32x128xbf16>, vector<16x32xf32> -> vector<16x32xf32>
    %147 = vector.extract_strided_slice %107 {offsets = [4, 0], sizes = [1, 32], strides = [1, 1]} : vector<5x32xf32> to vector<1x32xf32>
    %148 = vector.broadcast %147 : vector<1x32xf32> to vector<16x32xf32>
    %149 = arith.addf %146, %148 : vector<16x32xf32>
    %150 = arith.addf %132, %149 : vector<16x32xf32>
    %151 = vector.extract_strided_slice %107 {offsets = [2, 0], sizes = [1, 32], strides = [1, 1]} : vector<5x32xf32> to vector<1x32xf32>
    %152 = vector.extract_strided_slice %107 {offsets = [3, 0], sizes = [1, 32], strides = [1, 1]} : vector<5x32xf32> to vector<1x32xf32>
    %cst_34 = arith.constant dense<0.000000e+00> : vector<16xf32>
    %153 = vector.multi_reduction <add>, %150, %cst_34 [1] : vector<16x32xf32> to vector<16xf32>
    %154 = vector.shape_cast %153 : vector<16xf32> to vector<16x1xf32>
    %cst_35 = arith.constant 3.200000e+01 : f32
    %155 = vector.broadcast %cst_35 : f32 to vector<16x1xf32>
    %156 = arith.divf %154, %155 : vector<16x1xf32>
    %157 = vector.broadcast %156 : vector<16x1xf32> to vector<16x32xf32>
    %158 = arith.subf %150, %157 : vector<16x32xf32>
    %159 = arith.mulf %158, %158 : vector<16x32xf32>
    %cst_36 = arith.constant dense<0.000000e+00> : vector<16xf32>
    %160 = vector.multi_reduction <add>, %159, %cst_36 [1] : vector<16x32xf32> to vector<16xf32>
    %161 = vector.shape_cast %160 : vector<16xf32> to vector<16x1xf32>
    %cst_37 = arith.constant 3.200000e+01 : f32
    %162 = vector.broadcast %cst_37 : f32 to vector<16x1xf32>
    %163 = arith.divf %161, %162 : vector<16x1xf32>
    %164 = vector.broadcast %156 : vector<16x1xf32> to vector<16x32xf32>
    %165 = arith.subf %150, %164 : vector<16x32xf32>
    %cst_38 = arith.constant 9.99999974E-6 : f32
    %166 = vector.broadcast %cst_38 : f32 to vector<16x1xf32>
    %167 = arith.addf %163, %166 : vector<16x1xf32>
    %168 = math.rsqrt %167 : vector<16x1xf32>
    %169 = vector.broadcast %168 : vector<16x1xf32> to vector<16x32xf32>
    %170 = arith.mulf %165, %169 : vector<16x32xf32>
    %171 = vector.broadcast %151 : vector<1x32xf32> to vector<16x32xf32>
    %172 = arith.mulf %170, %171 : vector<16x32xf32>
    %173 = vector.broadcast %152 : vector<1x32xf32> to vector<16x32xf32>
    %174 = arith.addf %172, %173 : vector<16x32xf32>
    %c1 = arith.constant 1 : index
    %c0_39 = arith.constant 0 : index
    %c0_40 = arith.constant 0 : index
    %175 = vector.load %arg3[%c1, %c0_39, %c0_40] : memref<4x32x128xbf16, #tpu.memory_space<vmem>>, vector<1x32x128xbf16>
    %176 = vector.shape_cast %175 : vector<1x32x128xbf16> to vector<32x128xbf16>
    %c1_41 = arith.constant 1 : index
    %c0_42 = arith.constant 0 : index
    %c0_43 = arith.constant 0 : index
    %177 = vector.load %arg4[%c1_41, %c0_42, %c0_43] : memref<4x1x128xf32, #tpu.memory_space<vmem>>, vector<1x1x128xf32>
    %178 = vector.shape_cast %177 : vector<1x1x128xf32> to vector<1x128xf32>
    %179 = arith.truncf %174 : vector<16x32xf32> to vector<16x32xbf16>
    %cst_44 = arith.constant dense<0.000000e+00> : vector<16x128xf32>
    %180 = tpu.matmul %179, %176, %cst_44 {dimension_numbers = #tpu.dot_dimension_numbers<[1], [0], [0], [1], [0, 0, 1, 1], [], []>} : vector<16x32xbf16>, vector<32x128xbf16>, vector<16x128xf32> -> vector<16x128xf32>
    %181 = vector.broadcast %178 : vector<1x128xf32> to vector<16x128xf32>
    %182 = arith.addf %180, %181 : vector<16x128xf32>
    %183 = vector.extract_strided_slice %182 {offsets = [0, 0], sizes = [16, 32], strides = [1, 1]} : vector<16x128xf32> to vector<16x32xf32>
    %184 = vector.extract_strided_slice %182 {offsets = [0, 32], sizes = [16, 32], strides = [1, 1]} : vector<16x128xf32> to vector<16x32xf32>
    %185 = vector.extract_strided_slice %182 {offsets = [0, 64], sizes = [16, 32], strides = [1, 1]} : vector<16x128xf32> to vector<16x32xf32>
    %186 = vector.extract_strided_slice %183 {offsets = [0, 0], sizes = [8, 8], strides = [1, 1]} : vector<16x32xf32> to vector<8x8xf32>
    %187 = vector.extract_strided_slice %183 {offsets = [0, 8], sizes = [8, 8], strides = [1, 1]} : vector<16x32xf32> to vector<8x8xf32>
    %188 = vector.extract_strided_slice %183 {offsets = [0, 16], sizes = [8, 8], strides = [1, 1]} : vector<16x32xf32> to vector<8x8xf32>
    %189 = vector.extract_strided_slice %183 {offsets = [0, 24], sizes = [8, 8], strides = [1, 1]} : vector<16x32xf32> to vector<8x8xf32>
    %190 = vector.extract_strided_slice %183 {offsets = [8, 0], sizes = [8, 8], strides = [1, 1]} : vector<16x32xf32> to vector<8x8xf32>
    %191 = vector.extract_strided_slice %183 {offsets = [8, 8], sizes = [8, 8], strides = [1, 1]} : vector<16x32xf32> to vector<8x8xf32>
    %192 = vector.extract_strided_slice %183 {offsets = [8, 16], sizes = [8, 8], strides = [1, 1]} : vector<16x32xf32> to vector<8x8xf32>
    %193 = vector.extract_strided_slice %183 {offsets = [8, 24], sizes = [8, 8], strides = [1, 1]} : vector<16x32xf32> to vector<8x8xf32>
    %194 = vector.shape_cast %186 : vector<8x8xf32> to vector<1x8x8xf32>
    %195 = vector.shape_cast %187 : vector<8x8xf32> to vector<1x8x8xf32>
    %196 = vector.shape_cast %188 : vector<8x8xf32> to vector<1x8x8xf32>
    %197 = vector.shape_cast %189 : vector<8x8xf32> to vector<1x8x8xf32>
    %198 = vector.shape_cast %190 : vector<8x8xf32> to vector<1x8x8xf32>
    %199 = vector.shape_cast %191 : vector<8x8xf32> to vector<1x8x8xf32>
    %200 = vector.shape_cast %192 : vector<8x8xf32> to vector<1x8x8xf32>
    %201 = vector.shape_cast %193 : vector<8x8xf32> to vector<1x8x8xf32>
    %202 = tpu.concatenate %194, %195, %196, %197, %198, %199, %200, %201 in 0 : vector<1x8x8xf32>, vector<1x8x8xf32>, vector<1x8x8xf32>, vector<1x8x8xf32>, vector<1x8x8xf32>, vector<1x8x8xf32>, vector<1x8x8xf32>, vector<1x8x8xf32> -> vector<8x8x8xf32>
    %203 = arith.truncf %202 : vector<8x8x8xf32> to vector<8x8x8xbf16>
    %204 = vector.extract_strided_slice %184 {offsets = [0, 0], sizes = [8, 8], strides = [1, 1]} : vector<16x32xf32> to vector<8x8xf32>
    %205 = vector.extract_strided_slice %184 {offsets = [0, 8], sizes = [8, 8], strides = [1, 1]} : vector<16x32xf32> to vector<8x8xf32>
    %206 = vector.extract_strided_slice %184 {offsets = [0, 16], sizes = [8, 8], strides = [1, 1]} : vector<16x32xf32> to vector<8x8xf32>
    %207 = vector.extract_strided_slice %184 {offsets = [0, 24], sizes = [8, 8], strides = [1, 1]} : vector<16x32xf32> to vector<8x8xf32>
    %208 = vector.extract_strided_slice %184 {offsets = [8, 0], sizes = [8, 8], strides = [1, 1]} : vector<16x32xf32> to vector<8x8xf32>
    %209 = vector.extract_strided_slice %184 {offsets = [8, 8], sizes = [8, 8], strides = [1, 1]} : vector<16x32xf32> to vector<8x8xf32>
    %210 = vector.extract_strided_slice %184 {offsets = [8, 16], sizes = [8, 8], strides = [1, 1]} : vector<16x32xf32> to vector<8x8xf32>
    %211 = vector.extract_strided_slice %184 {offsets = [8, 24], sizes = [8, 8], strides = [1, 1]} : vector<16x32xf32> to vector<8x8xf32>
    %212 = vector.shape_cast %204 : vector<8x8xf32> to vector<1x8x8xf32>
    %213 = vector.shape_cast %205 : vector<8x8xf32> to vector<1x8x8xf32>
    %214 = vector.shape_cast %206 : vector<8x8xf32> to vector<1x8x8xf32>
    %215 = vector.shape_cast %207 : vector<8x8xf32> to vector<1x8x8xf32>
    %216 = vector.shape_cast %208 : vector<8x8xf32> to vector<1x8x8xf32>
    %217 = vector.shape_cast %209 : vector<8x8xf32> to vector<1x8x8xf32>
    %218 = vector.shape_cast %210 : vector<8x8xf32> to vector<1x8x8xf32>
    %219 = vector.shape_cast %211 : vector<8x8xf32> to vector<1x8x8xf32>
    %220 = tpu.concatenate %212, %213, %214, %215, %216, %217, %218, %219 in 0 : vector<1x8x8xf32>, vector<1x8x8xf32>, vector<1x8x8xf32>, vector<1x8x8xf32>, vector<1x8x8xf32>, vector<1x8x8xf32>, vector<1x8x8xf32>, vector<1x8x8xf32> -> vector<8x8x8xf32>
    %221 = arith.truncf %220 : vector<8x8x8xf32> to vector<8x8x8xbf16>
    %222 = vector.extract_strided_slice %185 {offsets = [0, 0], sizes = [8, 8], strides = [1, 1]} : vector<16x32xf32> to vector<8x8xf32>
    %223 = vector.extract_strided_slice %185 {offsets = [0, 8], sizes = [8, 8], strides = [1, 1]} : vector<16x32xf32> to vector<8x8xf32>
    %224 = vector.extract_strided_slice %185 {offsets = [0, 16], sizes = [8, 8], strides = [1, 1]} : vector<16x32xf32> to vector<8x8xf32>
    %225 = vector.extract_strided_slice %185 {offsets = [0, 24], sizes = [8, 8], strides = [1, 1]} : vector<16x32xf32> to vector<8x8xf32>
    %226 = vector.extract_strided_slice %185 {offsets = [8, 0], sizes = [8, 8], strides = [1, 1]} : vector<16x32xf32> to vector<8x8xf32>
    %227 = vector.extract_strided_slice %185 {offsets = [8, 8], sizes = [8, 8], strides = [1, 1]} : vector<16x32xf32> to vector<8x8xf32>
    %228 = vector.extract_strided_slice %185 {offsets = [8, 16], sizes = [8, 8], strides = [1, 1]} : vector<16x32xf32> to vector<8x8xf32>
    %229 = vector.extract_strided_slice %185 {offsets = [8, 24], sizes = [8, 8], strides = [1, 1]} : vector<16x32xf32> to vector<8x8xf32>
    %230 = vector.shape_cast %222 : vector<8x8xf32> to vector<1x8x8xf32>
    %231 = vector.shape_cast %223 : vector<8x8xf32> to vector<1x8x8xf32>
    %232 = vector.shape_cast %224 : vector<8x8xf32> to vector<1x8x8xf32>
    %233 = vector.shape_cast %225 : vector<8x8xf32> to vector<1x8x8xf32>
    %234 = vector.shape_cast %226 : vector<8x8xf32> to vector<1x8x8xf32>
    %235 = vector.shape_cast %227 : vector<8x8xf32> to vector<1x8x8xf32>
    %236 = vector.shape_cast %228 : vector<8x8xf32> to vector<1x8x8xf32>
    %237 = vector.shape_cast %229 : vector<8x8xf32> to vector<1x8x8xf32>
    %238 = tpu.concatenate %230, %231, %232, %233, %234, %235, %236, %237 in 0 : vector<1x8x8xf32>, vector<1x8x8xf32>, vector<1x8x8xf32>, vector<1x8x8xf32>, vector<1x8x8xf32>, vector<1x8x8xf32>, vector<1x8x8xf32>, vector<1x8x8xf32> -> vector<8x8x8xf32>
    %239 = arith.truncf %238 : vector<8x8x8xf32> to vector<8x8x8xbf16>
    "tpu.trace_start"() <{level = 10 : i32, message = "bsd,btd->bst"}> : () -> ()
    %cst_45 = arith.constant dense<0.000000e+00> : vector<8x8x8xf32>
    %240 = tpu.matmul %203, %221, %cst_45 {dimension_numbers = #tpu.dot_dimension_numbers<[2], [2], [1], [1], [0, 0, 0, 1, 1, 1], [0], [0]>} : vector<8x8x8xbf16>, vector<8x8x8xbf16>, vector<8x8x8xf32> -> vector<8x8x8xf32>
    "tpu.trace_stop"() : () -> ()
    %cst_46 = arith.constant dense<0xFF800000> : vector<8x8xf32>
    %241 = vector.multi_reduction <maximumf>, %240, %cst_46 [2] : vector<8x8x8xf32> to vector<8x8xf32>
    %242 = vector.shape_cast %241 : vector<8x8xf32> to vector<8x8x1xf32>
    %243 = vector.broadcast %242 : vector<8x8x1xf32> to vector<8x8x8xf32>
    %244 = arith.subf %240, %243 : vector<8x8x8xf32>
    %245 = math.exp %244 : vector<8x8x8xf32>
    %cst_47 = arith.constant dense<0.000000e+00> : vector<8x8xf32>
    %246 = vector.multi_reduction <add>, %245, %cst_47 [2] : vector<8x8x8xf32> to vector<8x8xf32>
    %247 = vector.shape_cast %246 : vector<8x8xf32> to vector<8x8x1xf32>
    %248 = tpu.reciprocal %247 {approx = true} : vector<8x8x1xf32> -> vector<8x8x1xf32>
    %249 = vector.broadcast %248 : vector<8x8x1xf32> to vector<8x8x8xf32>
    %250 = arith.mulf %245, %249 : vector<8x8x8xf32>
    %251 = arith.truncf %250 : vector<8x8x8xf32> to vector<8x8x8xbf16>
    "tpu.trace_start"() <{level = 10 : i32, message = "bst,btd->bsd"}> : () -> ()
    %cst_48 = arith.constant dense<0.000000e+00> : vector<8x8x8xf32>
    %252 = tpu.matmul %251, %239, %cst_48 {dimension_numbers = #tpu.dot_dimension_numbers<[2], [1], [1], [2], [0, 0, 0, 1, 1, 2], [0], [0]>} : vector<8x8x8xbf16>, vector<8x8x8xbf16>, vector<8x8x8xf32> -> vector<8x8x8xf32>
    "tpu.trace_stop"() : () -> ()
    %253 = vector.extract_strided_slice %252 {offsets = [0, 0, 0], sizes = [1, 8, 8], strides = [1, 1, 1]} : vector<8x8x8xf32> to vector<1x8x8xf32>
    %254 = vector.shape_cast %253 : vector<1x8x8xf32> to vector<8x8xf32>
    %255 = vector.extract_strided_slice %252 {offsets = [1, 0, 0], sizes = [1, 8, 8], strides = [1, 1, 1]} : vector<8x8x8xf32> to vector<1x8x8xf32>
    %256 = vector.shape_cast %255 : vector<1x8x8xf32> to vector<8x8xf32>
    %257 = vector.extract_strided_slice %252 {offsets = [2, 0, 0], sizes = [1, 8, 8], strides = [1, 1, 1]} : vector<8x8x8xf32> to vector<1x8x8xf32>
    %258 = vector.shape_cast %257 : vector<1x8x8xf32> to vector<8x8xf32>
    %259 = vector.extract_strided_slice %252 {offsets = [3, 0, 0], sizes = [1, 8, 8], strides = [1, 1, 1]} : vector<8x8x8xf32> to vector<1x8x8xf32>
    %260 = vector.shape_cast %259 : vector<1x8x8xf32> to vector<8x8xf32>
    %261 = tpu.concatenate %254, %256, %258, %260 in 1 : vector<8x8xf32>, vector<8x8xf32>, vector<8x8xf32>, vector<8x8xf32> -> vector<8x32xf32>
    %262 = vector.extract_strided_slice %252 {offsets = [4, 0, 0], sizes = [1, 8, 8], strides = [1, 1, 1]} : vector<8x8x8xf32> to vector<1x8x8xf32>
    %263 = vector.shape_cast %262 : vector<1x8x8xf32> to vector<8x8xf32>
    %264 = vector.extract_strided_slice %252 {offsets = [5, 0, 0], sizes = [1, 8, 8], strides = [1, 1, 1]} : vector<8x8x8xf32> to vector<1x8x8xf32>
    %265 = vector.shape_cast %264 : vector<1x8x8xf32> to vector<8x8xf32>
    %266 = vector.extract_strided_slice %252 {offsets = [6, 0, 0], sizes = [1, 8, 8], strides = [1, 1, 1]} : vector<8x8x8xf32> to vector<1x8x8xf32>
    %267 = vector.shape_cast %266 : vector<1x8x8xf32> to vector<8x8xf32>
    %268 = vector.extract_strided_slice %252 {offsets = [7, 0, 0], sizes = [1, 8, 8], strides = [1, 1, 1]} : vector<8x8x8xf32> to vector<1x8x8xf32>
    %269 = vector.shape_cast %268 : vector<1x8x8xf32> to vector<8x8xf32>
    %270 = tpu.concatenate %263, %265, %267, %269 in 1 : vector<8x8xf32>, vector<8x8xf32>, vector<8x8xf32>, vector<8x8xf32> -> vector<8x32xf32>
    %271 = tpu.concatenate %261, %270 in 0 : vector<8x32xf32>, vector<8x32xf32> -> vector<16x32xf32>
    %272 = vector.extract_strided_slice %176 {offsets = [0, 96], sizes = [32, 32], strides = [1, 1]} : vector<32x128xbf16> to vector<32x32xbf16>
    %273 = vector.extract_strided_slice %178 {offsets = [0, 96], sizes = [1, 32], strides = [1, 1]} : vector<1x128xf32> to vector<1x32xf32>
    %274 = arith.truncf %271 : vector<16x32xf32> to vector<16x32xbf16>
    %cst_49 = arith.constant dense<0.000000e+00> : vector<16x32xf32>
    %275 = tpu.matmul %274, %272, %cst_49 {dimension_numbers = #tpu.dot_dimension_numbers<[1], [0], [0], [1], [0, 0, 1, 1], [], []>} : vector<16x32xbf16>, vector<32x32xbf16>, vector<16x32xf32> -> vector<16x32xf32>
    %276 = vector.broadcast %273 : vector<1x32xf32> to vector<16x32xf32>
    %277 = arith.addf %275, %276 : vector<16x32xf32>
    %c1_50 = arith.constant 1 : index
    %c0_51 = arith.constant 0 : index
    %c0_52 = arith.constant 0 : index
    %278 = vector.load %arg8[%c1_50, %c0_51, %c0_52] : memref<4x5x32xf32, #tpu.memory_space<vmem>>, vector<1x5x32xf32>
    %279 = vector.shape_cast %278 : vector<1x5x32xf32> to vector<5x32xf32>
    %280 = arith.addf %174, %277 : vector<16x32xf32>
    %281 = vector.extract_strided_slice %279 {offsets = [0, 0], sizes = [1, 32], strides = [1, 1]} : vector<5x32xf32> to vector<1x32xf32>
    %282 = vector.extract_strided_slice %279 {offsets = [1, 0], sizes = [1, 32], strides = [1, 1]} : vector<5x32xf32> to vector<1x32xf32>
    %cst_53 = arith.constant dense<0.000000e+00> : vector<16xf32>
    %283 = vector.multi_reduction <add>, %280, %cst_53 [1] : vector<16x32xf32> to vector<16xf32>
    %284 = vector.shape_cast %283 : vector<16xf32> to vector<16x1xf32>
    %cst_54 = arith.constant 3.200000e+01 : f32
    %285 = vector.broadcast %cst_54 : f32 to vector<16x1xf32>
    %286 = arith.divf %284, %285 : vector<16x1xf32>
    %287 = vector.broadcast %286 : vector<16x1xf32> to vector<16x32xf32>
    %288 = arith.subf %280, %287 : vector<16x32xf32>
    %289 = arith.mulf %288, %288 : vector<16x32xf32>
    %cst_55 = arith.constant dense<0.000000e+00> : vector<16xf32>
    %290 = vector.multi_reduction <add>, %289, %cst_55 [1] : vector<16x32xf32> to vector<16xf32>
    %291 = vector.shape_cast %290 : vector<16xf32> to vector<16x1xf32>
    %cst_56 = arith.constant 3.200000e+01 : f32
    %292 = vector.broadcast %cst_56 : f32 to vector<16x1xf32>
    %293 = arith.divf %291, %292 : vector<16x1xf32>
    %294 = vector.broadcast %286 : vector<16x1xf32> to vector<16x32xf32>
    %295 = arith.subf %280, %294 : vector<16x32xf32>
    %cst_57 = arith.constant 9.99999974E-6 : f32
    %296 = vector.broadcast %cst_57 : f32 to vector<16x1xf32>
    %297 = arith.addf %293, %296 : vector<16x1xf32>
    %298 = math.rsqrt %297 : vector<16x1xf32>
    %299 = vector.broadcast %298 : vector<16x1xf32> to vector<16x32xf32>
    %300 = arith.mulf %295, %299 : vector<16x32xf32>
    %301 = vector.broadcast %281 : vector<1x32xf32> to vector<16x32xf32>
    %302 = arith.mulf %300, %301 : vector<16x32xf32>
    %303 = vector.broadcast %282 : vector<1x32xf32> to vector<16x32xf32>
    %304 = arith.addf %302, %303 : vector<16x32xf32>
    %305 = arith.truncf %304 : vector<16x32xf32> to vector<16x32xbf16>
    %c1_58 = arith.constant 1 : index
    %c0_59 = arith.constant 0 : index
    %c0_60 = arith.constant 0 : index
    %306 = vector.load %arg5[%c1_58, %c0_59, %c0_60] : memref<4x32x128xbf16, #tpu.memory_space<vmem>>, vector<1x32x128xbf16>
    %307 = vector.shape_cast %306 : vector<1x32x128xbf16> to vector<32x128xbf16>
    %cst_61 = arith.constant dense<0.000000e+00> : vector<16x128xf32>
    %308 = tpu.matmul %305, %307, %cst_61 {dimension_numbers = #tpu.dot_dimension_numbers<[1], [0], [0], [1], [0, 0, 1, 1], [], []>} : vector<16x32xbf16>, vector<32x128xbf16>, vector<16x128xf32> -> vector<16x128xf32>
    %c1_62 = arith.constant 1 : index
    %c0_63 = arith.constant 0 : index
    %c0_64 = arith.constant 0 : index
    %309 = vector.load %arg6[%c1_62, %c0_63, %c0_64] : memref<4x1x128xf32, #tpu.memory_space<vmem>>, vector<1x1x128xf32>
    %310 = vector.shape_cast %309 : vector<1x1x128xf32> to vector<1x128xf32>
    %311 = vector.broadcast %310 : vector<1x128xf32> to vector<16x128xf32>
    %312 = arith.addf %308, %311 : vector<16x128xf32>
    %cst_65 = arith.constant 0.000000e+00 : f32
    %313 = vector.broadcast %cst_65 : f32 to vector<16x128xf32>
    %314 = arith.maximumf %312, %313 : vector<16x128xf32>
    %315 = arith.truncf %314 : vector<16x128xf32> to vector<16x128xbf16>
    %c1_66 = arith.constant 1 : index
    %c0_67 = arith.constant 0 : index
    %c0_68 = arith.constant 0 : index
    %316 = vector.load %arg7[%c1_66, %c0_67, %c0_68] : memref<4x32x128xbf16, #tpu.memory_space<vmem>>, vector<1x32x128xbf16>
    %317 = vector.shape_cast %316 : vector<1x32x128xbf16> to vector<32x128xbf16>
    %cst_69 = arith.constant dense<0.000000e+00> : vector<16x32xf32>
    %318 = tpu.matmul %315, %317, %cst_69 {dimension_numbers = #tpu.dot_dimension_numbers<[1], [1], [0], [0], [0, 0, 1, 0], [], []>} : vector<16x128xbf16>, vector<32x128xbf16>, vector<16x32xf32> -> vector<16x32xf32>
    %319 = vector.extract_strided_slice %279 {offsets = [4, 0], sizes = [1, 32], strides = [1, 1]} : vector<5x32xf32> to vector<1x32xf32>
    %320 = vector.broadcast %319 : vector<1x32xf32> to vector<16x32xf32>
    %321 = arith.addf %318, %320 : vector<16x32xf32>
    %322 = arith.addf %304, %321 : vector<16x32xf32>
    %323 = vector.extract_strided_slice %279 {offsets = [2, 0], sizes = [1, 32], strides = [1, 1]} : vector<5x32xf32> to vector<1x32xf32>
    %324 = vector.extract_strided_slice %279 {offsets = [3, 0], sizes = [1, 32], strides = [1, 1]} : vector<5x32xf32> to vector<1x32xf32>
    %cst_70 = arith.constant dense<0.000000e+00> : vector<16xf32>
    %325 = vector.multi_reduction <add>, %322, %cst_70 [1] : vector<16x32xf32> to vector<16xf32>
    %326 = vector.shape_cast %325 : vector<16xf32> to vector<16x1xf32>
    %cst_71 = arith.constant 3.200000e+01 : f32
    %327 = vector.broadcast %cst_71 : f32 to vector<16x1xf32>
    %328 = arith.divf %326, %327 : vector<16x1xf32>
    %329 = vector.broadcast %328 : vector<16x1xf32> to vector<16x32xf32>
    %330 = arith.subf %322, %329 : vector<16x32xf32>
    %331 = arith.mulf %330, %330 : vector<16x32xf32>
    %cst_72 = arith.constant dense<0.000000e+00> : vector<16xf32>
    %332 = vector.multi_reduction <add>, %331, %cst_72 [1] : vector<16x32xf32> to vector<16xf32>
    %333 = vector.shape_cast %332 : vector<16xf32> to vector<16x1xf32>
    %cst_73 = arith.constant 3.200000e+01 : f32
    %334 = vector.broadcast %cst_73 : f32 to vector<16x1xf32>
    %335 = arith.divf %333, %334 : vector<16x1xf32>
    %336 = vector.broadcast %328 : vector<16x1xf32> to vector<16x32xf32>
    %337 = arith.subf %322, %336 : vector<16x32xf32>
    %cst_74 = arith.constant 9.99999974E-6 : f32
    %338 = vector.broadcast %cst_74 : f32 to vector<16x1xf32>
    %339 = arith.addf %335, %338 : vector<16x1xf32>
    %340 = math.rsqrt %339 : vector<16x1xf32>
    %341 = vector.broadcast %340 : vector<16x1xf32> to vector<16x32xf32>
    %342 = arith.mulf %337, %341 : vector<16x32xf32>
    %343 = vector.broadcast %323 : vector<1x32xf32> to vector<16x32xf32>
    %344 = arith.mulf %342, %343 : vector<16x32xf32>
    %345 = vector.broadcast %324 : vector<1x32xf32> to vector<16x32xf32>
    %346 = arith.addf %344, %345 : vector<16x32xf32>
    %c0_75 = arith.constant 0 : index
    %c0_76 = arith.constant 0 : index
    %347 = vector.load %arg10[%c0_75, %c0_76] : memref<5x32xf32, #tpu.memory_space<vmem>>, vector<1x32xf32>
    %c1_77 = arith.constant 1 : index
    %c0_78 = arith.constant 0 : index
    %348 = vector.load %arg10[%c1_77, %c0_78] : memref<5x32xf32, #tpu.memory_space<vmem>>, vector<1x32xf32>
    %cst_79 = arith.constant dense<0.000000e+00> : vector<16xf32>
    %349 = vector.multi_reduction <add>, %346, %cst_79 [1] : vector<16x32xf32> to vector<16xf32>
    %350 = vector.shape_cast %349 : vector<16xf32> to vector<16x1xf32>
    %cst_80 = arith.constant 3.200000e+01 : f32
    %351 = vector.broadcast %cst_80 : f32 to vector<16x1xf32>
    %352 = arith.divf %350, %351 : vector<16x1xf32>
    %353 = vector.broadcast %352 : vector<16x1xf32> to vector<16x32xf32>
    %354 = arith.subf %346, %353 : vector<16x32xf32>
    %355 = arith.mulf %354, %354 : vector<16x32xf32>
    %cst_81 = arith.constant dense<0.000000e+00> : vector<16xf32>
    %356 = vector.multi_reduction <add>, %355, %cst_81 [1] : vector<16x32xf32> to vector<16xf32>
    %357 = vector.shape_cast %356 : vector<16xf32> to vector<16x1xf32>
    %cst_82 = arith.constant 3.200000e+01 : f32
    %358 = vector.broadcast %cst_82 : f32 to vector<16x1xf32>
    %359 = arith.divf %357, %358 : vector<16x1xf32>
    %360 = vector.broadcast %352 : vector<16x1xf32> to vector<16x32xf32>
    %361 = arith.subf %346, %360 : vector<16x32xf32>
    %cst_83 = arith.constant 9.99999974E-6 : f32
    %362 = vector.broadcast %cst_83 : f32 to vector<16x1xf32>
    %363 = arith.addf %359, %362 : vector<16x1xf32>
    %364 = math.rsqrt %363 : vector<16x1xf32>
    %365 = vector.broadcast %364 : vector<16x1xf32> to vector<16x32xf32>
    %366 = arith.mulf %361, %365 : vector<16x32xf32>
    %367 = vector.broadcast %347 : vector<1x32xf32> to vector<16x32xf32>
    %368 = arith.mulf %366, %367 : vector<16x32xf32>
    %369 = vector.broadcast %348 : vector<1x32xf32> to vector<16x32xf32>
    %370 = arith.addf %368, %369 : vector<16x32xf32>
    %371 = arith.addf %370, %0 : vector<16x32xf32>
    %c2 = arith.constant 2 : index
    %c0_84 = arith.constant 0 : index
    %c0_85 = arith.constant 0 : index
    %372 = vector.load %arg3[%c2, %c0_84, %c0_85] : memref<4x32x128xbf16, #tpu.memory_space<vmem>>, vector<1x32x128xbf16>
    %373 = vector.shape_cast %372 : vector<1x32x128xbf16> to vector<32x128xbf16>
    %c2_86 = arith.constant 2 : index
    %c0_87 = arith.constant 0 : index
    %c0_88 = arith.constant 0 : index
    %374 = vector.load %arg4[%c2_86, %c0_87, %c0_88] : memref<4x1x128xf32, #tpu.memory_space<vmem>>, vector<1x1x128xf32>
    %375 = vector.shape_cast %374 : vector<1x1x128xf32> to vector<1x128xf32>
    %376 = arith.truncf %371 : vector<16x32xf32> to vector<16x32xbf16>
    %cst_89 = arith.constant dense<0.000000e+00> : vector<16x128xf32>
    %377 = tpu.matmul %376, %373, %cst_89 {dimension_numbers = #tpu.dot_dimension_numbers<[1], [0], [0], [1], [0, 0, 1, 1], [], []>} : vector<16x32xbf16>, vector<32x128xbf16>, vector<16x128xf32> -> vector<16x128xf32>
    %378 = vector.broadcast %375 : vector<1x128xf32> to vector<16x128xf32>
    %379 = arith.addf %377, %378 : vector<16x128xf32>
    %380 = vector.extract_strided_slice %379 {offsets = [0, 0], sizes = [16, 32], strides = [1, 1]} : vector<16x128xf32> to vector<16x32xf32>
    %381 = vector.extract_strided_slice %379 {offsets = [0, 32], sizes = [16, 32], strides = [1, 1]} : vector<16x128xf32> to vector<16x32xf32>
    %382 = vector.extract_strided_slice %379 {offsets = [0, 64], sizes = [16, 32], strides = [1, 1]} : vector<16x128xf32> to vector<16x32xf32>
    %383 = vector.extract_strided_slice %380 {offsets = [0, 0], sizes = [8, 8], strides = [1, 1]} : vector<16x32xf32> to vector<8x8xf32>
    %384 = vector.extract_strided_slice %380 {offsets = [0, 8], sizes = [8, 8], strides = [1, 1]} : vector<16x32xf32> to vector<8x8xf32>
    %385 = vector.extract_strided_slice %380 {offsets = [0, 16], sizes = [8, 8], strides = [1, 1]} : vector<16x32xf32> to vector<8x8xf32>
    %386 = vector.extract_strided_slice %380 {offsets = [0, 24], sizes = [8, 8], strides = [1, 1]} : vector<16x32xf32> to vector<8x8xf32>
    %387 = vector.extract_strided_slice %380 {offsets = [8, 0], sizes = [8, 8], strides = [1, 1]} : vector<16x32xf32> to vector<8x8xf32>
    %388 = vector.extract_strided_slice %380 {offsets = [8, 8], sizes = [8, 8], strides = [1, 1]} : vector<16x32xf32> to vector<8x8xf32>
    %389 = vector.extract_strided_slice %380 {offsets = [8, 16], sizes = [8, 8], strides = [1, 1]} : vector<16x32xf32> to vector<8x8xf32>
    %390 = vector.extract_strided_slice %380 {offsets = [8, 24], sizes = [8, 8], strides = [1, 1]} : vector<16x32xf32> to vector<8x8xf32>
    %391 = vector.shape_cast %383 : vector<8x8xf32> to vector<1x8x8xf32>
    %392 = vector.shape_cast %384 : vector<8x8xf32> to vector<1x8x8xf32>
    %393 = vector.shape_cast %385 : vector<8x8xf32> to vector<1x8x8xf32>
    %394 = vector.shape_cast %386 : vector<8x8xf32> to vector<1x8x8xf32>
    %395 = vector.shape_cast %387 : vector<8x8xf32> to vector<1x8x8xf32>
    %396 = vector.shape_cast %388 : vector<8x8xf32> to vector<1x8x8xf32>
    %397 = vector.shape_cast %389 : vector<8x8xf32> to vector<1x8x8xf32>
    %398 = vector.shape_cast %390 : vector<8x8xf32> to vector<1x8x8xf32>
    %399 = tpu.concatenate %391, %392, %393, %394, %395, %396, %397, %398 in 0 : vector<1x8x8xf32>, vector<1x8x8xf32>, vector<1x8x8xf32>, vector<1x8x8xf32>, vector<1x8x8xf32>, vector<1x8x8xf32>, vector<1x8x8xf32>, vector<1x8x8xf32> -> vector<8x8x8xf32>
    %400 = arith.truncf %399 : vector<8x8x8xf32> to vector<8x8x8xbf16>
    %401 = vector.extract_strided_slice %381 {offsets = [0, 0], sizes = [8, 8], strides = [1, 1]} : vector<16x32xf32> to vector<8x8xf32>
    %402 = vector.extract_strided_slice %381 {offsets = [0, 8], sizes = [8, 8], strides = [1, 1]} : vector<16x32xf32> to vector<8x8xf32>
    %403 = vector.extract_strided_slice %381 {offsets = [0, 16], sizes = [8, 8], strides = [1, 1]} : vector<16x32xf32> to vector<8x8xf32>
    %404 = vector.extract_strided_slice %381 {offsets = [0, 24], sizes = [8, 8], strides = [1, 1]} : vector<16x32xf32> to vector<8x8xf32>
    %405 = vector.extract_strided_slice %381 {offsets = [8, 0], sizes = [8, 8], strides = [1, 1]} : vector<16x32xf32> to vector<8x8xf32>
    %406 = vector.extract_strided_slice %381 {offsets = [8, 8], sizes = [8, 8], strides = [1, 1]} : vector<16x32xf32> to vector<8x8xf32>
    %407 = vector.extract_strided_slice %381 {offsets = [8, 16], sizes = [8, 8], strides = [1, 1]} : vector<16x32xf32> to vector<8x8xf32>
    %408 = vector.extract_strided_slice %381 {offsets = [8, 24], sizes = [8, 8], strides = [1, 1]} : vector<16x32xf32> to vector<8x8xf32>
    %409 = vector.shape_cast %401 : vector<8x8xf32> to vector<1x8x8xf32>
    %410 = vector.shape_cast %402 : vector<8x8xf32> to vector<1x8x8xf32>
    %411 = vector.shape_cast %403 : vector<8x8xf32> to vector<1x8x8xf32>
    %412 = vector.shape_cast %404 : vector<8x8xf32> to vector<1x8x8xf32>
    %413 = vector.shape_cast %405 : vector<8x8xf32> to vector<1x8x8xf32>
    %414 = vector.shape_cast %406 : vector<8x8xf32> to vector<1x8x8xf32>
    %415 = vector.shape_cast %407 : vector<8x8xf32> to vector<1x8x8xf32>
    %416 = vector.shape_cast %408 : vector<8x8xf32> to vector<1x8x8xf32>
    %417 = tpu.concatenate %409, %410, %411, %412, %413, %414, %415, %416 in 0 : vector<1x8x8xf32>, vector<1x8x8xf32>, vector<1x8x8xf32>, vector<1x8x8xf32>, vector<1x8x8xf32>, vector<1x8x8xf32>, vector<1x8x8xf32>, vector<1x8x8xf32> -> vector<8x8x8xf32>
    %418 = arith.truncf %417 : vector<8x8x8xf32> to vector<8x8x8xbf16>
    %419 = vector.extract_strided_slice %382 {offsets = [0, 0], sizes = [8, 8], strides = [1, 1]} : vector<16x32xf32> to vector<8x8xf32>
    %420 = vector.extract_strided_slice %382 {offsets = [0, 8], sizes = [8, 8], strides = [1, 1]} : vector<16x32xf32> to vector<8x8xf32>
    %421 = vector.extract_strided_slice %382 {offsets = [0, 16], sizes = [8, 8], strides = [1, 1]} : vector<16x32xf32> to vector<8x8xf32>
    %422 = vector.extract_strided_slice %382 {offsets = [0, 24], sizes = [8, 8], strides = [1, 1]} : vector<16x32xf32> to vector<8x8xf32>
    %423 = vector.extract_strided_slice %382 {offsets = [8, 0], sizes = [8, 8], strides = [1, 1]} : vector<16x32xf32> to vector<8x8xf32>
    %424 = vector.extract_strided_slice %382 {offsets = [8, 8], sizes = [8, 8], strides = [1, 1]} : vector<16x32xf32> to vector<8x8xf32>
    %425 = vector.extract_strided_slice %382 {offsets = [8, 16], sizes = [8, 8], strides = [1, 1]} : vector<16x32xf32> to vector<8x8xf32>
    %426 = vector.extract_strided_slice %382 {offsets = [8, 24], sizes = [8, 8], strides = [1, 1]} : vector<16x32xf32> to vector<8x8xf32>
    %427 = vector.shape_cast %419 : vector<8x8xf32> to vector<1x8x8xf32>
    %428 = vector.shape_cast %420 : vector<8x8xf32> to vector<1x8x8xf32>
    %429 = vector.shape_cast %421 : vector<8x8xf32> to vector<1x8x8xf32>
    %430 = vector.shape_cast %422 : vector<8x8xf32> to vector<1x8x8xf32>
    %431 = vector.shape_cast %423 : vector<8x8xf32> to vector<1x8x8xf32>
    %432 = vector.shape_cast %424 : vector<8x8xf32> to vector<1x8x8xf32>
    %433 = vector.shape_cast %425 : vector<8x8xf32> to vector<1x8x8xf32>
    %434 = vector.shape_cast %426 : vector<8x8xf32> to vector<1x8x8xf32>
    %435 = tpu.concatenate %427, %428, %429, %430, %431, %432, %433, %434 in 0 : vector<1x8x8xf32>, vector<1x8x8xf32>, vector<1x8x8xf32>, vector<1x8x8xf32>, vector<1x8x8xf32>, vector<1x8x8xf32>, vector<1x8x8xf32>, vector<1x8x8xf32> -> vector<8x8x8xf32>
    %436 = arith.truncf %435 : vector<8x8x8xf32> to vector<8x8x8xbf16>
    "tpu.trace_start"() <{level = 10 : i32, message = "bsd,btd->bst"}> : () -> ()
    %cst_90 = arith.constant dense<0.000000e+00> : vector<8x8x8xf32>
    %437 = tpu.matmul %400, %418, %cst_90 {dimension_numbers = #tpu.dot_dimension_numbers<[2], [2], [1], [1], [0, 0, 0, 1, 1, 1], [0], [0]>} : vector<8x8x8xbf16>, vector<8x8x8xbf16>, vector<8x8x8xf32> -> vector<8x8x8xf32>
    "tpu.trace_stop"() : () -> ()
    %cst_91 = arith.constant dense<0xFF800000> : vector<8x8xf32>
    %438 = vector.multi_reduction <maximumf>, %437, %cst_91 [2] : vector<8x8x8xf32> to vector<8x8xf32>
    %439 = vector.shape_cast %438 : vector<8x8xf32> to vector<8x8x1xf32>
    %440 = vector.broadcast %439 : vector<8x8x1xf32> to vector<8x8x8xf32>
    %441 = arith.subf %437, %440 : vector<8x8x8xf32>
    %442 = math.exp %441 : vector<8x8x8xf32>
    %cst_92 = arith.constant dense<0.000000e+00> : vector<8x8xf32>
    %443 = vector.multi_reduction <add>, %442, %cst_92 [2] : vector<8x8x8xf32> to vector<8x8xf32>
    %444 = vector.shape_cast %443 : vector<8x8xf32> to vector<8x8x1xf32>
    %445 = tpu.reciprocal %444 {approx = true} : vector<8x8x1xf32> -> vector<8x8x1xf32>
    %446 = vector.broadcast %445 : vector<8x8x1xf32> to vector<8x8x8xf32>
    %447 = arith.mulf %442, %446 : vector<8x8x8xf32>
    %448 = arith.truncf %447 : vector<8x8x8xf32> to vector<8x8x8xbf16>
    "tpu.trace_start"() <{level = 10 : i32, message = "bst,btd->bsd"}> : () -> ()
    %cst_93 = arith.constant dense<0.000000e+00> : vector<8x8x8xf32>
    %449 = tpu.matmul %448, %436, %cst_93 {dimension_numbers = #tpu.dot_dimension_numbers<[2], [1], [1], [2], [0, 0, 0, 1, 1, 2], [0], [0]>} : vector<8x8x8xbf16>, vector<8x8x8xbf16>, vector<8x8x8xf32> -> vector<8x8x8xf32>
    "tpu.trace_stop"() : () -> ()
    %450 = vector.extract_strided_slice %449 {offsets = [0, 0, 0], sizes = [1, 8, 8], strides = [1, 1, 1]} : vector<8x8x8xf32> to vector<1x8x8xf32>
    %451 = vector.shape_cast %450 : vector<1x8x8xf32> to vector<8x8xf32>
    %452 = vector.extract_strided_slice %449 {offsets = [1, 0, 0], sizes = [1, 8, 8], strides = [1, 1, 1]} : vector<8x8x8xf32> to vector<1x8x8xf32>
    %453 = vector.shape_cast %452 : vector<1x8x8xf32> to vector<8x8xf32>
    %454 = vector.extract_strided_slice %449 {offsets = [2, 0, 0], sizes = [1, 8, 8], strides = [1, 1, 1]} : vector<8x8x8xf32> to vector<1x8x8xf32>
    %455 = vector.shape_cast %454 : vector<1x8x8xf32> to vector<8x8xf32>
    %456 = vector.extract_strided_slice %449 {offsets = [3, 0, 0], sizes = [1, 8, 8], strides = [1, 1, 1]} : vector<8x8x8xf32> to vector<1x8x8xf32>
    %457 = vector.shape_cast %456 : vector<1x8x8xf32> to vector<8x8xf32>
    %458 = tpu.concatenate %451, %453, %455, %457 in 1 : vector<8x8xf32>, vector<8x8xf32>, vector<8x8xf32>, vector<8x8xf32> -> vector<8x32xf32>
    %459 = vector.extract_strided_slice %449 {offsets = [4, 0, 0], sizes = [1, 8, 8], strides = [1, 1, 1]} : vector<8x8x8xf32> to vector<1x8x8xf32>
    %460 = vector.shape_cast %459 : vector<1x8x8xf32> to vector<8x8xf32>
    %461 = vector.extract_strided_slice %449 {offsets = [5, 0, 0], sizes = [1, 8, 8], strides = [1, 1, 1]} : vector<8x8x8xf32> to vector<1x8x8xf32>
    %462 = vector.shape_cast %461 : vector<1x8x8xf32> to vector<8x8xf32>
    %463 = vector.extract_strided_slice %449 {offsets = [6, 0, 0], sizes = [1, 8, 8], strides = [1, 1, 1]} : vector<8x8x8xf32> to vector<1x8x8xf32>
    %464 = vector.shape_cast %463 : vector<1x8x8xf32> to vector<8x8xf32>
    %465 = vector.extract_strided_slice %449 {offsets = [7, 0, 0], sizes = [1, 8, 8], strides = [1, 1, 1]} : vector<8x8x8xf32> to vector<1x8x8xf32>
    %466 = vector.shape_cast %465 : vector<1x8x8xf32> to vector<8x8xf32>
    %467 = tpu.concatenate %460, %462, %464, %466 in 1 : vector<8x8xf32>, vector<8x8xf32>, vector<8x8xf32>, vector<8x8xf32> -> vector<8x32xf32>
    %468 = tpu.concatenate %458, %467 in 0 : vector<8x32xf32>, vector<8x32xf32> -> vector<16x32xf32>
    %469 = vector.extract_strided_slice %373 {offsets = [0, 96], sizes = [32, 32], strides = [1, 1]} : vector<32x128xbf16> to vector<32x32xbf16>
    %470 = vector.extract_strided_slice %375 {offsets = [0, 96], sizes = [1, 32], strides = [1, 1]} : vector<1x128xf32> to vector<1x32xf32>
    %471 = arith.truncf %468 : vector<16x32xf32> to vector<16x32xbf16>
    %cst_94 = arith.constant dense<0.000000e+00> : vector<16x32xf32>
    %472 = tpu.matmul %471, %469, %cst_94 {dimension_numbers = #tpu.dot_dimension_numbers<[1], [0], [0], [1], [0, 0, 1, 1], [], []>} : vector<16x32xbf16>, vector<32x32xbf16>, vector<16x32xf32> -> vector<16x32xf32>
    %473 = vector.broadcast %470 : vector<1x32xf32> to vector<16x32xf32>
    %474 = arith.addf %472, %473 : vector<16x32xf32>
    %c2_95 = arith.constant 2 : index
    %c0_96 = arith.constant 0 : index
    %c0_97 = arith.constant 0 : index
    %475 = vector.load %arg8[%c2_95, %c0_96, %c0_97] : memref<4x5x32xf32, #tpu.memory_space<vmem>>, vector<1x5x32xf32>
    %476 = vector.shape_cast %475 : vector<1x5x32xf32> to vector<5x32xf32>
    %477 = arith.addf %371, %474 : vector<16x32xf32>
    %478 = vector.extract_strided_slice %476 {offsets = [0, 0], sizes = [1, 32], strides = [1, 1]} : vector<5x32xf32> to vector<1x32xf32>
    %479 = vector.extract_strided_slice %476 {offsets = [1, 0], sizes = [1, 32], strides = [1, 1]} : vector<5x32xf32> to vector<1x32xf32>
    %cst_98 = arith.constant dense<0.000000e+00> : vector<16xf32>
    %480 = vector.multi_reduction <add>, %477, %cst_98 [1] : vector<16x32xf32> to vector<16xf32>
    %481 = vector.shape_cast %480 : vector<16xf32> to vector<16x1xf32>
    %cst_99 = arith.constant 3.200000e+01 : f32
    %482 = vector.broadcast %cst_99 : f32 to vector<16x1xf32>
    %483 = arith.divf %481, %482 : vector<16x1xf32>
    %484 = vector.broadcast %483 : vector<16x1xf32> to vector<16x32xf32>
    %485 = arith.subf %477, %484 : vector<16x32xf32>
    %486 = arith.mulf %485, %485 : vector<16x32xf32>
    %cst_100 = arith.constant dense<0.000000e+00> : vector<16xf32>
    %487 = vector.multi_reduction <add>, %486, %cst_100 [1] : vector<16x32xf32> to vector<16xf32>
    %488 = vector.shape_cast %487 : vector<16xf32> to vector<16x1xf32>
    %cst_101 = arith.constant 3.200000e+01 : f32
    %489 = vector.broadcast %cst_101 : f32 to vector<16x1xf32>
    %490 = arith.divf %488, %489 : vector<16x1xf32>
    %491 = vector.broadcast %483 : vector<16x1xf32> to vector<16x32xf32>
    %492 = arith.subf %477, %491 : vector<16x32xf32>
    %cst_102 = arith.constant 9.99999974E-6 : f32
    %493 = vector.broadcast %cst_102 : f32 to vector<16x1xf32>
    %494 = arith.addf %490, %493 : vector<16x1xf32>
    %495 = math.rsqrt %494 : vector<16x1xf32>
    %496 = vector.broadcast %495 : vector<16x1xf32> to vector<16x32xf32>
    %497 = arith.mulf %492, %496 : vector<16x32xf32>
    %498 = vector.broadcast %478 : vector<1x32xf32> to vector<16x32xf32>
    %499 = arith.mulf %497, %498 : vector<16x32xf32>
    %500 = vector.broadcast %479 : vector<1x32xf32> to vector<16x32xf32>
    %501 = arith.addf %499, %500 : vector<16x32xf32>
    %502 = arith.truncf %501 : vector<16x32xf32> to vector<16x32xbf16>
    %c2_103 = arith.constant 2 : index
    %c0_104 = arith.constant 0 : index
    %c0_105 = arith.constant 0 : index
    %503 = vector.load %arg5[%c2_103, %c0_104, %c0_105] : memref<4x32x128xbf16, #tpu.memory_space<vmem>>, vector<1x32x128xbf16>
    %504 = vector.shape_cast %503 : vector<1x32x128xbf16> to vector<32x128xbf16>
    %cst_106 = arith.constant dense<0.000000e+00> : vector<16x128xf32>
    %505 = tpu.matmul %502, %504, %cst_106 {dimension_numbers = #tpu.dot_dimension_numbers<[1], [0], [0], [1], [0, 0, 1, 1], [], []>} : vector<16x32xbf16>, vector<32x128xbf16>, vector<16x128xf32> -> vector<16x128xf32>
    %c2_107 = arith.constant 2 : index
    %c0_108 = arith.constant 0 : index
    %c0_109 = arith.constant 0 : index
    %506 = vector.load %arg6[%c2_107, %c0_108, %c0_109] : memref<4x1x128xf32, #tpu.memory_space<vmem>>, vector<1x1x128xf32>
    %507 = vector.shape_cast %506 : vector<1x1x128xf32> to vector<1x128xf32>
    %508 = vector.broadcast %507 : vector<1x128xf32> to vector<16x128xf32>
    %509 = arith.addf %505, %508 : vector<16x128xf32>
    %cst_110 = arith.constant 0.000000e+00 : f32
    %510 = vector.broadcast %cst_110 : f32 to vector<16x128xf32>
    %511 = arith.maximumf %509, %510 : vector<16x128xf32>
    %512 = arith.truncf %511 : vector<16x128xf32> to vector<16x128xbf16>
    %c2_111 = arith.constant 2 : index
    %c0_112 = arith.constant 0 : index
    %c0_113 = arith.constant 0 : index
    %513 = vector.load %arg7[%c2_111, %c0_112, %c0_113] : memref<4x32x128xbf16, #tpu.memory_space<vmem>>, vector<1x32x128xbf16>
    %514 = vector.shape_cast %513 : vector<1x32x128xbf16> to vector<32x128xbf16>
    %cst_114 = arith.constant dense<0.000000e+00> : vector<16x32xf32>
    %515 = tpu.matmul %512, %514, %cst_114 {dimension_numbers = #tpu.dot_dimension_numbers<[1], [1], [0], [0], [0, 0, 1, 0], [], []>} : vector<16x128xbf16>, vector<32x128xbf16>, vector<16x32xf32> -> vector<16x32xf32>
    %516 = vector.extract_strided_slice %476 {offsets = [4, 0], sizes = [1, 32], strides = [1, 1]} : vector<5x32xf32> to vector<1x32xf32>
    %517 = vector.broadcast %516 : vector<1x32xf32> to vector<16x32xf32>
    %518 = arith.addf %515, %517 : vector<16x32xf32>
    %519 = arith.addf %501, %518 : vector<16x32xf32>
    %520 = vector.extract_strided_slice %476 {offsets = [2, 0], sizes = [1, 32], strides = [1, 1]} : vector<5x32xf32> to vector<1x32xf32>
    %521 = vector.extract_strided_slice %476 {offsets = [3, 0], sizes = [1, 32], strides = [1, 1]} : vector<5x32xf32> to vector<1x32xf32>
    %cst_115 = arith.constant dense<0.000000e+00> : vector<16xf32>
    %522 = vector.multi_reduction <add>, %519, %cst_115 [1] : vector<16x32xf32> to vector<16xf32>
    %523 = vector.shape_cast %522 : vector<16xf32> to vector<16x1xf32>
    %cst_116 = arith.constant 3.200000e+01 : f32
    %524 = vector.broadcast %cst_116 : f32 to vector<16x1xf32>
    %525 = arith.divf %523, %524 : vector<16x1xf32>
    %526 = vector.broadcast %525 : vector<16x1xf32> to vector<16x32xf32>
    %527 = arith.subf %519, %526 : vector<16x32xf32>
    %528 = arith.mulf %527, %527 : vector<16x32xf32>
    %cst_117 = arith.constant dense<0.000000e+00> : vector<16xf32>
    %529 = vector.multi_reduction <add>, %528, %cst_117 [1] : vector<16x32xf32> to vector<16xf32>
    %530 = vector.shape_cast %529 : vector<16xf32> to vector<16x1xf32>
    %cst_118 = arith.constant 3.200000e+01 : f32
    %531 = vector.broadcast %cst_118 : f32 to vector<16x1xf32>
    %532 = arith.divf %530, %531 : vector<16x1xf32>
    %533 = vector.broadcast %525 : vector<16x1xf32> to vector<16x32xf32>
    %534 = arith.subf %519, %533 : vector<16x32xf32>
    %cst_119 = arith.constant 9.99999974E-6 : f32
    %535 = vector.broadcast %cst_119 : f32 to vector<16x1xf32>
    %536 = arith.addf %532, %535 : vector<16x1xf32>
    %537 = math.rsqrt %536 : vector<16x1xf32>
    %538 = vector.broadcast %537 : vector<16x1xf32> to vector<16x32xf32>
    %539 = arith.mulf %534, %538 : vector<16x32xf32>
    %540 = vector.broadcast %520 : vector<1x32xf32> to vector<16x32xf32>
    %541 = arith.mulf %539, %540 : vector<16x32xf32>
    %542 = vector.broadcast %521 : vector<1x32xf32> to vector<16x32xf32>
    %543 = arith.addf %541, %542 : vector<16x32xf32>
    %c3 = arith.constant 3 : index
    %c0_120 = arith.constant 0 : index
    %c0_121 = arith.constant 0 : index
    %544 = vector.load %arg3[%c3, %c0_120, %c0_121] : memref<4x32x128xbf16, #tpu.memory_space<vmem>>, vector<1x32x128xbf16>
    %545 = vector.shape_cast %544 : vector<1x32x128xbf16> to vector<32x128xbf16>
    %c3_122 = arith.constant 3 : index
    %c0_123 = arith.constant 0 : index
    %c0_124 = arith.constant 0 : index
    %546 = vector.load %arg4[%c3_122, %c0_123, %c0_124] : memref<4x1x128xf32, #tpu.memory_space<vmem>>, vector<1x1x128xf32>
    %547 = vector.shape_cast %546 : vector<1x1x128xf32> to vector<1x128xf32>
    %548 = arith.truncf %543 : vector<16x32xf32> to vector<16x32xbf16>
    %cst_125 = arith.constant dense<0.000000e+00> : vector<16x128xf32>
    %549 = tpu.matmul %548, %545, %cst_125 {dimension_numbers = #tpu.dot_dimension_numbers<[1], [0], [0], [1], [0, 0, 1, 1], [], []>} : vector<16x32xbf16>, vector<32x128xbf16>, vector<16x128xf32> -> vector<16x128xf32>
    %550 = vector.broadcast %547 : vector<1x128xf32> to vector<16x128xf32>
    %551 = arith.addf %549, %550 : vector<16x128xf32>
    %552 = vector.extract_strided_slice %551 {offsets = [0, 0], sizes = [16, 32], strides = [1, 1]} : vector<16x128xf32> to vector<16x32xf32>
    %553 = vector.extract_strided_slice %551 {offsets = [0, 32], sizes = [16, 32], strides = [1, 1]} : vector<16x128xf32> to vector<16x32xf32>
    %554 = vector.extract_strided_slice %551 {offsets = [0, 64], sizes = [16, 32], strides = [1, 1]} : vector<16x128xf32> to vector<16x32xf32>
    %555 = vector.extract_strided_slice %552 {offsets = [0, 0], sizes = [8, 8], strides = [1, 1]} : vector<16x32xf32> to vector<8x8xf32>
    %556 = vector.extract_strided_slice %552 {offsets = [0, 8], sizes = [8, 8], strides = [1, 1]} : vector<16x32xf32> to vector<8x8xf32>
    %557 = vector.extract_strided_slice %552 {offsets = [0, 16], sizes = [8, 8], strides = [1, 1]} : vector<16x32xf32> to vector<8x8xf32>
    %558 = vector.extract_strided_slice %552 {offsets = [0, 24], sizes = [8, 8], strides = [1, 1]} : vector<16x32xf32> to vector<8x8xf32>
    %559 = vector.extract_strided_slice %552 {offsets = [8, 0], sizes = [8, 8], strides = [1, 1]} : vector<16x32xf32> to vector<8x8xf32>
    %560 = vector.extract_strided_slice %552 {offsets = [8, 8], sizes = [8, 8], strides = [1, 1]} : vector<16x32xf32> to vector<8x8xf32>
    %561 = vector.extract_strided_slice %552 {offsets = [8, 16], sizes = [8, 8], strides = [1, 1]} : vector<16x32xf32> to vector<8x8xf32>
    %562 = vector.extract_strided_slice %552 {offsets = [8, 24], sizes = [8, 8], strides = [1, 1]} : vector<16x32xf32> to vector<8x8xf32>
    %563 = vector.shape_cast %555 : vector<8x8xf32> to vector<1x8x8xf32>
    %564 = vector.shape_cast %556 : vector<8x8xf32> to vector<1x8x8xf32>
    %565 = vector.shape_cast %557 : vector<8x8xf32> to vector<1x8x8xf32>
    %566 = vector.shape_cast %558 : vector<8x8xf32> to vector<1x8x8xf32>
    %567 = vector.shape_cast %559 : vector<8x8xf32> to vector<1x8x8xf32>
    %568 = vector.shape_cast %560 : vector<8x8xf32> to vector<1x8x8xf32>
    %569 = vector.shape_cast %561 : vector<8x8xf32> to vector<1x8x8xf32>
    %570 = vector.shape_cast %562 : vector<8x8xf32> to vector<1x8x8xf32>
    %571 = tpu.concatenate %563, %564, %565, %566, %567, %568, %569, %570 in 0 : vector<1x8x8xf32>, vector<1x8x8xf32>, vector<1x8x8xf32>, vector<1x8x8xf32>, vector<1x8x8xf32>, vector<1x8x8xf32>, vector<1x8x8xf32>, vector<1x8x8xf32> -> vector<8x8x8xf32>
    %572 = arith.truncf %571 : vector<8x8x8xf32> to vector<8x8x8xbf16>
    %573 = vector.extract_strided_slice %553 {offsets = [0, 0], sizes = [8, 8], strides = [1, 1]} : vector<16x32xf32> to vector<8x8xf32>
    %574 = vector.extract_strided_slice %553 {offsets = [0, 8], sizes = [8, 8], strides = [1, 1]} : vector<16x32xf32> to vector<8x8xf32>
    %575 = vector.extract_strided_slice %553 {offsets = [0, 16], sizes = [8, 8], strides = [1, 1]} : vector<16x32xf32> to vector<8x8xf32>
    %576 = vector.extract_strided_slice %553 {offsets = [0, 24], sizes = [8, 8], strides = [1, 1]} : vector<16x32xf32> to vector<8x8xf32>
    %577 = vector.extract_strided_slice %553 {offsets = [8, 0], sizes = [8, 8], strides = [1, 1]} : vector<16x32xf32> to vector<8x8xf32>
    %578 = vector.extract_strided_slice %553 {offsets = [8, 8], sizes = [8, 8], strides = [1, 1]} : vector<16x32xf32> to vector<8x8xf32>
    %579 = vector.extract_strided_slice %553 {offsets = [8, 16], sizes = [8, 8], strides = [1, 1]} : vector<16x32xf32> to vector<8x8xf32>
    %580 = vector.extract_strided_slice %553 {offsets = [8, 24], sizes = [8, 8], strides = [1, 1]} : vector<16x32xf32> to vector<8x8xf32>
    %581 = vector.shape_cast %573 : vector<8x8xf32> to vector<1x8x8xf32>
    %582 = vector.shape_cast %574 : vector<8x8xf32> to vector<1x8x8xf32>
    %583 = vector.shape_cast %575 : vector<8x8xf32> to vector<1x8x8xf32>
    %584 = vector.shape_cast %576 : vector<8x8xf32> to vector<1x8x8xf32>
    %585 = vector.shape_cast %577 : vector<8x8xf32> to vector<1x8x8xf32>
    %586 = vector.shape_cast %578 : vector<8x8xf32> to vector<1x8x8xf32>
    %587 = vector.shape_cast %579 : vector<8x8xf32> to vector<1x8x8xf32>
    %588 = vector.shape_cast %580 : vector<8x8xf32> to vector<1x8x8xf32>
    %589 = tpu.concatenate %581, %582, %583, %584, %585, %586, %587, %588 in 0 : vector<1x8x8xf32>, vector<1x8x8xf32>, vector<1x8x8xf32>, vector<1x8x8xf32>, vector<1x8x8xf32>, vector<1x8x8xf32>, vector<1x8x8xf32>, vector<1x8x8xf32> -> vector<8x8x8xf32>
    %590 = arith.truncf %589 : vector<8x8x8xf32> to vector<8x8x8xbf16>
    %591 = vector.extract_strided_slice %554 {offsets = [0, 0], sizes = [8, 8], strides = [1, 1]} : vector<16x32xf32> to vector<8x8xf32>
    %592 = vector.extract_strided_slice %554 {offsets = [0, 8], sizes = [8, 8], strides = [1, 1]} : vector<16x32xf32> to vector<8x8xf32>
    %593 = vector.extract_strided_slice %554 {offsets = [0, 16], sizes = [8, 8], strides = [1, 1]} : vector<16x32xf32> to vector<8x8xf32>
    %594 = vector.extract_strided_slice %554 {offsets = [0, 24], sizes = [8, 8], strides = [1, 1]} : vector<16x32xf32> to vector<8x8xf32>
    %595 = vector.extract_strided_slice %554 {offsets = [8, 0], sizes = [8, 8], strides = [1, 1]} : vector<16x32xf32> to vector<8x8xf32>
    %596 = vector.extract_strided_slice %554 {offsets = [8, 8], sizes = [8, 8], strides = [1, 1]} : vector<16x32xf32> to vector<8x8xf32>
    %597 = vector.extract_strided_slice %554 {offsets = [8, 16], sizes = [8, 8], strides = [1, 1]} : vector<16x32xf32> to vector<8x8xf32>
    %598 = vector.extract_strided_slice %554 {offsets = [8, 24], sizes = [8, 8], strides = [1, 1]} : vector<16x32xf32> to vector<8x8xf32>
    %599 = vector.shape_cast %591 : vector<8x8xf32> to vector<1x8x8xf32>
    %600 = vector.shape_cast %592 : vector<8x8xf32> to vector<1x8x8xf32>
    %601 = vector.shape_cast %593 : vector<8x8xf32> to vector<1x8x8xf32>
    %602 = vector.shape_cast %594 : vector<8x8xf32> to vector<1x8x8xf32>
    %603 = vector.shape_cast %595 : vector<8x8xf32> to vector<1x8x8xf32>
    %604 = vector.shape_cast %596 : vector<8x8xf32> to vector<1x8x8xf32>
    %605 = vector.shape_cast %597 : vector<8x8xf32> to vector<1x8x8xf32>
    %606 = vector.shape_cast %598 : vector<8x8xf32> to vector<1x8x8xf32>
    %607 = tpu.concatenate %599, %600, %601, %602, %603, %604, %605, %606 in 0 : vector<1x8x8xf32>, vector<1x8x8xf32>, vector<1x8x8xf32>, vector<1x8x8xf32>, vector<1x8x8xf32>, vector<1x8x8xf32>, vector<1x8x8xf32>, vector<1x8x8xf32> -> vector<8x8x8xf32>
    %608 = arith.truncf %607 : vector<8x8x8xf32> to vector<8x8x8xbf16>
    "tpu.trace_start"() <{level = 10 : i32, message = "bsd,btd->bst"}> : () -> ()
    %cst_126 = arith.constant dense<0.000000e+00> : vector<8x8x8xf32>
    %609 = tpu.matmul %572, %590, %cst_126 {dimension_numbers = #tpu.dot_dimension_numbers<[2], [2], [1], [1], [0, 0, 0, 1, 1, 1], [0], [0]>} : vector<8x8x8xbf16>, vector<8x8x8xbf16>, vector<8x8x8xf32> -> vector<8x8x8xf32>
    "tpu.trace_stop"() : () -> ()
    %cst_127 = arith.constant dense<0xFF800000> : vector<8x8xf32>
    %610 = vector.multi_reduction <maximumf>, %609, %cst_127 [2] : vector<8x8x8xf32> to vector<8x8xf32>
    %611 = vector.shape_cast %610 : vector<8x8xf32> to vector<8x8x1xf32>
    %612 = vector.broadcast %611 : vector<8x8x1xf32> to vector<8x8x8xf32>
    %613 = arith.subf %609, %612 : vector<8x8x8xf32>
    %614 = math.exp %613 : vector<8x8x8xf32>
    %cst_128 = arith.constant dense<0.000000e+00> : vector<8x8xf32>
    %615 = vector.multi_reduction <add>, %614, %cst_128 [2] : vector<8x8x8xf32> to vector<8x8xf32>
    %616 = vector.shape_cast %615 : vector<8x8xf32> to vector<8x8x1xf32>
    %617 = tpu.reciprocal %616 {approx = true} : vector<8x8x1xf32> -> vector<8x8x1xf32>
    %618 = vector.broadcast %617 : vector<8x8x1xf32> to vector<8x8x8xf32>
    %619 = arith.mulf %614, %618 : vector<8x8x8xf32>
    %620 = arith.truncf %619 : vector<8x8x8xf32> to vector<8x8x8xbf16>
    "tpu.trace_start"() <{level = 10 : i32, message = "bst,btd->bsd"}> : () -> ()
    %cst_129 = arith.constant dense<0.000000e+00> : vector<8x8x8xf32>
    %621 = tpu.matmul %620, %608, %cst_129 {dimension_numbers = #tpu.dot_dimension_numbers<[2], [1], [1], [2], [0, 0, 0, 1, 1, 2], [0], [0]>} : vector<8x8x8xbf16>, vector<8x8x8xbf16>, vector<8x8x8xf32> -> vector<8x8x8xf32>
    "tpu.trace_stop"() : () -> ()
    %622 = vector.extract_strided_slice %621 {offsets = [0, 0, 0], sizes = [1, 8, 8], strides = [1, 1, 1]} : vector<8x8x8xf32> to vector<1x8x8xf32>
    %623 = vector.shape_cast %622 : vector<1x8x8xf32> to vector<8x8xf32>
    %624 = vector.extract_strided_slice %621 {offsets = [1, 0, 0], sizes = [1, 8, 8], strides = [1, 1, 1]} : vector<8x8x8xf32> to vector<1x8x8xf32>
    %625 = vector.shape_cast %624 : vector<1x8x8xf32> to vector<8x8xf32>
    %626 = vector.extract_strided_slice %621 {offsets = [2, 0, 0], sizes = [1, 8, 8], strides = [1, 1, 1]} : vector<8x8x8xf32> to vector<1x8x8xf32>
    %627 = vector.shape_cast %626 : vector<1x8x8xf32> to vector<8x8xf32>
    %628 = vector.extract_strided_slice %621 {offsets = [3, 0, 0], sizes = [1, 8, 8], strides = [1, 1, 1]} : vector<8x8x8xf32> to vector<1x8x8xf32>
    %629 = vector.shape_cast %628 : vector<1x8x8xf32> to vector<8x8xf32>
    %630 = tpu.concatenate %623, %625, %627, %629 in 1 : vector<8x8xf32>, vector<8x8xf32>, vector<8x8xf32>, vector<8x8xf32> -> vector<8x32xf32>
    %631 = vector.extract_strided_slice %621 {offsets = [4, 0, 0], sizes = [1, 8, 8], strides = [1, 1, 1]} : vector<8x8x8xf32> to vector<1x8x8xf32>
    %632 = vector.shape_cast %631 : vector<1x8x8xf32> to vector<8x8xf32>
    %633 = vector.extract_strided_slice %621 {offsets = [5, 0, 0], sizes = [1, 8, 8], strides = [1, 1, 1]} : vector<8x8x8xf32> to vector<1x8x8xf32>
    %634 = vector.shape_cast %633 : vector<1x8x8xf32> to vector<8x8xf32>
    %635 = vector.extract_strided_slice %621 {offsets = [6, 0, 0], sizes = [1, 8, 8], strides = [1, 1, 1]} : vector<8x8x8xf32> to vector<1x8x8xf32>
    %636 = vector.shape_cast %635 : vector<1x8x8xf32> to vector<8x8xf32>
    %637 = vector.extract_strided_slice %621 {offsets = [7, 0, 0], sizes = [1, 8, 8], strides = [1, 1, 1]} : vector<8x8x8xf32> to vector<1x8x8xf32>
    %638 = vector.shape_cast %637 : vector<1x8x8xf32> to vector<8x8xf32>
    %639 = tpu.concatenate %632, %634, %636, %638 in 1 : vector<8x8xf32>, vector<8x8xf32>, vector<8x8xf32>, vector<8x8xf32> -> vector<8x32xf32>
    %640 = tpu.concatenate %630, %639 in 0 : vector<8x32xf32>, vector<8x32xf32> -> vector<16x32xf32>
    %641 = vector.extract_strided_slice %545 {offsets = [0, 96], sizes = [32, 32], strides = [1, 1]} : vector<32x128xbf16> to vector<32x32xbf16>
    %642 = vector.extract_strided_slice %547 {offsets = [0, 96], sizes = [1, 32], strides = [1, 1]} : vector<1x128xf32> to vector<1x32xf32>
    %643 = arith.truncf %640 : vector<16x32xf32> to vector<16x32xbf16>
    %cst_130 = arith.constant dense<0.000000e+00> : vector<16x32xf32>
    %644 = tpu.matmul %643, %641, %cst_130 {dimension_numbers = #tpu.dot_dimension_numbers<[1], [0], [0], [1], [0, 0, 1, 1], [], []>} : vector<16x32xbf16>, vector<32x32xbf16>, vector<16x32xf32> -> vector<16x32xf32>
    %645 = vector.broadcast %642 : vector<1x32xf32> to vector<16x32xf32>
    %646 = arith.addf %644, %645 : vector<16x32xf32>
    %c3_131 = arith.constant 3 : index
    %c0_132 = arith.constant 0 : index
    %c0_133 = arith.constant 0 : index
    %647 = vector.load %arg8[%c3_131, %c0_132, %c0_133] : memref<4x5x32xf32, #tpu.memory_space<vmem>>, vector<1x5x32xf32>
    %648 = vector.shape_cast %647 : vector<1x5x32xf32> to vector<5x32xf32>
    %649 = arith.addf %543, %646 : vector<16x32xf32>
    %650 = vector.extract_strided_slice %648 {offsets = [0, 0], sizes = [1, 32], strides = [1, 1]} : vector<5x32xf32> to vector<1x32xf32>
    %651 = vector.extract_strided_slice %648 {offsets = [1, 0], sizes = [1, 32], strides = [1, 1]} : vector<5x32xf32> to vector<1x32xf32>
    %cst_134 = arith.constant dense<0.000000e+00> : vector<16xf32>
    %652 = vector.multi_reduction <add>, %649, %cst_134 [1] : vector<16x32xf32> to vector<16xf32>
    %653 = vector.shape_cast %652 : vector<16xf32> to vector<16x1xf32>
    %cst_135 = arith.constant 3.200000e+01 : f32
    %654 = vector.broadcast %cst_135 : f32 to vector<16x1xf32>
    %655 = arith.divf %653, %654 : vector<16x1xf32>
    %656 = vector.broadcast %655 : vector<16x1xf32> to vector<16x32xf32>
    %657 = arith.subf %649, %656 : vector<16x32xf32>
    %658 = arith.mulf %657, %657 : vector<16x32xf32>
    %cst_136 = arith.constant dense<0.000000e+00> : vector<16xf32>
    %659 = vector.multi_reduction <add>, %658, %cst_136 [1] : vector<16x32xf32> to vector<16xf32>
    %660 = vector.shape_cast %659 : vector<16xf32> to vector<16x1xf32>
    %cst_137 = arith.constant 3.200000e+01 : f32
    %661 = vector.broadcast %cst_137 : f32 to vector<16x1xf32>
    %662 = arith.divf %660, %661 : vector<16x1xf32>
    %663 = vector.broadcast %655 : vector<16x1xf32> to vector<16x32xf32>
    %664 = arith.subf %649, %663 : vector<16x32xf32>
    %cst_138 = arith.constant 9.99999974E-6 : f32
    %665 = vector.broadcast %cst_138 : f32 to vector<16x1xf32>
    %666 = arith.addf %662, %665 : vector<16x1xf32>
    %667 = math.rsqrt %666 : vector<16x1xf32>
    %668 = vector.broadcast %667 : vector<16x1xf32> to vector<16x32xf32>
    %669 = arith.mulf %664, %668 : vector<16x32xf32>
    %670 = vector.broadcast %650 : vector<1x32xf32> to vector<16x32xf32>
    %671 = arith.mulf %669, %670 : vector<16x32xf32>
    %672 = vector.broadcast %651 : vector<1x32xf32> to vector<16x32xf32>
    %673 = arith.addf %671, %672 : vector<16x32xf32>
    %674 = arith.truncf %673 : vector<16x32xf32> to vector<16x32xbf16>
    %c3_139 = arith.constant 3 : index
    %c0_140 = arith.constant 0 : index
    %c0_141 = arith.constant 0 : index
    %675 = vector.load %arg5[%c3_139, %c0_140, %c0_141] : memref<4x32x128xbf16, #tpu.memory_space<vmem>>, vector<1x32x128xbf16>
    %676 = vector.shape_cast %675 : vector<1x32x128xbf16> to vector<32x128xbf16>
    %cst_142 = arith.constant dense<0.000000e+00> : vector<16x128xf32>
    %677 = tpu.matmul %674, %676, %cst_142 {dimension_numbers = #tpu.dot_dimension_numbers<[1], [0], [0], [1], [0, 0, 1, 1], [], []>} : vector<16x32xbf16>, vector<32x128xbf16>, vector<16x128xf32> -> vector<16x128xf32>
    %c3_143 = arith.constant 3 : index
    %c0_144 = arith.constant 0 : index
    %c0_145 = arith.constant 0 : index
    %678 = vector.load %arg6[%c3_143, %c0_144, %c0_145] : memref<4x1x128xf32, #tpu.memory_space<vmem>>, vector<1x1x128xf32>
    %679 = vector.shape_cast %678 : vector<1x1x128xf32> to vector<1x128xf32>
    %680 = vector.broadcast %679 : vector<1x128xf32> to vector<16x128xf32>
    %681 = arith.addf %677, %680 : vector<16x128xf32>
    %cst_146 = arith.constant 0.000000e+00 : f32
    %682 = vector.broadcast %cst_146 : f32 to vector<16x128xf32>
    %683 = arith.maximumf %681, %682 : vector<16x128xf32>
    %684 = arith.truncf %683 : vector<16x128xf32> to vector<16x128xbf16>
    %c3_147 = arith.constant 3 : index
    %c0_148 = arith.constant 0 : index
    %c0_149 = arith.constant 0 : index
    %685 = vector.load %arg7[%c3_147, %c0_148, %c0_149] : memref<4x32x128xbf16, #tpu.memory_space<vmem>>, vector<1x32x128xbf16>
    %686 = vector.shape_cast %685 : vector<1x32x128xbf16> to vector<32x128xbf16>
    %cst_150 = arith.constant dense<0.000000e+00> : vector<16x32xf32>
    %687 = tpu.matmul %684, %686, %cst_150 {dimension_numbers = #tpu.dot_dimension_numbers<[1], [1], [0], [0], [0, 0, 1, 0], [], []>} : vector<16x128xbf16>, vector<32x128xbf16>, vector<16x32xf32> -> vector<16x32xf32>
    %688 = vector.extract_strided_slice %648 {offsets = [4, 0], sizes = [1, 32], strides = [1, 1]} : vector<5x32xf32> to vector<1x32xf32>
    %689 = vector.broadcast %688 : vector<1x32xf32> to vector<16x32xf32>
    %690 = arith.addf %687, %689 : vector<16x32xf32>
    %691 = arith.addf %673, %690 : vector<16x32xf32>
    %692 = vector.extract_strided_slice %648 {offsets = [2, 0], sizes = [1, 32], strides = [1, 1]} : vector<5x32xf32> to vector<1x32xf32>
    %693 = vector.extract_strided_slice %648 {offsets = [3, 0], sizes = [1, 32], strides = [1, 1]} : vector<5x32xf32> to vector<1x32xf32>
    %cst_151 = arith.constant dense<0.000000e+00> : vector<16xf32>
    %694 = vector.multi_reduction <add>, %691, %cst_151 [1] : vector<16x32xf32> to vector<16xf32>
    %695 = vector.shape_cast %694 : vector<16xf32> to vector<16x1xf32>
    %cst_152 = arith.constant 3.200000e+01 : f32
    %696 = vector.broadcast %cst_152 : f32 to vector<16x1xf32>
    %697 = arith.divf %695, %696 : vector<16x1xf32>
    %698 = vector.broadcast %697 : vector<16x1xf32> to vector<16x32xf32>
    %699 = arith.subf %691, %698 : vector<16x32xf32>
    %700 = arith.mulf %699, %699 : vector<16x32xf32>
    %cst_153 = arith.constant dense<0.000000e+00> : vector<16xf32>
    %701 = vector.multi_reduction <add>, %700, %cst_153 [1] : vector<16x32xf32> to vector<16xf32>
    %702 = vector.shape_cast %701 : vector<16xf32> to vector<16x1xf32>
    %cst_154 = arith.constant 3.200000e+01 : f32
    %703 = vector.broadcast %cst_154 : f32 to vector<16x1xf32>
    %704 = arith.divf %702, %703 : vector<16x1xf32>
    %705 = vector.broadcast %697 : vector<16x1xf32> to vector<16x32xf32>
    %706 = arith.subf %691, %705 : vector<16x32xf32>
    %cst_155 = arith.constant 9.99999974E-6 : f32
    %707 = vector.broadcast %cst_155 : f32 to vector<16x1xf32>
    %708 = arith.addf %704, %707 : vector<16x1xf32>
    %709 = math.rsqrt %708 : vector<16x1xf32>
    %710 = vector.broadcast %709 : vector<16x1xf32> to vector<16x32xf32>
    %711 = arith.mulf %706, %710 : vector<16x32xf32>
    %712 = vector.broadcast %692 : vector<1x32xf32> to vector<16x32xf32>
    %713 = arith.mulf %711, %712 : vector<16x32xf32>
    %714 = vector.broadcast %693 : vector<1x32xf32> to vector<16x32xf32>
    %715 = arith.addf %713, %714 : vector<16x32xf32>
    %c2_156 = arith.constant 2 : index
    %c0_157 = arith.constant 0 : index
    %716 = vector.load %arg10[%c2_156, %c0_157] : memref<5x32xf32, #tpu.memory_space<vmem>>, vector<1x32xf32>
    %c3_158 = arith.constant 3 : index
    %c0_159 = arith.constant 0 : index
    %717 = vector.load %arg10[%c3_158, %c0_159] : memref<5x32xf32, #tpu.memory_space<vmem>>, vector<1x32xf32>
    %cst_160 = arith.constant dense<0.000000e+00> : vector<16xf32>
    %718 = vector.multi_reduction <add>, %715, %cst_160 [1] : vector<16x32xf32> to vector<16xf32>
    %719 = vector.shape_cast %718 : vector<16xf32> to vector<16x1xf32>
    %cst_161 = arith.constant 3.200000e+01 : f32
    %720 = vector.broadcast %cst_161 : f32 to vector<16x1xf32>
    %721 = arith.divf %719, %720 : vector<16x1xf32>
    %722 = vector.broadcast %721 : vector<16x1xf32> to vector<16x32xf32>
    %723 = arith.subf %715, %722 : vector<16x32xf32>
    %724 = arith.mulf %723, %723 : vector<16x32xf32>
    %cst_162 = arith.constant dense<0.000000e+00> : vector<16xf32>
    %725 = vector.multi_reduction <add>, %724, %cst_162 [1] : vector<16x32xf32> to vector<16xf32>
    %726 = vector.shape_cast %725 : vector<16xf32> to vector<16x1xf32>
    %cst_163 = arith.constant 3.200000e+01 : f32
    %727 = vector.broadcast %cst_163 : f32 to vector<16x1xf32>
    %728 = arith.divf %726, %727 : vector<16x1xf32>
    %729 = vector.broadcast %721 : vector<16x1xf32> to vector<16x32xf32>
    %730 = arith.subf %715, %729 : vector<16x32xf32>
    %cst_164 = arith.constant 9.99999974E-6 : f32
    %731 = vector.broadcast %cst_164 : f32 to vector<16x1xf32>
    %732 = arith.addf %728, %731 : vector<16x1xf32>
    %733 = math.rsqrt %732 : vector<16x1xf32>
    %734 = vector.broadcast %733 : vector<16x1xf32> to vector<16x32xf32>
    %735 = arith.mulf %730, %734 : vector<16x32xf32>
    %736 = vector.broadcast %716 : vector<1x32xf32> to vector<16x32xf32>
    %737 = arith.mulf %735, %736 : vector<16x32xf32>
    %738 = vector.broadcast %717 : vector<1x32xf32> to vector<16x32xf32>
    %739 = arith.addf %737, %738 : vector<16x32xf32>
    %740 = arith.truncf %739 : vector<16x32xf32> to vector<16x32xbf16>
    %c0_165 = arith.constant 0 : index
    %c0_166 = arith.constant 0 : index
    %741 = vector.load %arg9[%c0_165, %c0_166] : memref<32x32xbf16, #tpu.memory_space<vmem>>, vector<32x32xbf16>
    %cst_167 = arith.constant dense<0.000000e+00> : vector<16x32xf32>
    %742 = tpu.matmul %740, %741, %cst_167 {dimension_numbers = #tpu.dot_dimension_numbers<[1], [0], [0], [1], [0, 0, 1, 1], [], []>} : vector<16x32xbf16>, vector<32x32xbf16>, vector<16x32xf32> -> vector<16x32xf32>
    %c4 = arith.constant 4 : index
    %c0_168 = arith.constant 0 : index
    %743 = vector.load %arg10[%c4, %c0_168] : memref<5x32xf32, #tpu.memory_space<vmem>>, vector<1x32xf32>
    %744 = vector.broadcast %743 : vector<1x32xf32> to vector<16x32xf32>
    %745 = arith.addf %742, %744 : vector<16x32xf32>
    %c0_169 = arith.constant 0 : index
    %c0_170 = arith.constant 0 : index
    %746 = vector.load %arg11[%c0_169, %c0_170] : memref<16x32xf32, #tpu.memory_space<vmem>>, vector<16x32xf32>
    tpu.vector_store %arg11[%c0_169, %c0_170], %745 {strides = array<i32>} : memref<16x32xf32, #tpu.memory_space<vmem>>, vector<16x32xf32>,
    return
  }
  func.func @transform_0(%arg0: i32) -> (i32, i32) {
    %c0_i32 = arith.constant 0 : i32
    %c0_i32_0 = arith.constant 0 : i32
    %c0_i32_1 = arith.constant 0 : i32
    return %c0_i32, %c0_i32_0 : i32, i32
  }
  func.func @transform_1(%arg0: i32) -> (i32, i32) {
    %c0_i32 = arith.constant 0 : i32
    %c0_i32_0 = arith.constant 0 : i32
    %c0_i32_1 = arith.constant 0 : i32
    return %c0_i32, %c0_i32_0 : i32, i32
  }
  func.func @transform_2(%arg0: i32) -> (i32, i32, i32) {
    %c0_i32 = arith.constant 0 : i32
    %c0_i32_0 = arith.constant 0 : i32
    %c0_i32_1 = arith.constant 0 : i32
    %c0_i32_2 = arith.constant 0 : i32
    return %c0_i32, %c0_i32_0, %c0_i32_1 : i32, i32, i32
  }
  func.func @transform_3(%arg0: i32) -> (i32, i32, i32) {
    %c0_i32 = arith.constant 0 : i32
    %c0_i32_0 = arith.constant 0 : i32
    %c0_i32_1 = arith.constant 0 : i32
    %c0_i32_2 = arith.constant 0 : i32
    return %c0_i32, %c0_i32_0, %c0_i32_1 : i32, i32, i32
  }
  func.func @transform_4(%arg0: i32) -> (i32, i32, i32) {
    %c0_i32 = arith.constant 0 : i32
    %c0_i32_0 = arith.constant 0 : i32
    %c0_i32_1 = arith.constant 0 : i32
    %c0_i32_2 = arith.constant 0 : i32
    return %c0_i32, %c0_i32_0, %c0_i32_1 : i32, i32, i32
  }
  func.func @transform_5(%arg0: i32) -> (i32, i32, i32) {
    %c0_i32 = arith.constant 0 : i32
    %c0_i32_0 = arith.constant 0 : i32
    %c0_i32_1 = arith.constant 0 : i32
    %c0_i32_2 = arith.constant 0 : i32
    return %c0_i32, %c0_i32_0, %c0_i32_1 : i32, i32, i32
  }
  func.func @transform_6(%arg0: i32) -> (i32, i32, i32) {
    %c0_i32 = arith.constant 0 : i32
    %c0_i32_0 = arith.constant 0 : i32
    %c0_i32_1 = arith.constant 0 : i32
    %c0_i32_2 = arith.constant 0 : i32
    return %c0_i32, %c0_i32_0, %c0_i32_1 : i32, i32, i32
  }
  func.func @transform_7(%arg0: i32) -> (i32, i32, i32) {
    %c0_i32 = arith.constant 0 : i32
    %c0_i32_0 = arith.constant 0 : i32
    %c0_i32_1 = arith.constant 0 : i32
    %c0_i32_2 = arith.constant 0 : i32
    return %c0_i32, %c0_i32_0, %c0_i32_1 : i32, i32, i32
  }
  func.func @transform_8(%arg0: i32) -> (i32, i32) {
    %c0_i32 = arith.constant 0 : i32
    %c0_i32_0 = arith.constant 0 : i32
    %c0_i32_1 = arith.constant 0 : i32
    return %c0_i32, %c0_i32_0 : i32, i32
  }
  func.func @transform_9(%arg0: i32) -> (i32, i32) {
    %c0_i32 = arith.constant 0 : i32
    %c0_i32_0 = arith.constant 0 : i32
    %c0_i32_1 = arith.constant 0 : i32
    return %c0_i32, %c0_i32_0 : i32, i32
  }
  func.func @transform_10(%arg0: i32) -> (i32, i32) {
    %c0_i32 = arith.constant 0 : i32
    %c0_i32_0 = arith.constant 0 : i32
    %c0_i32_1 = arith.constant 0 : i32
    return %c0_i32, %c0_i32_0 : i32, i32
  }
}

</mosaic_0001>

<bundles_post_ra>
// kernel: tpu_custom_call.1
= control target key start
LH: loop header
LB: loop body
LE: loop exit
PB: predicated region body
PF: predicated region fallthrough
CT: control target
= control target key end

     0   :  { %15 = vsyncpa [#allocation3], 0  ;;  %s8041_s0 = inlined_call_operand.hbm [shape: f32[16,32], index: 0, kind: input, shape index: {}]   ;;  %s8042_s1 = inlined_call_operand.hbm [shape: f32[16,32], index: 1, kind: input, shape index: {}]   ;;  %s8043_s2 = inlined_call_operand.hbm [shape: bf16[4,32,128], index: 2, kind: input, shape index: {}]   ;;  %s8044_s3 = inlined_call_operand.hbm [shape: f32[4,1,128], index: 3, kind: input, shape index: {}]   ;;  %s8045_s4 = inlined_call_operand.vmem [shape: bf16[4,32,128], index: 4, kind: input, shape index: {}]   ;;  %s8046_s5 = inlined_call_operand.hbm [shape: f32[4,1,128], index: 5, kind: input, shape index: {}]   ;;  %s8047_s6 = inlined_call_operand.hbm [shape: bf16[4,32,128], index: 6, kind: input, shape index: {}]   ;;  %s8048_s7 = inlined_call_operand.vmem [shape: f32[4,5,32], index: 7, kind: input, shape index: {}]   ;;  %s8049_s8 = inlined_call_operand.vmem [shape: bf16[32,32], index: 8, kind: input, shape index: {}]   ;;  %s8050_s9 = inlined_call_operand.hbm [shape: f32[5,32], index: 9, kind: input, shape index: {}]   ;;  %s8051_s10 = inlined_call_operand.hbm [shape: f32[16,32], index: 10, kind: output, shape index: {}]  }
   0x1   :  { %16 = vsyncpa [#allocation6], 0 }
   0x2   :  { %17 = vsyncpa [#allocation9], 0 }
   0x3   :  { %18 = vsyncpa [#allocation12], 0 }
   0x4   :  { %19 = vsyncpa [#allocation4], 0  ;;  %s6684_s13 = smov [#allocation5]   ;;  %s6685_s15 = smov [#allocation8]  }
   0x5   :  { %s37_s14 = sshll.u32 %s6684_s13, 4  ;;  %s61_s16 = sshll.u32 %s6685_s15, 4  ;;  %s38_s14 = int_to_ptr.vmem [resolvable:$true] %s37_s14  ;;  %s6761_s16 = int_to_ptr.vmem [resolvable:$true] %s61_s16 }
   0x6   :  { %s6498_s19 = scalar_lea.hbm %s8042_s1, 256 }
   0x7   :  { %p6499_p0 = scmp.ne.s32.totalorder %s8042_s1, %s6498_s19  ;;  %p6502_p1 = scmp.lt.u32.totalorder %s6498_s19, %s8042_s1 }
   0x9   :  { %p6504_p2 = pnand %p6502_p1, %p6499_p0 }
   0xb   :  { %6507 = shalt.err (!%p6504_p2)
}
   0xc   :  { %s6508_s24 = scalar_lea.vmem %s38_s14, 256  ;;  %p6513_p4 = scmp.lt.s32.totalorder %s38_s14, %s38_s14 }
   0xd   :  { %p6509_p3 = scmp.ne.s32.totalorder %s38_s14, %s6508_s24  ;;  %p6514_p5 = scmp.lt.s32.totalorder %s6508_s24, %s6508_s24 }
   0xf   :  { %p6515_p6 = por %p6514_p5, %p6513_p4 }
  0x11   :  { %p6516_p7 = pnand %p6515_p6, %p6509_p3 }
  0x13   :  { %6519 = shalt.err (!%p6516_p7)
}
  0x14   :  { %s6686_s25 = smov 128   ;;  %s6687_s26 = smov 8  }
  0x15   :  { %43 = dma.hbm_to_vmem [thread:$0]  %s8042_s1, 256, %s38_s14, [#allocation6], %s6686_s25, %s6686_s25, %s6687_s26  }
  0x16   :  { %s6520_s11 = scalar_lea.hbm %s8044_s3, 64 }
  0x17   :  { %p6521_p8 = scmp.ne.s32.totalorder %s8044_s3, %s6520_s11  ;;  %p6524_p9 = scmp.lt.u32.totalorder %s6520_s11, %s8044_s3 }
  0x19   :  { %p6526_p10 = pnand %p6524_p9, %p6521_p8 }
  0x1b   :  { %6529 = shalt.err (!%p6526_p10)
}
  0x1c   :  { %s6530_s18 = scalar_lea.vmem %s6761_s16, 64  ;;  %p6535_p12 = scmp.lt.s32.totalorder %s6761_s16, %s6761_s16 }
  0x1d   :  { %p6531_p11 = scmp.ne.s32.totalorder %s6761_s16, %s6530_s18  ;;  %p6536_p13 = scmp.lt.s32.totalorder %s6530_s18, %s6530_s18 }
  0x1f   :  { %p6537_p0 = por %p6536_p13, %p6535_p12 }
  0x21   :  { %p6538_p1 = pnand %p6537_p0, %p6531_p11 }
  0x23   :  { %6541 = shalt.err (!%p6538_p1)
}
  0x24   :  { %s6688_s1 = smov 16   ;;  %s6689_s14 = smov 1  }
  0x25   :  { %67 = dma.hbm_to_vmem [thread:$0]  %s8044_s3, 64, %s6761_s16, [#allocation9], %s6688_s1, %s6688_s1, %s6689_s14  }
  0x26   :  { %s6690_s21 = smov [#allocation11]   ;;  %s6691_s23 = smov [#allocation2]  }
  0x27   :  { %s87_s22 = sshll.u32 %s6690_s21, 4  ;;  %s25_s24 = sshll.u32 %s6691_s23, 4  ;;  %s88_s22 = int_to_ptr.vmem [resolvable:$true] %s87_s22  ;;  %s6798_s24 = int_to_ptr.vmem [resolvable:$true] %s25_s24 }
  0x28   :  { %s6542_s29 = scalar_lea.hbm %s8047_s6, 1024 }
  0x29   :  { %p6543_p2 = scmp.ne.s32.totalorder %s8047_s6, %s6542_s29  ;;  %p6546_p3 = scmp.lt.u32.totalorder %s6542_s29, %s8047_s6 }
  0x2b   :  { %p6548_p4 = pnand %p6546_p3, %p6543_p2 }
  0x2d   :  { %6551 = shalt.err (!%p6548_p4)
}
  0x2e   :  { %s6552_s3 = scalar_lea.vmem %s88_s22, 1024  ;;  %p6557_p6 = scmp.lt.s32.totalorder %s88_s22, %s88_s22 }
  0x2f   :  { %p6553_p5 = scmp.ne.s32.totalorder %s88_s22, %s6552_s3  ;;  %p6558_p7 = scmp.lt.s32.totalorder %s6552_s3, %s6552_s3 }
  0x31   :  { %p6559_p8 = por %p6558_p7, %p6557_p6 }
  0x33   :  { %p6560_p9 = pnand %p6559_p8, %p6553_p5 }
  0x35   :  { %6563 = shalt.err (!%p6560_p9)
}
  0x36   :  { %s6692_s16 = smov 64   ;;  %s6693_s15 = smov 4  }
  0x37   :  { %93 = dma.hbm_to_vmem [thread:$0]  %s8047_s6, 1024, %s88_s22, [#allocation12], %s6692_s16, %s6692_s16, %s6693_s15  }
  0x38   :  { %s6564_s21 = scalar_lea.hbm %s8041_s0, 256 }
  0x39   :  { %p6565_p10 = scmp.ne.s32.totalorder %s8041_s0, %s6564_s21  ;;  %p6568_p11 = scmp.lt.u32.totalorder %s6564_s21, %s8041_s0 }
  0x3b   :  { %p6570_p12 = pnand %p6568_p11, %p6565_p10 }
  0x3d   :  { %6573 = shalt.err (!%p6570_p12)
}
  0x3e   :  { %s6574_s30 = scalar_lea.vmem %s6798_s24, 256  ;;  %p6579_p0 = scmp.lt.s32.totalorder %s6798_s24, %s6798_s24 }
  0x3f   :  { %p6575_p13 = scmp.ne.s32.totalorder %s6798_s24, %s6574_s30  ;;  %p6580_p1 = scmp.lt.s32.totalorder %s6574_s30, %s6574_s30 }
  0x41   :  { %p6581_p2 = por %p6580_p1, %p6579_p0 }
  0x43   :  { %p6582_p3 = pnand %p6581_p2, %p6575_p13 }
  0x45   :  { %6585 = shalt.err (!%p6582_p3)
}
  0x46   :  { %31 = dma.hbm_to_vmem [thread:$0]  %s8041_s0, 256, %s6798_s24, [#allocation3], %s6686_s25, %s6686_s25, %s6687_s26  }
  0x47   :  { %s6694_s11 = smov [#allocation7]   ;;  %s6695_s13 = smov [#allocation10]  }
  0x48   :  { %s49_s12 = sshll.u32 %s6694_s11, 4  ;;  %s75_s3 = sshll.u32 %s6695_s13, 4  ;;  %s50_s12 = int_to_ptr.vmem [resolvable:$true] %s49_s12  ;;  %s6835_s3 = int_to_ptr.vmem [resolvable:$true] %s75_s3 }
  0x49   :  { %s6586_s19 = scalar_lea.hbm %s8043_s2, 1024 }
  0x4a   :  { %p6587_p4 = scmp.ne.s32.totalorder %s8043_s2, %s6586_s19  ;;  %p6590_p5 = scmp.lt.u32.totalorder %s6586_s19, %s8043_s2 }
  0x4c   :  { %p6592_p6 = pnand %p6590_p5, %p6587_p4 }
  0x4e   :  { %6595 = shalt.err (!%p6592_p6)
}
  0x4f   :  { %s6596_s0 = scalar_lea.vmem %s50_s12, 1024  ;;  %p6601_p8 = scmp.lt.s32.totalorder %s50_s12, %s50_s12 }
  0x50   :  { %p6597_p7 = scmp.ne.s32.totalorder %s50_s12, %s6596_s0  ;;  %p6602_p9 = scmp.lt.s32.totalorder %s6596_s0, %s6596_s0 }
  0x52   :  { %p6603_p10 = por %p6602_p9, %p6601_p8 }
  0x54   :  { %p6604_p11 = pnand %p6603_p10, %p6597_p7 }
  0x56   :  { %6607 = shalt.err (!%p6604_p11)
}
  0x57   :  { %55 = dma.hbm_to_vmem [thread:$0]  %s8043_s2, 1024, %s50_s12, [#allocation6], %s6692_s16, %s6692_s16, %s6693_s15  }
  0x58   :  { %s6608_s6 = scalar_lea.hbm %s8046_s5, 64 }
  0x59   :  { %p6609_p12 = scmp.ne.s32.totalorder %s8046_s5, %s6608_s6  ;;  %p6612_p13 = scmp.lt.u32.totalorder %s6608_s6, %s8046_s5 }
  0x5b   :  { %p6614_p0 = pnand %p6612_p13, %p6609_p12 }
  0x5d   :  { %6617 = shalt.err (!%p6614_p0)
}
  0x5e   :  { %s6618_s18 = scalar_lea.vmem %s6835_s3, 64  ;;  %p6623_p2 = scmp.lt.s32.totalorder %s6835_s3, %s6835_s3 }
  0x5f   :  { %p6619_p1 = scmp.ne.s32.totalorder %s6835_s3, %s6618_s18  ;;  %p6624_p3 = scmp.lt.s32.totalorder %s6618_s18, %s6618_s18 }
  0x61   :  { %p6625_p4 = por %p6624_p3, %p6623_p2 }
  0x63   :  { %p6626_p5 = pnand %p6625_p4, %p6619_p1 }
  0x65   :  { %6629 = shalt.err (!%p6626_p5)
}
  0x66   :  { %81 = dma.hbm_to_vmem [thread:$0]  %s8046_s5, 64, %s6835_s3, [#allocation9], %s6688_s1, %s6688_s1, %s6689_s14  }
  0x67   :  { %s6696_s12 = smov [#allocation13]   ;;  %s6630_s23 = scalar_lea.hbm %s8050_s9, 128 }
  0x68   :  { %s104_s19 = sshll.u32 %s6696_s12, 4  ;;  %p6631_p6 = scmp.ne.s32.totalorder %s8050_s9, %s6630_s23  ;;  %s105_s19 = int_to_ptr.vmem [resolvable:$true] %s104_s19 }
  0x69   :  { %p6634_p7 = scmp.lt.u32.totalorder %s6630_s23, %s8050_s9 }
  0x6b   :  { %p6636_p8 = pnand %p6634_p7, %p6631_p6 }
  0x6d   :  { %6639 = shalt.err (!%p6636_p8)
}
  0x6e   :  { %s6640_s29 = scalar_lea.vmem %s105_s19, 128  ;;  %p6645_p10 = scmp.lt.s32.totalorder %s105_s19, %s105_s19 }
  0x6f   :  { %p6641_p9 = scmp.ne.s32.totalorder %s105_s19, %s6640_s29  ;;  %p6646_p11 = scmp.lt.s32.totalorder %s6640_s29, %s6640_s29 }
  0x71   :  { %p6647_p12 = por %p6646_p11, %p6645_p10 }
  0x73   :  { %p6648_p13 = pnand %p6647_p12, %p6641_p9 }
  0x75   :  { %6651 = shalt.err (!%p6648_p13)
}
  0x76   :  { %107 = dma.hbm_to_vmem [thread:$0]  %s8050_s9, 128, %s105_s19, [#allocation12]  }
  0x77   :  { %6674 = dma.done.wait [#allocation3], 256  }
  0x78   :  { %6675 = vsyncadd [#allocation3], 4294967040 }
  0x79   :  { %6676 = dma.done.wait [#allocation6], 1280  }
  0x7a   :  { %6677 = vsyncadd [#allocation6], 4294966016 }
  0x7b   :  { %6678 = dma.done.wait [#allocation9], 128  }
  0x7c   :  { %6679 = vsyncadd [#allocation9], 4294967168 }
  0x7d   :  { %6680 = dma.done.wait [#allocation12], 1152  }
  0x7e   :  { %6681 = vsyncadd [#allocation12], 4294966144  ;;  %v6697_v0 = vmov 0.0   ;;  %vm6698_vm0 = vmmov 0   ;;  %v6890_v1 = vld [vmem:[#allocation7] sm:$0xff]   ;;  %v6892_v2 = vld [vmem:[#allocation7 + $0x8] sm:$0xff]  }
  0x7f   :  { %5700 = vmatprep.subr.bf16.mxu0 %v6697_v0  ;;  %5704 = vmatprep.mubr.msk.bf16.mxu0 %vm6698_vm0, %v6697_v0  ;;  %v130_v3 = vld [vmem:[#allocation5] sm:$0xff]  ;;  %v131_v4 = vld [vmem:[#allocation5 + $0x8] sm:$0xff]  ;;  %v132_v5 = vld [vmem:[#allocation2] sm:$0xff]  ;;  %vm160_vm1 = vcmask 261120   ;;  %s6699_s9 = smov 104   ;;  %s6700_s3 = smov 120  }
  0x80   :  { %5708 = vmatprep.subr.bf16.mxu1 %v6697_v0  ;;  %5710 = vmatprep.mubr.msk.bf16.mxu1 %vm6698_vm0, %v6697_v0  ;;  %v133_v6 = vld [vmem:[#allocation2 + $0x8] sm:$0xff]  ;;  %v6896_v7 = vadd.f32 %v132_v5, %v130_v3  ;;  %v6907_v10 = vld [vmem:[#allocation8] ss:$0 sm:$0xff]  ;;  %s6701_s30 = smov 112   ;;  %s6702_s6 = smov 96   ;;  %vm236_vm2 = vcmask 64512  }
  0x81   :  { %5701 = vmatpush3.bf16.msra.mxu0 %v6890_v1  ;;  %v6898_v8 = vadd.f32 %v133_v6, %v131_v4  ;;  %vm727_vm3 = vcmask 1043456   ;;  %s6703_s22 = smov 32   ;;  %s6704_s11 = smov 24   ;;  %vm1120_vm4 = vcmask 130048   ;;  %vm1122_vm5 = vcmask 195584  }
  0x82   :  { %5702 = vmatprep.subr.bf16.mxu0 %v6697_v0 }
  0x83   :  { %v141_v9 = vpack.c.bf16 %v6898_v8, %v6896_v7 }
  0x85   :  { %5703 = vmatpush3.bf16.msra.mxu0 %v6892_v2 }
  0x86   :  { %5714 = vmatprep.subr.bf16.mxu0 %v6697_v0 }
  0x88   :  { %5705 = vmatmul.mubr.msk.bf16.vlgmr.msra.gmra.mrb[0].mxu0 %vm160_vm1, %v141_v9 }
  0x89   :  { %5716 = vmatprep.mubr.msk.bf16.mxu0 %vm6698_vm0, %v6697_v0 }
 0x15b   :  { %v198_v11 = vpop.f32.mrb[0].mxu0 }
 0x15c   :  { %v199_v12 = vadd.f32 %v6907_v10, %v198_v11  ;;  %v5706_v13 = vpop.f32.mrb[1].mxu0 }
 0x15d   :  { %v201_v14 = vpop.f32.mrb[2].mxu0 }
 0x15e   :  { %212 = vrot.lane.b32.xlu1 %v199_v12, %s6699_s9  ;;  %206 = vrot.lane.b32.xlu0 %v199_v12, %s6700_s3  ;;  %v5707_v15 = vpop.f32.mrb[3].mxu0  ;;  %v202_v16 = vadd.f32 %v6907_v10, %v201_v14  ;;  %v225_v17 = vpack.c.bf16 %v199_v12, %v199_v12 }
 0x160   :  { %v6932_v27 = vpack.c.bf16 %v202_v16, %v202_v16 }
 0x162   :  { %209 = vrot.lane.b32.xlu0 %v199_v12, %s6701_s30  ;;  %216 = vrot.lane.b32.xlu1 %v202_v16, %s6700_s3 }
 0x166   :  { %219 = vrot.lane.b32.xlu0 %v202_v16, %s6701_s30  ;;  %222 = vrot.lane.b32.xlu1 %v202_v16, %s6699_s9 }
 0x16a   :  { %234 = vrot.lane.b32.xlu0 %v225_v17, %s6702_s6 }
 0x1d0   :  { %v213_v18 = vpop.permute.xlu1 %212  ;;  %v207_v19 = vpop.permute.xlu0 %206 }
 0x1d1   :  { %v6918_v20 = vpack.c.bf16 %v207_v19, %v207_v19  ;;  %v6922_v23 = vpack.c.bf16 %v213_v18, %v213_v18 }
 0x1d3   :  { %284 = vrot.lane.b32.xlu1 %v6918_v20, %s6702_s6 }
 0x1d4   :  { %v210_v21 = vpop.permute.xlu0 %209  ;;  %v217_v22 = vpop.permute.xlu1 %216 }
 0x1d5   :  { %v6924_v24 = vpack.c.bf16 %v210_v21, %v210_v21  ;;  %v6930_v26 = vpack.c.bf16 %v217_v22, %v217_v22 }
 0x1d7   :  { %333 = vrot.lane.b32.xlu0 %v6924_v24, %s6702_s6  ;;  %382 = vrot.lane.b32.xlu1 %v6922_v23, %s6702_s6 }
 0x1d8   :  { %v220_v25 = vpop.permute.xlu0 %219  ;;  %v223_v28 = vpop.permute.xlu1 %222 }
 0x1d9   :  { %v6938_v30 = vpack.c.bf16 %v220_v25, %v220_v25  ;;  %v6940_v31 = vpack.c.bf16 %v223_v28, %v223_v28 }
 0x1db   :  { %480 = vrot.lane.b32.xlu1 %v6930_v26, %s6702_s6  ;;  %431 = vrot.lane.b32.xlu0 %v6932_v27, %s6702_s6 }
 0x1dc   :  { %v235_v29 = vpop.permute.xlu0 %234 }
 0x1dd   :  { %v241_v32 = vsel %vm236_vm2, %v235_v29, 0 }
 0x1de   :  { %5709 = vmatpush3.bf16.xpose.msra.mxu1 %v241_v32 }
 0x1df   :  { %578 = vrot.lane.b32.xlu1 %v6940_v31, %s6702_s6  ;;  %529 = vrot.lane.b32.xlu0 %v6938_v30, %s6702_s6 }
 0x1e0   :  { %5720 = vmatprep.subr.bf16.mxu1 %v6697_v0 }
 0x1e3   :  { %722 = vrot.lane.b32.xlu1 %v225_v17, %s6692_s16 }
 0x1e5   :  { %5711 = vmatmul.mubr.msk.bf16.vlgmr.msra.gmra.mrb[0].mxu1 %vm236_vm2, %v225_v17 }
 0x1e6   :  { %5722 = vmatprep.mubr.msk.bf16.mxu1 %vm6698_vm0, %v6697_v0 }
 0x245   :  { %v285_v33 = vpop.permute.xlu1 %284 }
 0x246   :  { %v290_v34 = vsel %vm236_vm2, %v285_v33, 0 }
 0x247   :  { %5715 = vmatpush3.bf16.xpose.msra.mxu0 %v290_v34 }
 0x248   :  { %5726 = vmatprep.subr.bf16.mxu0 %v6697_v0 }
 0x249   :  { %v334_v35 = vpop.permute.xlu0 %333  ;;  %v383_v37 = vpop.permute.xlu1 %382 }
 0x24a   :  { %v339_v36 = vsel %vm236_vm2, %v334_v35, 0  ;;  %v388_v38 = vsel %vm236_vm2, %v383_v37, 0 }
 0x24b   :  { %5721 = vmatpush3.bf16.xpose.msra.mxu1 %v339_v36 }
 0x24c   :  { %5732 = vmatprep.subr.bf16.mxu1 %v6697_v0 }
 0x24d   :  { %v432_v39 = vpop.permute.xlu0 %431  ;;  %v481_v41 = vpop.permute.xlu1 %480 }
 0x24e   :  { %5717 = vmatmul.mubr.msk.bf16.vlgmr.msra.gmra.mrb[4].mxu0 %vm236_vm2, %v6918_v20  ;;  %v437_v40 = vsel %vm236_vm2, %v432_v39, 0  ;;  %v486_v42 = vsel %vm236_vm2, %v481_v41, 0 }
 0x24f   :  { %5727 = vmatpush3.bf16.xpose.msra.mxu0 %v388_v38  ;;  %5728 = vmatprep.mubr.msk.bf16.mxu0 %vm6698_vm0, %v6697_v0 }
 0x250   :  { %5738 = vmatprep.subr.bf16.mxu0 %v6697_v0 }
 0x251   :  { %v530_v43 = vpop.permute.xlu0 %529  ;;  %v579_v44 = vpop.permute.xlu1 %578 }
 0x252   :  { %5723 = vmatmul.mubr.msk.bf16.vlgmr.msra.gmra.mrb[4].mxu1 %vm236_vm2, %v6924_v24  ;;  %v535_v45 = vsel %vm236_vm2, %v530_v43, 0  ;;  %v584_v46 = vsel %vm236_vm2, %v579_v44, 0 }
 0x253   :  { %5733 = vmatpush3.bf16.xpose.msra.mxu1 %v437_v40  ;;  %5734 = vmatprep.mubr.msk.bf16.mxu1 %vm6698_vm0, %v6697_v0 }
 0x254   :  { %5744 = vmatprep.subr.bf16.mxu1 %v6697_v0 }
 0x255   :  { %v723_v47 = vpop.permute.xlu1 %722 }
 0x256   :  { %5729 = vmatmul.mubr.msk.bf16.vlgmr.msra.gmra.mrb[8].mxu0 %vm236_vm2, %v6922_v23  ;;  %v729_v48 = vsel %vm727_vm3, %v723_v47, 0 }
 0x257   :  { %5739 = vmatpush3.bf16.xpose.msra.mxu0 %v486_v42  ;;  %5740 = vmatprep.mubr.msk.bf16.mxu0 %vm6698_vm0, %v6697_v0 }
 0x258   :  { %5750 = vmatprep.subr.bf16.mxu0 %v6697_v0 }
 0x25a   :  { %5735 = vmatmul.mubr.msk.bf16.vlgmr.msra.gmra.mrb[8].mxu1 %vm236_vm2, %v6932_v27 }
 0x25b   :  { %5745 = vmatpush3.bf16.xpose.msra.mxu1 %v535_v45  ;;  %5746 = vmatprep.mubr.msk.bf16.mxu1 %vm6698_vm0, %v6697_v0 }
 0x25c   :  { %5756 = vmatprep.subr.bf16.mxu1 %v6697_v0 }
 0x25e   :  { %5741 = vmatmul.mubr.msk.bf16.vlgmr.msra.gmra.mrb[12].mxu0 %vm236_vm2, %v6930_v26 }
 0x25f   :  { %5751 = vmatpush3.bf16.xpose.msra.mxu0 %v584_v46  ;;  %5752 = vmatprep.mubr.msk.bf16.mxu0 %vm6698_vm0, %v6697_v0 }
 0x260   :  { %5762 = vmatprep.subr.bf16.mxu0 %v6697_v0 }
 0x262   :  { %5747 = vmatmul.mubr.msk.bf16.vlgmr.msra.gmra.mrb[12].mxu1 %vm236_vm2, %v6938_v30 }
 0x263   :  { %5757 = vmatpush3.bf16.msra.mxu1 %v729_v48  ;;  %5758 = vmatprep.mubr.msk.bf16.mxu1 %vm6698_vm0, %v6697_v0 }
 0x264   :  { %5768 = vmatprep.subr.bf16.mxu1 %v6697_v0 }
 0x266   :  { %5753 = vmatmul.mubr.msk.bf16.vlgmr.msra.gmra.mrb[16].mxu0 %vm236_vm2, %v6940_v31 }
 0x267   :  { %5764 = vmatprep.mubr.msk.bf16.mxu0 %vm6698_vm0, %v6697_v0 }
 0x2b8   :  { %v277_v49 = vpop.f32.mrb[0].mxu1 }
 0x2b9   :  { %v5712_v50 = vpop.f32.mrb[1].mxu1  ;;  %v626_v51 = vsel %vm236_vm2, %v277_v49, -inf }
 0x2ba   :  { %v280_v52 = vpop.f32.mrb[2].mxu1  ;;  %627 = vmax.xlane.f32.xlu0 %v626_v51 }
 0x2bb   :  { %v5713_v53 = vpop.f32.mrb[3].mxu1 }
 0x321   :  { %v326_v54 = vpop.f32.mrb[4].mxu0 }
 0x322   :  { %v5718_v55 = vpop.f32.mrb[5].mxu0  ;;  %v629_v56 = vsel %vm236_vm2, %v326_v54, -inf }
 0x323   :  { %630 = vmax.xlane.f32.xlu1 %v629_v56  ;;  %v329_v57 = vpop.f32.mrb[6].mxu0 }
 0x324   :  { %v5719_v58 = vpop.f32.mrb[7].mxu0 }
 0x325   :  { %v375_v59 = vpop.f32.mrb[4].mxu1 }
 0x326   :  { %v5724_v60 = vpop.f32.mrb[5].mxu1  ;;  %v632_v61 = vsel %vm236_vm2, %v375_v59, -inf }
 0x327   :  { %v378_v62 = vpop.f32.mrb[6].mxu1  ;;  %633 = vmax.xlane.f32.xlu0 %v632_v61 }
 0x328   :  { %v5725_v63 = vpop.f32.mrb[7].mxu1 }
 0x329   :  { %v424_v3 = vpop.f32.mrb[8].mxu0 }
 0x32a   :  { %v5730_v4 = vpop.f32.mrb[9].mxu0  ;;  %v635_v5 = vsel %vm236_vm2, %v424_v3, -inf }
 0x32b   :  { %636 = vmax.xlane.f32.xlu0 %v635_v5  ;;  %v427_v6 = vpop.f32.mrb[10].mxu0 }
 0x32c   :  { %v5731_v9 = vpop.f32.mrb[11].mxu0 }
 0x32d   :  { %v7000_v11 = vpop.f32.mrb[8].mxu1 }
 0x32e   :  { %v5736_v12 = vpop.f32.mrb[9].mxu1  ;;  %v638_v13 = vsel %vm236_vm2, %v7000_v11, -inf }
 0x32f   :  { %v476_v14 = vpop.f32.mrb[10].mxu1  ;;  %639 = vmax.xlane.f32.xlu1 %v638_v13 }
 0x330   :  { %v5737_v15 = vpop.f32.mrb[11].mxu1 }
 0x331   :  { %v7004_v16 = vpop.f32.mrb[12].mxu0 }
 0x332   :  { %v5742_v17 = vpop.f32.mrb[13].mxu0  ;;  %v641_v18 = vsel %vm236_vm2, %v7004_v16, -inf }
 0x333   :  { %642 = vmax.xlane.f32.xlu0 %v641_v18  ;;  %v525_v19 = vpop.f32.mrb[14].mxu0 }
 0x334   :  { %v5743_v21 = vpop.f32.mrb[15].mxu0 }
 0x335   :  { %v571_v22 = vpop.f32.mrb[12].mxu1 }
 0x336   :  { %v5748_v25 = vpop.f32.mrb[13].mxu1  ;;  %v644_v28 = vsel %vm236_vm2, %v571_v22, -inf }
 0x337   :  { %v574_v29 = vpop.f32.mrb[14].mxu1  ;;  %645 = vmax.xlane.f32.xlu1 %v644_v28 }
 0x338   :  { %v5749_v32 = vpop.f32.mrb[15].mxu1 }
 0x339   :  { %v620_v33 = vpop.f32.mrb[16].mxu0 }
 0x33a   :  { %v5754_v34 = vpop.f32.mrb[17].mxu0  ;;  %v647_v35 = vsel %vm236_vm2, %v620_v33, -inf }
 0x33b   :  { %648 = vmax.xlane.f32.xlu0 %v647_v35  ;;  %v623_v36 = vpop.f32.mrb[18].mxu0 }
 0x33c   :  { %v5755_v37 = vpop.f32.mrb[19].mxu0 }
 0x347   :  { %v628_v38 = vpop.xlane.xlu0 %627 }
 0x348   :  { %819 = vrot.lane.b32.xlu1 %v6924_v24, %s6692_s16  ;;  %v650_v39 = vsub.f32 %v277_v49, %v628_v38 }
 0x34a   :  { %v658_v40 = vmul.f32 1.442695, %v650_v39 }
 0x34c   :  { %867 = vrot.lane.b32.xlu1 %v6922_v23, %s6692_s16  ;;  %6328 = vpow2.f32 %v658_v40 }
 0x351   :  { %771 = vrot.lane.b32.xlu0 %v6918_v20, %s6692_s16 }
 0x356   :  { %v7016_v41 = vpop.eup %6328 }
 0x357   :  { %v674_v42 = vsel %vm236_vm2, %v7016_v41, 0.0 }
 0x370   :  { %675 = vadd.xlane.f32.xlu1 %v674_v42 }
 0x3b0   :  { %v631_v43 = vpop.xlane.xlu1 %630 }
 0x3b1   :  { %v651_v44 = vsub.f32 %v326_v54, %v631_v43 }
 0x3b3   :  { %v660_v45 = vmul.f32 1.442695, %v651_v44 }
 0x3b4   :  { %v634_v24 = vpop.xlane.xlu0 %633 }
 0x3b5   :  { %6330 = vpow2.f32 %v660_v45  ;;  %v652_v46 = vsub.f32 %v375_v59, %v634_v24 }
 0x3b7   :  { %v662_v23 = vmul.f32 1.442695, %v652_v46 }
 0x3b8   :  { %v637_v47 = vpop.xlane.xlu0 %636 }
 0x3b9   :  { %6332 = vpow2.f32 %v662_v23  ;;  %v653_v20 = vsub.f32 %v424_v3, %v637_v47 }
 0x3bb   :  { %v664_v48 = vmul.f32 1.442695, %v653_v20 }
 0x3bc   :  { %v640_v59 = vpop.xlane.xlu1 %639 }
 0x3bd   :  { %6334 = vpow2.f32 %v664_v48  ;;  %v654_v60 = vsub.f32 %v7000_v11, %v640_v59 }
 0x3bf   :  { %v7020_v49 = vpop.eup %6330  ;;  %v666_v63 = vmul.f32 1.442695, %v654_v60 }
 0x3c0   :  { %v677_v50 = vsel %vm236_vm2, %v7020_v49, 0.0  ;;  %v643_v52 = vpop.xlane.xlu0 %642 }
 0x3c1   :  { %678 = vadd.xlane.f32.xlu0 %v677_v50  ;;  %v655_v62 = vsub.f32 %v7004_v16, %v643_v52  ;;  %6336 = vpow2.f32 %v666_v63 }
 0x3c3   :  { %v7024_v51 = vpop.eup %6332  ;;  %v668_v4 = vmul.f32 1.442695, %v655_v62 }
 0x3c4   :  { %v680_v53 = vsel %vm236_vm2, %v7024_v51, 0.0  ;;  %v646_v61 = vpop.xlane.xlu1 %645 }
 0x3c5   :  { %681 = vadd.xlane.f32.xlu1 %v680_v53  ;;  %v656_v3 = vsub.f32 %v571_v22, %v646_v61  ;;  %6338 = vpow2.f32 %v668_v4 }
 0x3c7   :  { %v7028_v54 = vpop.eup %6334  ;;  %v670_v5 = vmul.f32 1.442695, %v656_v3 }
 0x3c8   :  { %v649_v55 = vpop.xlane.xlu0 %648  ;;  %v683_v56 = vsel %vm236_vm2, %v7028_v54, 0.0  ;;  %v820_v12 = vpop.permute.xlu1 %819 }
 0x3c9   :  { %684 = vadd.xlane.f32.xlu0 %v683_v56  ;;  %v657_v6 = vsub.f32 %v620_v33, %v649_v55  ;;  %6340 = vpow2.f32 %v670_v5  ;;  %v825_v28 = vsel %vm727_vm3, %v820_v12, 0 }
 0x3cb   :  { %v672_v9 = vmul.f32 1.442695, %v657_v6 }
 0x3cc   :  { %v772_v57 = vpop.permute.xlu0 %771  ;;  %v868_v13 = vpop.permute.xlu1 %867 }
 0x3cd   :  { %v777_v58 = vsel %vm727_vm3, %v772_v57, 0  ;;  %6342 = vpow2.f32 %v672_v9  ;;  %v873_v38 = vsel %vm727_vm3, %v868_v13, 0 }
 0x3ce   :  { %5763 = vmatpush3.bf16.msra.mxu0 %v777_v58 }
 0x3cf   :  { %5774 = vmatprep.subr.bf16.mxu0 %v6697_v0 }
 0x3d6   :  { %963 = vrot.lane.b32.xlu1 %v6930_v26, %s6692_s16  ;;  %v7040_v26 = vpop.eup %6336 }
 0x3d7   :  { %v686_v11 = vsel %vm236_vm2, %v7040_v26, 0.0 }
 0x3df   :  { %915 = vrot.lane.b32.xlu0 %v6932_v27, %s6692_s16  ;;  %v7042_v27 = vpop.eup %6338 }
 0x3e0   :  { %v7046_v14 = vpop.eup %6340  ;;  %v689_v17 = vsel %vm236_vm2, %v7042_v27, 0.0 }
 0x3e1   :  { %v692_v16 = vsel %vm236_vm2, %v7046_v14, 0.0  ;;  %v7052_v18 = vpop.eup %6342 }
 0x3e2   :  { %v695_v19 = vsel %vm236_vm2, %v7052_v18, 0.0 }
 0x3fa   :  { %687 = vadd.xlane.f32.xlu1 %v686_v11 }
 0x3fd   :  { %v676_v15 = vpop.xlane.xlu1 %675 }
 0x3fe   :  { %6344 = vrcp.f32 %v676_v15  ;;  %693 = vadd.xlane.f32.xlu1 %v692_v16  ;;  %690 = vadd.xlane.f32.xlu0 %v689_v17 }
 0x402   :  { %696 = vadd.xlane.f32.xlu0 %v695_v19 }
 0x408   :  { %v6345_v21 = vpop.eup %6344 }
 0x409   :  { %v706_v22 = vmul.f32 %v6345_v21, %v7016_v41 }
 0x40b   :  { %v714_v25 = vpack.c.bf16 %v706_v22, %v706_v22 }
 0x40d   :  { %5759 = vmatmul.mubr.msk.bf16.vlgmr.msra.gmra.mrb[16].mxu1 %vm236_vm2, %v714_v25 }
 0x40e   :  { %5769 = vmatpush3.bf16.msra.mxu1 %v825_v28  ;;  %5770 = vmatprep.mubr.msk.bf16.mxu1 %vm6698_vm0, %v6697_v0 }
 0x40f   :  { %1059 = vrot.lane.b32.xlu1 %v6940_v31, %s6692_s16  ;;  %5780 = vmatprep.subr.bf16.mxu1 %v6697_v0 }
 0x418   :  { %1011 = vrot.lane.b32.xlu0 %v6938_v30, %s6692_s16 }
 0x41c   :  { %1140 = vrot.lane.b32.xlu0 %v6890_v1, %s6703_s22 }
 0x44e   :  { %v679_v29 = vpop.xlane.xlu0 %678 }
 0x44f   :  { %6346 = vrcp.f32 %v679_v29 }
 0x452   :  { %v682_v32 = vpop.xlane.xlu1 %681 }
 0x453   :  { %6348 = vrcp.f32 %v682_v32 }
 0x456   :  { %v685_v33 = vpop.xlane.xlu0 %684  ;;  %v964_v43 = vpop.permute.xlu1 %963 }
 0x457   :  { %6350 = vrcp.f32 %v685_v33  ;;  %v969_v45 = vsel %vm727_vm3, %v964_v43, 0 }
 0x459   :  { %v6347_v34 = vpop.eup %6346 }
 0x45a   :  { %v707_v35 = vmul.f32 %v6347_v34, %v7020_v49  ;;  %v916_v39 = vpop.permute.xlu0 %915 }
 0x45b   :  { %v921_v41 = vsel %vm727_vm3, %v916_v39, 0 }
 0x45c   :  { %v715_v36 = vpack.c.bf16 %v707_v35, %v707_v35 }
 0x45d   :  { %v6349_v37 = vpop.eup %6348 }
 0x45e   :  { %5765 = vmatmul.mubr.msk.bf16.vlgmr.msra.gmra.mrb[20].mxu0 %vm236_vm2, %v715_v36  ;;  %v708_v31 = vmul.f32 %v6349_v37, %v7024_v51 }
 0x45f   :  { %5775 = vmatpush3.bf16.msra.mxu0 %v873_v38  ;;  %5776 = vmatprep.mubr.msk.bf16.mxu0 %vm6698_vm0, %v6697_v0 }
 0x460   :  { %v716_v30 = vpack.c.bf16 %v708_v31, %v708_v31  ;;  %5786 = vmatprep.subr.bf16.mxu0 %v6697_v0 }
 0x461   :  { %v6351_v40 = vpop.eup %6350 }
 0x462   :  { %5771 = vmatmul.mubr.msk.bf16.vlgmr.msra.gmra.mrb[20].mxu1 %vm236_vm2, %v716_v30  ;;  %v709_v42 = vmul.f32 %v6351_v40, %v7028_v54 }
 0x463   :  { %5781 = vmatpush3.bf16.msra.mxu1 %v921_v41  ;;  %5782 = vmatprep.mubr.msk.bf16.mxu1 %vm6698_vm0, %v6697_v0 }
 0x464   :  { %v717_v44 = vpack.c.bf16 %v709_v42, %v709_v42  ;;  %5792 = vmatprep.subr.bf16.mxu1 %v6697_v0 }
 0x466   :  { %5777 = vmatmul.mubr.msk.bf16.vlgmr.msra.gmra.mrb[24].mxu0 %vm236_vm2, %v717_v44 }
 0x467   :  { %5787 = vmatpush3.bf16.msra.mxu0 %v969_v45  ;;  %5788 = vmatprep.mubr.msk.bf16.mxu0 %vm6698_vm0, %v6697_v0 }
 0x468   :  { %5798 = vmatprep.subr.bf16.mxu0 %v6697_v0 }
 0x487   :  { %v688_v24 = vpop.xlane.xlu1 %687 }
 0x488   :  { %6352 = vrcp.f32 %v688_v24 }
 0x48b   :  { %v694_v46 = vpop.xlane.xlu1 %693  ;;  %v691_v23 = vpop.xlane.xlu0 %690 }
 0x48c   :  { %6354 = vrcp.f32 %v694_v46 }
 0x48d   :  { %6356 = vrcp.f32 %v691_v23 }
 0x48f   :  { %v697_v47 = vpop.xlane.xlu0 %696  ;;  %v1060_v55 = vpop.permute.xlu1 %1059 }
 0x490   :  { %6358 = vrcp.f32 %v697_v47  ;;  %v1065_v59 = vsel %vm727_vm3, %v1060_v55, 0 }
 0x492   :  { %v6353_v20 = vpop.eup %6352 }
 0x493   :  { %v710_v48 = vmul.f32 %v6353_v20, %v7040_v26  ;;  %v1012_v49 = vpop.permute.xlu0 %1011 }
 0x494   :  { %v1017_v53 = vsel %vm727_vm3, %v1012_v49, 0 }
 0x495   :  { %v718_v50 = vpack.c.bf16 %v710_v48, %v710_v48 }
 0x496   :  { %v6355_v51 = vpop.eup %6354 }
 0x497   :  { %v6357_v52 = vpop.eup %6356  ;;  %5783 = vmatmul.mubr.msk.bf16.vlgmr.msra.gmra.mrb[24].mxu1 %vm236_vm2, %v718_v50  ;;  %v712_v56 = vmul.f32 %v6355_v51, %v7046_v14  ;;  %v1141_v19 = vpop.permute.xlu0 %1140 }
 0x498   :  { %5793 = vmatpush3.bf16.msra.mxu1 %v1017_v53  ;;  %v711_v54 = vmul.f32 %v6357_v52, %v7042_v27  ;;  %5794 = vmatprep.mubr.msk.bf16.mxu1 %vm6698_vm0, %v6697_v0 }
 0x499   :  { %5804 = vmatprep.subr.bf16.mxu1 %v6697_v0  ;;  %v720_v60 = vpack.c.bf16 %v712_v56, %v712_v56 }
 0x49a   :  { %v719_v57 = vpack.c.bf16 %v711_v54, %v711_v54  ;;  %v6359_v58 = vpop.eup %6358 }
 0x49b   :  { %v713_v61 = vmul.f32 %v6359_v58, %v7052_v18 }
 0x49c   :  { %5789 = vmatmul.mubr.msk.bf16.vlgmr.msra.gmra.mrb[28].mxu0 %vm236_vm2, %v719_v57 }
 0x49d   :  { %5799 = vmatpush3.bf16.msra.mxu0 %v1065_v59  ;;  %5800 = vmatprep.mubr.msk.bf16.mxu0 %vm6698_vm0, %v6697_v0  ;;  %v721_v62 = vpack.c.bf16 %v713_v61, %v713_v61 }
 0x49e   :  { %5812 = vmatprep.subr.bf16.mxu0 %v6697_v0 }
 0x49f   :  { %5795 = vmatmul.mubr.msk.bf16.vlgmr.msra.gmra.mrb[28].mxu1 %vm236_vm2, %v720_v60 }
 0x4a0   :  { %5808 = vmatprep.mubr.msk.bf16.mxu1 %vm6698_vm0, %v6697_v0  ;;  %5805 = vmatpush3.bf16.msra.mxu1 %v1141_v19 }
 0x4a1   :  { %5806 = vmatprep.subr.bf16.mxu1 %v6697_v0 }
 0x4a4   :  { %5801 = vmatmul.mubr.msk.bf16.vlgmr.msra.gmra.mrb[32].mxu0 %vm236_vm2, %v721_v62 }
 0x4a5   :  { %5816 = vmatprep.mubr.msk.bf16.mxu0 %vm6698_vm0, %v6697_v0 }
 0x4e0   :  { %v765_v63 = vpop.f32.mrb[16].mxu1 }
 0x4e1   :  { %v5760_v3 = vpop.f32.mrb[17].mxu1 }
 0x4e2   :  { %v768_v4 = vpop.f32.mrb[18].mxu1 }
 0x4e3   :  { %v5761_v5 = vpop.f32.mrb[19].mxu1 }
 0x531   :  { %v813_v6 = vpop.f32.mrb[20].mxu0 }
 0x532   :  { %v5766_v9 = vpop.f32.mrb[21].mxu0 }
 0x533   :  { %v816_v12 = vpop.f32.mrb[22].mxu0 }
 0x534   :  { %v5767_v26 = vpop.f32.mrb[23].mxu0 }
 0x535   :  { %v861_v27 = vpop.f32.mrb[20].mxu1 }
 0x536   :  { %v5772_v13 = vpop.f32.mrb[21].mxu1 }
 0x537   :  { %v864_v11 = vpop.f32.mrb[22].mxu1 }
 0x538   :  { %v5773_v14 = vpop.f32.mrb[23].mxu1 }
 0x539   :  { %v909_v15 = vpop.f32.mrb[24].mxu0 }
 0x53a   :  { %v5778_v16 = vpop.f32.mrb[25].mxu0 }
 0x53b   :  { %v912_v17 = vpop.f32.mrb[26].mxu0  ;;  %v6306_v16 = vld [vmem:[#allocation11] sm:$0xff]  }
 0x53c   :  { %v5779_v18 = vpop.f32.mrb[27].mxu0 }
 0x56a   :  { %v957_v21 = vpop.f32.mrb[24].mxu1 }
 0x56b   :  { %v5784_v22 = vpop.f32.mrb[25].mxu1 }
 0x56c   :  { %v960_v25 = vpop.f32.mrb[26].mxu1 }
 0x56d   :  { %v5785_v1 = vpop.f32.mrb[27].mxu1 }
 0x56f   :  { %v1005_v28 = vpop.f32.mrb[28].mxu0 }
 0x570   :  { %v6242_v29 = vpack.i.bf16 %v1005_v28, %v813_v6  ;;  %v5790_v32 = vpop.f32.mrb[29].mxu0 }
 0x571   :  { %v1008_v33 = vpop.f32.mrb[30].mxu0  ;;  %v7147_v32 = vld [vmem:[%s8048_s7] sm:$0x1f] }
 0x572   :  { %6243 = vrot.lane.b32.xlu1 %v6242_v29, %s6687_s26  ;;  %v5791_v34 = vpop.f32.mrb[31].mxu0  ;;  %v1053_v35 = vpop.f32.mrb[28].mxu1 }
 0x573   :  { %v6247_v36 = vpack.i.bf16 %v1053_v35, %v861_v27  ;;  %v5796_v37 = vpop.f32.mrb[29].mxu1 }
 0x574   :  { %v1056_v38 = vpop.f32.mrb[30].mxu1 }
 0x575   :  { %6248 = vrot.lane.b32.xlu0 %v6247_v36, %s6688_s1  ;;  %v5797_v31 = vpop.f32.mrb[31].mxu1 }
 0x577   :  { %v1101_v39 = vpop.f32.mrb[32].mxu0 }
 0x578   :  { %v6252_v30 = vpack.i.bf16 %v1101_v39, %v909_v15  ;;  %v5802_v40 = vpop.f32.mrb[33].mxu0  ;;  %v6305_v15 = vld [vmem:[%s8045_s4 + $0x8] sm:$0xff]  }
 0x579   :  { %v1104_v41 = vpop.f32.mrb[34].mxu0  ;;  %1142 = vrot.lane.b32.xlu0 %v6892_v2, %s6703_s22 }
 0x57a   :  { %6253 = vrot.lane.b32.xlu1 %v6252_v30, %s6704_s11  ;;  %v5803_v42 = vpop.f32.mrb[35].mxu0 }
 0x57e   :  { %1146 = vrot.lane.b32.xlu1 %v6907_v10, %s6703_s22 }
 0x5e4   :  { %v6244_v43 = vpop.permute.xlu1 %6243 }
 0x5e5   :  { %v6246_v45 = vunpack.i.h.bf16 %v6244_v43  ;;  %v6245_v24 = vunpack.i.l.bf16 %v6244_v43  ;;  %v6307_v43 = vld [vmem:[#allocation11 + $0x8] sm:$0xff]  }
 0x5e7   :  { %v6249_v44 = vpop.permute.xlu0 %6248  ;;  %v1136_v2 = vsel %vm236_vm2, %v957_v21, %v6246_v45  ;;  %v1119_v48 = vsel %vm236_vm2, %v765_v63, %v6245_v24  ;;  %v1223_v21 = vlaneseq }
 0x5e8   :  { %v6251_v46 = vunpack.i.h.bf16 %v6249_v44  ;;  %v6250_v23 = vunpack.i.l.bf16 %v6249_v44  ;;  %v5411_v44 = vld [vmem:[#allocation10] ss:$0 sm:$0xff] }
 0x5e9   :  { %v7139_v28 = vshrl.u32 %v1223_v21, 7 }
 0x5ea   :  { %v1121_v10 = vsel %vm1120_vm4, %v1119_v48, %v6250_v23  ;;  %v1137_v51 = vsel %vm1120_vm4, %v1136_v2, %v6251_v46 }
 0x5eb   :  { %v1143_v47 = vpop.permute.xlu0 %1142  ;;  %v7142_v29 = vsub.s32 0, %v7139_v28  ;;  %v7152_v36 = vsub.s32 1, %v7139_v28 }
 0x5ec   :  { %v6254_v20 = vpop.permute.xlu1 %6253  ;;  %5807 = vmatpush3.bf16.msra.mxu1 %v1143_v47 }
 0x5ed   :  { %v6256_v49 = vunpack.i.h.bf16 %v6254_v20  ;;  %v6255_v50 = vunpack.i.l.bf16 %v6254_v20  ;;  %5820 = vmatprep.subr.bf16.mxu1 %v6697_v0  ;;  %v1226_v34 = vrot.slane %v7147_v32, %v7142_v29  ;;  %v1232_v39 = vrot.slane %v7147_v32, %v7152_v36 }
 0x5ef   :  { %v1138_v52 = vsel %vm1122_vm5, %v1137_v51, %v6256_v49  ;;  %v1123_v53 = vsel %vm1122_vm5, %v1121_v10, %v6255_v50  ;;  %v7163_v50 = vsub.s32 4, %v7139_v28 }
 0x5f0   :  { %v1139_v54 = vpack.c.bf16 %v1138_v52, %v1123_v53  ;;  %v1147_v55 = vpop.permute.xlu1 %1146 }
 0x5f1   :  { %v1313_v10 = vrot.slane %v7147_v32, %v7163_v50 }
 0x5f2   :  { %5809 = vmatmul.mubr.msk.bf16.vlgmr.msra.gmra.mrb[32].mxu1 %vm160_vm1, %v1139_v54 }
 0x5f3   :  { %5824 = vmatprep.mubr.msk.bf16.mxu1 %vm6698_vm0, %v6697_v0 }
 0x5f5   :  { %5821 = vmatpush3.bf16.xpose.msra.mxu1 %v6306_v16 }
 0x5f6   :  { %5822 = vmatprep.subr.bf16.mxu1 %v6697_v0 }
 0x5fd   :  { %5823 = vmatpush3.bf16.xpose.msra.mxu1 %v6307_v43 }
 0x5fe   :  { %5842 = vmatprep.subr.bf16.mxu1 %v6697_v0 }
 0x6c5   :  { %v1186_v56 = vpop.f32.mrb[32].mxu1 }
 0x6c6   :  { %v1187_v57 = vadd.f32 %v1186_v56, %v1147_v55  ;;  %v5810_v58 = vpop.f32.mrb[33].mxu1 }
 0x6c7   :  { %v1189_v59 = vpop.f32.mrb[34].mxu1 }
 0x6c8   :  { %v1190_v60 = vadd.f32 %v1189_v59, %v1147_v55  ;;  %v5811_v61 = vpop.f32.mrb[35].mxu1  ;;  %v1194_v62 = vadd.f32 %v1187_v57, %v6896_v7 }
 0x6ca   :  { %v1196_v63 = vsel %vm160_vm1, %v1194_v62, 0.0  ;;  %v1195_v3 = vadd.f32 %v1190_v60, %v6898_v8  ;;  %v6304_v8 = vld [vmem:[%s8045_s4] sm:$0xff]  }
 0x6cb   :  { %1197 = vadd.xlane.f32.xlu0 %v1196_v63  ;;  %5813 = vmatpush3.bf16.msra.mxu0 %v6304_v8 }
 0x6cc   :  { %v1199_v4 = vsel %vm160_vm1, %v1195_v3, 0.0  ;;  %5814 = vmatprep.subr.bf16.mxu0 %v6697_v0 }
 0x6cd   :  { %1200 = vadd.xlane.f32.xlu1 %v1199_v4 }
 0x6cf   :  { %5815 = vmatpush3.bf16.msra.mxu0 %v6305_v15 }
 0x6d0   :  { %5828 = vmatprep.subr.bf16.mxu0 %v6697_v0 }
 0x758   :  { %v1198_v5 = vpop.xlane.xlu0 %1197 }
 0x759   :  { %v1203_v6 = vmul.f32 0.03125, %v1198_v5 }
 0x75a   :  { %v1201_v9 = vpop.xlane.xlu1 %1200 }
 0x75b   :  { %v1205_v12 = vsub.f32 %v1194_v62, %v1203_v6  ;;  %v1204_v26 = vmul.f32 0.03125, %v1201_v9 }
 0x75d   :  { %v1206_v27 = vsub.f32 %v1195_v3, %v1204_v26  ;;  %v1207_v13 = vmul.f32 %v1205_v12, %v1205_v12 }
 0x75f   :  { %v1209_v11 = vsel %vm160_vm1, %v1207_v13, 0.0  ;;  %v1208_v14 = vmul.f32 %v1206_v27, %v1206_v27  ;;  %v7174_v13 = vld [vmem:[#allocation7 + $0x18] sm:$0xff]  }
 0x760   :  { %1210 = vadd.xlane.f32.xlu0 %v1209_v11 }
 0x761   :  { %v1212_v7 = vsel %vm160_vm1, %v1208_v14, 0.0 }
 0x764   :  { %1213 = vadd.xlane.f32.xlu0 %v1212_v7 }
 0x7ed   :  { %v1211_v17 = vpop.xlane.xlu0 %1210 }
 0x7ee   :  { %v1215_v18 = vmul.f32 0.03125, %v1211_v17  ;;  %v7180_v17 = vsub.s32 2, %v7139_v28 }
 0x7f0   :  { %v1217_v19 = vadd.f32 1e-05, %v1215_v18  ;;  %v1398_v18 = vrot.slane %v7147_v32, %v7180_v17 }
 0x7f1   :  { %v1214_v22 = vpop.xlane.xlu0 %1213 }
 0x7f2   :  { %6360 = vrsqrt.f32 %v1217_v19  ;;  %v1216_v25 = vmul.f32 0.03125, %v1214_v22  ;;  %v7185_v19 = vsub.s32 3, %v7139_v28  ;;  %v7198_v28 = vld [vmem:[#allocation8 + $0x1] ss:$0 sm:$0xff] }
 0x7f4   :  { %v1218_v1 = vadd.f32 1e-05, %v1216_v25 }
 0x7f6   :  { %6362 = vrsqrt.f32 %v1218_v1 }
 0x7fc   :  { %v6361_v33 = vpop.eup %6360 }
 0x7fd   :  { %v1221_v35 = vmul.f32 %v6361_v33, %v1205_v12 }
 0x7ff   :  { %v1227_v38 = vmul.f32 %v1226_v34, %v1221_v35 }
 0x800   :  { %v6363_v37 = vpop.eup %6362 }
 0x801   :  { %v1222_v31 = vmul.f32 %v6363_v37, %v1206_v27  ;;  %v1233_v40 = vadd.f32 %v1232_v39, %v1227_v38  ;;  %v7171_v27 = vld [vmem:[#allocation7 + $0x10] sm:$0xff]  }
 0x803   :  { %v1228_v30 = vmul.f32 %v1226_v34, %v1222_v31  ;;  %v1404_v34 = vrot.slane %v7147_v32, %v7185_v19 }
 0x805   :  { %v1234_v41 = vadd.f32 %v1232_v39, %v1228_v30 }
 0x807   :  { %v1235_v42 = vpack.c.bf16 %v1234_v41, %v1233_v40 }
 0x809   :  { %5817 = vmatmul.mubr.msk.bf16.vlgmr.msra.gmra.mrb[36].mxu0 %vm160_vm1, %v1235_v42 }
 0x80a   :  { %5832 = vmatprep.mubr.msk.bf16.mxu0 %vm6698_vm0, %v6697_v0  ;;  %5829 = vmatpush3.bf16.msra.mxu0 %v7171_v27 }
 0x80b   :  { %5830 = vmatprep.subr.bf16.mxu0 %v6697_v0 }
 0x80e   :  { %5831 = vmatpush3.bf16.msra.mxu0 %v7174_v13 }
 0x80f   :  { %5836 = vmatprep.subr.bf16.mxu0 %v6697_v0 }
 0x8dc   :  { %v1296_v45 = vpop.f32.mrb[36].mxu0 }
 0x8dd   :  { %v1297_v24 = vadd.f32 %v5411_v44, %v1296_v45  ;;  %v5818_v46 = vpop.f32.mrb[37].mxu0 }
 0x8de   :  { %v1299_v23 = vpop.f32.mrb[38].mxu0 }
 0x8df   :  { %v1300_v47 = vadd.f32 %v5411_v44, %v1299_v23  ;;  %v5819_v20 = vpop.f32.mrb[39].mxu0  ;;  %v1303_v2 = vmax.f32 %v1297_v24, 0.0 }
 0x8e1   :  { %v1304_v48 = vmax.f32 %v1300_v47, 0.0 }
 0x8e3   :  { %v1305_v49 = vpack.c.bf16 %v1304_v48, %v1303_v2 }
 0x8e5   :  { %5825 = vmatmul.mubr.bf16.vlgmr.msra.gmra.mrb[36].mxu1 %v1305_v49 }
 0x8e6   :  { %5844 = vmatprep.mubr.msk.bf16.mxu1 %vm6698_vm0, %v6697_v0 }
 0x9b8   :  { %v1360_v51 = vpop.f32.mrb[36].mxu1 }
 0x9b9   :  { %v1361_v52 = vadd.f32 %v1360_v51, %v1313_v10  ;;  %v5826_v53 = vpop.f32.mrb[37].mxu1 }
 0x9ba   :  { %v1363_v54 = vpop.f32.mrb[38].mxu1 }
 0x9bb   :  { %v1364_v55 = vadd.f32 %v1363_v54, %v1313_v10  ;;  %v5827_v56 = vpop.f32.mrb[39].mxu1  ;;  %v1367_v57 = vadd.f32 %v1361_v52, %v1233_v40 }
 0x9bd   :  { %v1369_v58 = vsel %vm160_vm1, %v1367_v57, 0.0  ;;  %v1368_v59 = vadd.f32 %v1364_v55, %v1234_v41 }
 0x9be   :  { %1370 = vadd.xlane.f32.xlu1 %v1369_v58 }
 0x9bf   :  { %v1372_v60 = vsel %vm160_vm1, %v1368_v59, 0.0 }
 0x9c0   :  { %1373 = vadd.xlane.f32.xlu0 %v1372_v60 }
 0xa4b   :  { %v1371_v61 = vpop.xlane.xlu1 %1370 }
 0xa4c   :  { %v1375_v62 = vmul.f32 0.03125, %v1371_v61 }
 0xa4d   :  { %v1374_v63 = vpop.xlane.xlu0 %1373 }
 0xa4e   :  { %v1377_v3 = vsub.f32 %v1367_v57, %v1375_v62  ;;  %v1376_v4 = vmul.f32 0.03125, %v1374_v63 }
 0xa50   :  { %v1378_v5 = vsub.f32 %v1368_v59, %v1376_v4  ;;  %v1379_v6 = vmul.f32 %v1377_v3, %v1377_v3 }
 0xa52   :  { %v1381_v9 = vsel %vm160_vm1, %v1379_v6, 0.0  ;;  %v1380_v12 = vmul.f32 %v1378_v5, %v1378_v5 }
 0xa53   :  { %1382 = vadd.xlane.f32.xlu1 %v1381_v9 }
 0xa54   :  { %v1384_v26 = vsel %vm160_vm1, %v1380_v12, 0.0 }
 0xa55   :  { %1385 = vadd.xlane.f32.xlu0 %v1384_v26 }
 0xae0   :  { %v1383_v11 = vpop.xlane.xlu1 %1382 }
 0xae1   :  { %v1387_v14 = vmul.f32 0.03125, %v1383_v11 }
 0xae2   :  { %v1386_v7 = vpop.xlane.xlu0 %1385 }
 0xae3   :  { %v1389_v8 = vadd.f32 1e-05, %v1387_v14  ;;  %v1388_v15 = vmul.f32 0.03125, %v1386_v7 }
 0xae5   :  { %6364 = vrsqrt.f32 %v1389_v8  ;;  %v1390_v16 = vadd.f32 1e-05, %v1388_v15 }
 0xae7   :  { %6366 = vrsqrt.f32 %v1390_v16 }
 0xaef   :  { %v6365_v21 = vpop.eup %6364 }
 0xaf0   :  { %v1393_v22 = vmul.f32 %v6365_v21, %v1377_v3 }
 0xaf1   :  { %v6367_v25 = vpop.eup %6366 }
 0xaf2   :  { %v1399_v1 = vmul.f32 %v1398_v18, %v1393_v22  ;;  %v1394_v33 = vmul.f32 %v6367_v25, %v1378_v5 }
 0xaf4   :  { %v1400_v35 = vmul.f32 %v1398_v18, %v1394_v33  ;;  %v7189_v37 = vadd.f32 %v1404_v34, %v1399_v1 }
 0xaf6   :  { %v7191_v38 = vadd.f32 %v1404_v34, %v1400_v35 }
 0xaf8   :  { %v1414_v31 = vpack.c.bf16 %v7191_v38, %v7189_v37 }
 0xafa   :  { %5833 = vmatmul.mubr.msk.bf16.vlgmr.msra.gmra.mrb[40].mxu0 %vm160_vm1, %v1414_v31 }
 0xafb   :  { %5838 = vmatprep.mubr.msk.bf16.mxu0 %vm6698_vm0, %v6697_v0 }
 0xbcd   :  { %v1470_v39 = vpop.f32.mrb[40].mxu0 }
 0xbce   :  { %v1471_v30 = vadd.f32 %v7198_v28, %v1470_v39  ;;  %v5834_v40 = vpop.f32.mrb[41].mxu0 }
 0xbcf   :  { %v1473_v32 = vpop.f32.mrb[42].mxu0 }
 0xbd0   :  { %1481 = vrot.lane.b32.xlu0 %v1471_v30, %s6701_s30  ;;  %1478 = vrot.lane.b32.xlu1 %v1471_v30, %s6700_s3  ;;  %v5835_v41 = vpop.f32.mrb[43].mxu0  ;;  %v1474_v42 = vadd.f32 %v7198_v28, %v1473_v32  ;;  %v1497_v43 = vpack.c.bf16 %v1471_v30, %v1471_v30 }
 0xbd2   :  { %v7219_v2 = vpack.c.bf16 %v1474_v42, %v1474_v42 }
 0xbd4   :  { %1484 = vrot.lane.b32.xlu1 %v1471_v30, %s6699_s9  ;;  %1491 = vrot.lane.b32.xlu0 %v1474_v42, %s6701_s30 }
 0xbd8   :  { %1506 = vrot.lane.b32.xlu0 %v1497_v43, %s6702_s6  ;;  %1488 = vrot.lane.b32.xlu1 %v1474_v42, %s6700_s3 }
 0xbdc   :  { %1494 = vrot.lane.b32.xlu1 %v1474_v42, %s6699_s9 }
 0xc42   :  { %v1482_v44 = vpop.permute.xlu0 %1481  ;;  %v1479_v45 = vpop.permute.xlu1 %1478 }
 0xc43   :  { %v7209_v24 = vpack.c.bf16 %v1482_v44, %v1482_v44  ;;  %v7211_v46 = vpack.c.bf16 %v1479_v45, %v1479_v45 }
 0xc45   :  { %1604 = vrot.lane.b32.xlu0 %v7209_v24, %s6702_s6  ;;  %1555 = vrot.lane.b32.xlu1 %v7211_v46, %s6702_s6 }
 0xc46   :  { %v1485_v23 = vpop.permute.xlu1 %1484  ;;  %v1492_v47 = vpop.permute.xlu0 %1491 }
 0xc47   :  { %v7217_v20 = vpack.c.bf16 %v1485_v23, %v1485_v23  ;;  %v7225_v10 = vpack.c.bf16 %v1492_v47, %v1492_v47 }
 0xc49   :  { %1653 = vrot.lane.b32.xlu1 %v7217_v20, %s6702_s6  ;;  %1702 = vrot.lane.b32.xlu0 %v7219_v2, %s6702_s6 }
 0xc4a   :  { %v1507_v48 = vpop.permute.xlu0 %1506  ;;  %v1489_v49 = vpop.permute.xlu1 %1488 }
 0xc4b   :  { %v1512_v51 = vsel %vm236_vm2, %v1507_v48, 0  ;;  %v7228_v52 = vpack.c.bf16 %v1489_v49, %v1489_v49 }
 0xc4c   :  { %5837 = vmatpush3.bf16.xpose.msra.mxu0 %v1512_v51 }
 0xc4d   :  { %1751 = vrot.lane.b32.xlu1 %v7228_v52, %s6702_s6  ;;  %1800 = vrot.lane.b32.xlu0 %v7225_v10, %s6702_s6 }
 0xc4e   :  { %v1495_v53 = vpop.permute.xlu1 %1494  ;;  %5848 = vmatprep.subr.bf16.mxu0 %v6697_v0 }
 0xc4f   :  { %v7235_v54 = vpack.c.bf16 %v1495_v53, %v1495_v53 }
 0xc51   :  { %1849 = vrot.lane.b32.xlu1 %v7235_v54, %s6702_s6 }
 0xc53   :  { %5839 = vmatmul.mubr.msk.bf16.vlgmr.msra.gmra.mrb[44].mxu0 %vm236_vm2, %v1497_v43 }
 0xc54   :  { %5850 = vmatprep.mubr.msk.bf16.mxu0 %vm6698_vm0, %v6697_v0 }
 0xc55   :  { %1993 = vrot.lane.b32.xlu1 %v1497_v43, %s6692_s16 }
 0xcb7   :  { %v1605_v55 = vpop.permute.xlu0 %1604  ;;  %v1556_v56 = vpop.permute.xlu1 %1555 }
 0xcb8   :  { %v1610_v57 = vsel %vm236_vm2, %v1605_v55, 0  ;;  %v1561_v58 = vsel %vm236_vm2, %v1556_v56, 0 }
 0xcb9   :  { %5843 = vmatpush3.bf16.xpose.msra.mxu1 %v1561_v58  ;;  %5849 = vmatpush3.bf16.xpose.msra.mxu0 %v1610_v57 }
 0xcba   :  { %5854 = vmatprep.subr.bf16.mxu1 %v6697_v0  ;;  %5860 = vmatprep.subr.bf16.mxu0 %v6697_v0 }
 0xcbb   :  { %v1654_v59 = vpop.permute.xlu1 %1653  ;;  %v1703_v60 = vpop.permute.xlu0 %1702 }
 0xcbc   :  { %v1659_v61 = vsel %vm236_vm2, %v1654_v59, 0  ;;  %v1708_v62 = vsel %vm236_vm2, %v1703_v60, 0 }
 0xcbf   :  { %v1752_v63 = vpop.permute.xlu1 %1751  ;;  %v1801_v3 = vpop.permute.xlu0 %1800 }
 0xcc0   :  { %5845 = vmatmul.mubr.msk.bf16.vlgmr.msra.gmra.mrb[40].mxu1 %vm236_vm2, %v7211_v46  ;;  %5851 = vmatmul.mubr.msk.bf16.vlgmr.msra.gmra.mrb[48].mxu0 %vm236_vm2, %v7209_v24  ;;  %v1757_v5 = vsel %vm236_vm2, %v1752_v63, 0  ;;  %v1806_v6 = vsel %vm236_vm2, %v1801_v3, 0 }
 0xcc1   :  { %5855 = vmatpush3.bf16.xpose.msra.mxu1 %v1659_v61  ;;  %5861 = vmatpush3.bf16.xpose.msra.mxu0 %v1708_v62 }
 0xcc2   :  { %5856 = vmatprep.mubr.msk.bf16.mxu1 %vm6698_vm0, %v6697_v0  ;;  %5862 = vmatprep.mubr.msk.bf16.mxu0 %vm6698_vm0, %v6697_v0 }
 0xcc3   :  { %5866 = vmatprep.subr.bf16.mxu1 %v6697_v0  ;;  %5872 = vmatprep.subr.bf16.mxu0 %v6697_v0  ;;  %v1850_v4 = vpop.permute.xlu1 %1849 }
 0xcc4   :  { %v1855_v12 = vsel %vm236_vm2, %v1850_v4, 0 }
 0xcc7   :  { %v1994_v9 = vpop.permute.xlu1 %1993 }
 0xcc8   :  { %5857 = vmatmul.mubr.msk.bf16.vlgmr.msra.gmra.mrb[44].mxu1 %vm236_vm2, %v7217_v20  ;;  %5863 = vmatmul.mubr.msk.bf16.vlgmr.msra.gmra.mrb[52].mxu0 %vm236_vm2, %v7219_v2  ;;  %v1999_v26 = vsel %vm727_vm3, %v1994_v9, 0 }
 0xcc9   :  { %5867 = vmatpush3.bf16.xpose.msra.mxu1 %v1757_v5  ;;  %5873 = vmatpush3.bf16.xpose.msra.mxu0 %v1806_v6 }
 0xcca   :  { %5868 = vmatprep.mubr.msk.bf16.mxu1 %vm6698_vm0, %v6697_v0  ;;  %5874 = vmatprep.mubr.msk.bf16.mxu0 %vm6698_vm0, %v6697_v0 }
 0xccb   :  { %5878 = vmatprep.subr.bf16.mxu1 %v6697_v0  ;;  %5884 = vmatprep.subr.bf16.mxu0 %v6697_v0 }
 0xcd0   :  { %5869 = vmatmul.mubr.msk.bf16.vlgmr.msra.gmra.mrb[48].mxu1 %vm236_vm2, %v7228_v52  ;;  %5875 = vmatmul.mubr.msk.bf16.vlgmr.msra.gmra.mrb[56].mxu0 %vm236_vm2, %v7225_v10 }
 0xcd1   :  { %5879 = vmatpush3.bf16.xpose.msra.mxu1 %v1855_v12  ;;  %5885 = vmatpush3.bf16.msra.mxu0 %v1999_v26 }
 0xcd2   :  { %5880 = vmatprep.mubr.msk.bf16.mxu1 %vm6698_vm0, %v6697_v0  ;;  %5890 = vmatprep.subr.bf16.mxu1 %v6697_v0 }
 0xcd3   :  { %5886 = vmatprep.mubr.msk.bf16.mxu0 %vm6698_vm0, %v6697_v0  ;;  %5896 = vmatprep.subr.bf16.mxu0 %v6697_v0 }
 0xcd8   :  { %5881 = vmatmul.mubr.msk.bf16.vlgmr.msra.gmra.mrb[52].mxu1 %vm236_vm2, %v7235_v54 }
 0xcd9   :  { %5892 = vmatprep.mubr.msk.bf16.mxu1 %vm6698_vm0, %v6697_v0 }
 0xd26   :  { %v1548_v11 = vpop.f32.mrb[44].mxu0 }
 0xd27   :  { %v5840_v14 = vpop.f32.mrb[45].mxu0  ;;  %v1897_v7 = vsel %vm236_vm2, %v1548_v11, -inf }
 0xd28   :  { %1898 = vmax.xlane.f32.xlu0 %v1897_v7  ;;  %v1551_v8 = vpop.f32.mrb[46].mxu0 }
 0xd29   :  { %v5841_v15 = vpop.f32.mrb[47].mxu0 }
 0xd93   :  { %v1597_v16 = vpop.f32.mrb[40].mxu1  ;;  %v1646_v18 = vpop.f32.mrb[48].mxu0 }
 0xd94   :  { %v5846_v21 = vpop.f32.mrb[41].mxu1  ;;  %v5852_v22 = vpop.f32.mrb[49].mxu0  ;;  %v1900_v25 = vsel %vm236_vm2, %v1597_v16, -inf  ;;  %v1903_v1 = vsel %vm236_vm2, %v1646_v18, -inf }
 0xd95   :  { %1901 = vmax.xlane.f32.xlu1 %v1900_v25  ;;  %v1600_v33 = vpop.f32.mrb[42].mxu1  ;;  %1904 = vmax.xlane.f32.xlu0 %v1903_v1  ;;  %v1649_v34 = vpop.f32.mrb[50].mxu0 }
 0xd96   :  { %v5847_v35 = vpop.f32.mrb[43].mxu1  ;;  %v5853_v31 = vpop.f32.mrb[51].mxu0 }
 0xd9b   :  { %v1695_v39 = vpop.f32.mrb[44].mxu1  ;;  %v7290_v30 = vpop.f32.mrb[52].mxu0 }
 0xd9c   :  { %v5858_v40 = vpop.f32.mrb[45].mxu1  ;;  %v5864_v32 = vpop.f32.mrb[53].mxu0  ;;  %v1906_v41 = vsel %vm236_vm2, %v1695_v39, -inf  ;;  %v1909_v42 = vsel %vm236_vm2, %v7290_v30, -inf }
 0xd9d   :  { %v1698_v43 = vpop.f32.mrb[46].mxu1  ;;  %1907 = vmax.xlane.f32.xlu0 %v1906_v41  ;;  %1910 = vmax.xlane.f32.xlu1 %v1909_v42  ;;  %v1747_v44 = vpop.f32.mrb[54].mxu0 }
 0xd9e   :  { %v5859_v45 = vpop.f32.mrb[47].mxu1  ;;  %v5865_v23 = vpop.f32.mrb[55].mxu0 }
 0xda3   :  { %v7295_v47 = vpop.f32.mrb[48].mxu1  ;;  %v7297_v48 = vpop.f32.mrb[56].mxu0 }
 0xda4   :  { %v5870_v49 = vpop.f32.mrb[49].mxu1  ;;  %v5876_v51 = vpop.f32.mrb[57].mxu0  ;;  %v1912_v53 = vsel %vm236_vm2, %v7295_v47, -inf  ;;  %v1915_v55 = vsel %vm236_vm2, %v7297_v48, -inf }
 0xda5   :  { %v1796_v56 = vpop.f32.mrb[50].mxu1  ;;  %1913 = vmax.xlane.f32.xlu0 %v1912_v53  ;;  %1916 = vmax.xlane.f32.xlu1 %v1915_v55  ;;  %v1845_v57 = vpop.f32.mrb[58].mxu0 }
 0xda6   :  { %v5871_v58 = vpop.f32.mrb[51].mxu1  ;;  %v5877_v59 = vpop.f32.mrb[59].mxu0 }
 0xdab   :  { %v1891_v60 = vpop.f32.mrb[52].mxu1 }
 0xdac   :  { %v5882_v61 = vpop.f32.mrb[53].mxu1  ;;  %v1918_v62 = vsel %vm236_vm2, %v1891_v60, -inf }
 0xdad   :  { %v1894_v63 = vpop.f32.mrb[54].mxu1  ;;  %1919 = vmax.xlane.f32.xlu0 %v1918_v62 }
 0xdae   :  { %v5883_v3 = vpop.f32.mrb[55].mxu1 }
 0xdb5   :  { %v1899_v4 = vpop.xlane.xlu0 %1898 }
 0xdb6   :  { %2089 = vrot.lane.b32.xlu1 %v7209_v24, %s6692_s16  ;;  %v1921_v5 = vsub.f32 %v1548_v11, %v1899_v4 }
 0xdb8   :  { %v1929_v6 = vmul.f32 1.442695, %v1921_v5 }
 0xdba   :  { %2137 = vrot.lane.b32.xlu1 %v7217_v20, %s6692_s16  ;;  %6368 = vpow2.f32 %v1929_v6 }
 0xdc3   :  { %2041 = vrot.lane.b32.xlu0 %v7211_v46, %s6692_s16 }
 0xdc4   :  { %v7310_v9 = vpop.eup %6368 }
 0xdc5   :  { %v1945_v12 = vsel %vm236_vm2, %v7310_v9, 0.0 }
 0xdde   :  { %1946 = vadd.xlane.f32.xlu1 %v1945_v12 }
 0xe22   :  { %v1902_v26 = vpop.xlane.xlu1 %1901  ;;  %v1905_v14 = vpop.xlane.xlu0 %1904 }
 0xe23   :  { %v1922_v7 = vsub.f32 %v1597_v16, %v1902_v26  ;;  %v1923_v24 = vsub.f32 %v1646_v18, %v1905_v14 }
 0xe25   :  { %v1931_v8 = vmul.f32 1.442695, %v1922_v7  ;;  %v1933_v15 = vmul.f32 1.442695, %v1923_v24 }
 0xe27   :  { %6370 = vpow2.f32 %v1931_v8 }
 0xe28   :  { %6372 = vpow2.f32 %v1933_v15 }
 0xe2a   :  { %v1908_v20 = vpop.xlane.xlu0 %1907 }
 0xe2b   :  { %v1924_v46 = vsub.f32 %v1695_v39, %v1908_v20  ;;  %v1911_v39 = vpop.xlane.xlu1 %1910 }
 0xe2c   :  { %v1925_v40 = vsub.f32 %v7290_v30, %v1911_v39 }
 0xe2d   :  { %v1935_v21 = vmul.f32 1.442695, %v1924_v46 }
 0xe2e   :  { %v1937_v41 = vmul.f32 1.442695, %v1925_v40 }
 0xe2f   :  { %6374 = vpow2.f32 %v1935_v21 }
 0xe30   :  { %6376 = vpow2.f32 %v1937_v41 }
 0xe31   :  { %v7314_v11 = vpop.eup %6370 }
 0xe32   :  { %v7316_v22 = vpop.eup %6372  ;;  %v1948_v25 = vsel %vm236_vm2, %v7314_v11, 0.0  ;;  %v1914_v18 = vpop.xlane.xlu0 %1913 }
 0xe33   :  { %1949 = vadd.xlane.f32.xlu0 %v1948_v25  ;;  %v1951_v16 = vsel %vm236_vm2, %v7316_v22, 0.0  ;;  %v1917_v32 = vpop.xlane.xlu1 %1916  ;;  %v1926_v43 = vsub.f32 %v7295_v47, %v1914_v18 }
 0xe34   :  { %1952 = vadd.xlane.f32.xlu1 %v1951_v16  ;;  %v1927_v42 = vsub.f32 %v7297_v48, %v1917_v32 }
 0xe35   :  { %v1939_v45 = vmul.f32 1.442695, %v1926_v43 }
 0xe36   :  { %v1941_v44 = vmul.f32 1.442695, %v1927_v42 }
 0xe37   :  { %v2090_v49 = vpop.permute.xlu1 %2089 }
 0xe38   :  { %6378 = vpow2.f32 %v1941_v44  ;;  %v2095_v62 = vsel %vm727_vm3, %v2090_v49, 0 }
 0xe39   :  { %v7322_v1 = vpop.eup %6374  ;;  %6380 = vpow2.f32 %v1939_v45 }
 0xe3a   :  { %v1920_v33 = vpop.xlane.xlu0 %1919  ;;  %v1954_v34 = vsel %vm236_vm2, %v7322_v1, 0.0  ;;  %v7335_v51 = vpop.eup %6376 }
 0xe3b   :  { %1955 = vadd.xlane.f32.xlu0 %v1954_v34  ;;  %v1928_v23 = vsub.f32 %v1891_v60, %v1920_v33  ;;  %v1957_v30 = vsel %vm236_vm2, %v7335_v51, 0.0 }
 0xe3e   :  { %v2042_v35 = vpop.permute.xlu0 %2041 }
 0xe3f   :  { %v2047_v31 = vsel %vm727_vm3, %v2042_v35, 0 }
 0xe40   :  { %5891 = vmatpush3.bf16.msra.mxu1 %v2047_v31 }
 0xe41   :  { %5902 = vmatprep.subr.bf16.mxu1 %v6697_v0 }
 0xe42   :  { %v7339_v53 = vpop.eup %6378 }
 0xe43   :  { %v7341_v47 = vpop.eup %6380  ;;  %v1963_v55 = vsel %vm236_vm2, %v7339_v53, 0.0 }
 0xe44   :  { %v1960_v56 = vsel %vm236_vm2, %v7341_v47, 0.0 }
 0xe45   :  { %2233 = vrot.lane.b32.xlu1 %v7228_v52, %s6692_s16  ;;  %v1943_v52 = vmul.f32 1.442695, %v1928_v23 }
 0xe47   :  { %6382 = vpow2.f32 %v1943_v52 }
 0xe51   :  { %2185 = vrot.lane.b32.xlu0 %v7219_v2, %s6692_s16  ;;  %v2138_v2 = vpop.permute.xlu1 %2137  ;;  %v7347_v57 = vpop.eup %6382 }
 0xe52   :  { %v1966_v58 = vsel %vm236_vm2, %v7347_v57, 0.0 }
 0xe69   :  { %1958 = vadd.xlane.f32.xlu1 %v1957_v30 }
 0xe6b   :  { %v1947_v48 = vpop.xlane.xlu1 %1946 }
 0xe6c   :  { %6384 = vrcp.f32 %v1947_v48 }
 0xe6d   :  { %1964 = vadd.xlane.f32.xlu1 %v1963_v55 }
 0xe70   :  { %1961 = vadd.xlane.f32.xlu0 %v1960_v56 }
 0xe74   :  { %1967 = vadd.xlane.f32.xlu0 %v1966_v58 }
 0xe76   :  { %v6385_v59 = vpop.eup %6384 }
 0xe77   :  { %v1977_v60 = vmul.f32 %v6385_v59, %v7310_v9 }
 0xe79   :  { %v1985_v61 = vpack.c.bf16 %v1977_v60, %v1977_v60 }
 0xe7b   :  { %5887 = vmatmul.mubr.msk.bf16.vlgmr.msra.gmra.mrb[60].mxu0 %vm236_vm2, %v1985_v61 }
 0xe7c   :  { %5897 = vmatpush3.bf16.msra.mxu0 %v2095_v62  ;;  %5898 = vmatprep.mubr.msk.bf16.mxu0 %vm6698_vm0, %v6697_v0 }
 0xe7d   :  { %5908 = vmatprep.subr.bf16.mxu0 %v6697_v0 }
 0xe7e   :  { %2329 = vrot.lane.b32.xlu1 %v7235_v54, %s6692_s16 }
 0xe8a   :  { %2281 = vrot.lane.b32.xlu0 %v7225_v10, %s6692_s16  ;;  %v2143_v10 = vsel %vm727_vm3, %v2138_v2, 0 }
 0xe8e   :  { %2408 = vrot.lane.b32.xlu0 %v7171_v27, %s6703_s22 }
 0xec0   :  { %v1950_v63 = vpop.xlane.xlu0 %1949 }
 0xec1   :  { %6386 = vrcp.f32 %v1950_v63  ;;  %v1953_v3 = vpop.xlane.xlu1 %1952 }
 0xec2   :  { %6388 = vrcp.f32 %v1953_v3 }
 0xec5   :  { %v2234_v8 = vpop.permute.xlu1 %2233 }
 0xec6   :  { %v2239_v20 = vsel %vm727_vm3, %v2234_v8, 0 }
 0xec8   :  { %v1956_v4 = vpop.xlane.xlu0 %1955 }
 0xec9   :  { %6390 = vrcp.f32 %v1956_v4 }
 0xecb   :  { %v6387_v5 = vpop.eup %6386 }
 0xecc   :  { %v6389_v6 = vpop.eup %6388  ;;  %v1978_v9 = vmul.f32 %v6387_v5, %v7314_v11  ;;  %v2186_v26 = vpop.permute.xlu0 %2185 }
 0xecd   :  { %v1979_v12 = vmul.f32 %v6389_v6, %v7316_v22  ;;  %v2191_v27 = vsel %vm727_vm3, %v2186_v26, 0 }
 0xece   :  { %v1986_v54 = vpack.c.bf16 %v1978_v9, %v1978_v9 }
 0xecf   :  { %v1987_v14 = vpack.c.bf16 %v1979_v12, %v1979_v12 }
 0xed0   :  { %5893 = vmatmul.mubr.msk.bf16.vlgmr.msra.gmra.mrb[56].mxu1 %vm236_vm2, %v1986_v54 }
 0xed1   :  { %5899 = vmatmul.mubr.msk.bf16.vlgmr.msra.gmra.mrb[64].mxu0 %vm236_vm2, %v1987_v14  ;;  %5903 = vmatpush3.bf16.msra.mxu1 %v2143_v10 }
 0xed2   :  { %5909 = vmatpush3.bf16.msra.mxu0 %v2191_v27  ;;  %5904 = vmatprep.mubr.msk.bf16.mxu1 %vm6698_vm0, %v6697_v0 }
 0xed3   :  { %v6391_v7 = vpop.eup %6390  ;;  %5914 = vmatprep.subr.bf16.mxu1 %v6697_v0  ;;  %5910 = vmatprep.mubr.msk.bf16.mxu0 %vm6698_vm0, %v6697_v0 }
 0xed4   :  { %v1980_v24 = vmul.f32 %v6391_v7, %v7322_v1  ;;  %5920 = vmatprep.subr.bf16.mxu0 %v6697_v0 }
 0xed6   :  { %v1988_v15 = vpack.c.bf16 %v1980_v24, %v1980_v24 }
 0xed8   :  { %5905 = vmatmul.mubr.msk.bf16.vlgmr.msra.gmra.mrb[60].mxu1 %vm236_vm2, %v1988_v15 }
 0xed9   :  { %5915 = vmatpush3.bf16.msra.mxu1 %v2239_v20  ;;  %5916 = vmatprep.mubr.msk.bf16.mxu1 %vm6698_vm0, %v6697_v0 }
 0xeda   :  { %5926 = vmatprep.subr.bf16.mxu1 %v6697_v0 }
 0xef6   :  { %v1959_v46 = vpop.xlane.xlu1 %1958 }
 0xef7   :  { %6392 = vrcp.f32 %v1959_v46 }
 0xefa   :  { %v1965_v21 = vpop.xlane.xlu1 %1964 }
 0xefb   :  { %6394 = vrcp.f32 %v1965_v21 }
 0xefd   :  { %v1962_v11 = vpop.xlane.xlu0 %1961 }
 0xefe   :  { %6396 = vrcp.f32 %v1962_v11  ;;  %v2330_v40 = vpop.permute.xlu1 %2329 }
 0xeff   :  { %v2335_v43 = vsel %vm727_vm3, %v2330_v40, 0 }
 0xf01   :  { %v6393_v22 = vpop.eup %6392  ;;  %v1968_v25 = vpop.xlane.xlu0 %1967 }
 0xf02   :  { %6398 = vrcp.f32 %v1968_v25  ;;  %v1981_v16 = vmul.f32 %v6393_v22, %v7335_v51 }
 0xf04   :  { %v1989_v18 = vpack.c.bf16 %v1981_v16, %v1981_v16 }
 0xf05   :  { %v6395_v1 = vpop.eup %6394  ;;  %v2282_v33 = vpop.permute.xlu0 %2281 }
 0xf06   :  { %v2287_v34 = vsel %vm727_vm3, %v2282_v33, 0  ;;  %5911 = vmatmul.mubr.msk.bf16.vlgmr.msra.gmra.mrb[68].mxu0 %vm236_vm2, %v1989_v18  ;;  %v1983_v31 = vmul.f32 %v6395_v1, %v7339_v53 }
 0xf07   :  { %5921 = vmatpush3.bf16.msra.mxu0 %v2287_v34  ;;  %5922 = vmatprep.mubr.msk.bf16.mxu0 %vm6698_vm0, %v6697_v0 }
 0xf08   :  { %v6397_v35 = vpop.eup %6396  ;;  %5932 = vmatprep.subr.bf16.mxu0 %v6697_v0  ;;  %v1991_v42 = vpack.c.bf16 %v1983_v31, %v1983_v31 }
 0xf09   :  { %v1982_v39 = vmul.f32 %v6397_v35, %v7341_v47  ;;  %v2409_v2 = vpop.permute.xlu0 %2408 }
 0xf0b   :  { %v1990_v32 = vpack.c.bf16 %v1982_v39, %v1982_v39 }
 0xf0c   :  { %v6399_v41 = vpop.eup %6398 }
 0xf0d   :  { %5917 = vmatmul.mubr.msk.bf16.vlgmr.msra.gmra.mrb[64].mxu1 %vm236_vm2, %v1990_v32  ;;  %v1984_v44 = vmul.f32 %v6399_v41, %v7347_v57 }
 0xf0e   :  { %5923 = vmatmul.mubr.msk.bf16.vlgmr.msra.gmra.mrb[72].mxu0 %vm236_vm2, %v1991_v42  ;;  %5927 = vmatpush3.bf16.msra.mxu1 %v2335_v43 }
 0xf0f   :  { %5928 = vmatprep.mubr.msk.bf16.mxu1 %vm6698_vm0, %v6697_v0  ;;  %5936 = vmatprep.mubr.msk.bf16.mxu0 %vm6698_vm0, %v6697_v0  ;;  %v1992_v45 = vpack.c.bf16 %v1984_v44, %v1984_v44 }
 0xf10   :  { %5940 = vmatprep.subr.bf16.mxu1 %v6697_v0  ;;  %5933 = vmatpush3.bf16.msra.mxu0 %v2409_v2 }
 0xf11   :  { %5934 = vmatprep.subr.bf16.mxu0 %v6697_v0 }
 0xf15   :  { %5929 = vmatmul.mubr.msk.bf16.vlgmr.msra.gmra.mrb[68].mxu1 %vm236_vm2, %v1992_v45 }
 0xf16   :  { %5944 = vmatprep.mubr.msk.bf16.mxu1 %vm6698_vm0, %v6697_v0 }
 0xf4e   :  { %v2035_v23 = vpop.f32.mrb[60].mxu0 }
 0xf4f   :  { %v5888_v49 = vpop.f32.mrb[61].mxu0 }
 0xf50   :  { %v2038_v52 = vpop.f32.mrb[62].mxu0 }
 0xf51   :  { %v5889_v51 = vpop.f32.mrb[63].mxu0 }
 0xfa3   :  { %v2083_v30 = vpop.f32.mrb[56].mxu1 }
 0xfa4   :  { %v2131_v53 = vpop.f32.mrb[64].mxu0  ;;  %v5894_v48 = vpop.f32.mrb[57].mxu1 }
 0xfa5   :  { %v5900_v47 = vpop.f32.mrb[65].mxu0  ;;  %v2086_v55 = vpop.f32.mrb[58].mxu1 }
 0xfa6   :  { %v2134_v56 = vpop.f32.mrb[66].mxu0  ;;  %v5895_v57 = vpop.f32.mrb[59].mxu1 }
 0xfa7   :  { %v5901_v58 = vpop.f32.mrb[67].mxu0 }
 0xfab   :  { %v2179_v59 = vpop.f32.mrb[60].mxu1 }
 0xfac   :  { %v5906_v60 = vpop.f32.mrb[61].mxu1 }
 0xfad   :  { %v2182_v61 = vpop.f32.mrb[62].mxu1 }
 0xfae   :  { %v5907_v62 = vpop.f32.mrb[63].mxu1 }
 0xfd9   :  { %v2227_v63 = vpop.f32.mrb[68].mxu0 }
 0xfda   :  { %v5912_v3 = vpop.f32.mrb[69].mxu0 }
 0xfdb   :  { %v2230_v4 = vpop.f32.mrb[70].mxu0  ;;  %v6312_v3 = vld [vmem:[#allocation11 + $0x10] sm:$0xff]  }
 0xfdc   :  { %v5913_v5 = vpop.f32.mrb[71].mxu0 }
 0xfe0   :  { %v2275_v6 = vpop.f32.mrb[64].mxu1 }
 0xfe1   :  { %v6257_v9 = vpack.i.bf16 %v2275_v6, %v2083_v30  ;;  %v2323_v12 = vpop.f32.mrb[72].mxu0  ;;  %v5918_v26 = vpop.f32.mrb[65].mxu1 }
 0xfe2   :  { %v6262_v54 = vpack.i.bf16 %v2323_v12, %v2131_v53  ;;  %v5924_v14 = vpop.f32.mrb[73].mxu0  ;;  %v2278_v10 = vpop.f32.mrb[66].mxu1 }
 0xfe3   :  { %v2326_v27 = vpop.f32.mrb[74].mxu0  ;;  %6258 = vrot.lane.b32.xlu1 %v6257_v9, %s6687_s26  ;;  %v5919_v7 = vpop.f32.mrb[67].mxu1 }
 0xfe4   :  { %6263 = vrot.lane.b32.xlu0 %v6262_v54, %s6688_s1  ;;  %v5925_v24 = vpop.f32.mrb[75].mxu0  ;;  %v7437_v54 = vld [vmem:[%s8048_s7 + $0x8] sm:$0x1f] }
 0xfe5   :  { %v2494_v10 = vrot.slane %v7437_v54, %v7142_v29 }
 0xfe8   :  { %v2371_v8 = vpop.f32.mrb[68].mxu1  ;;  %2410 = vrot.lane.b32.xlu0 %v7174_v13, %s6703_s22 }
 0xfe9   :  { %v6267_v15 = vpack.i.bf16 %v2371_v8, %v2179_v59  ;;  %v5930_v20 = vpop.f32.mrb[69].mxu1 }
 0xfea   :  { %v2374_v46 = vpop.f32.mrb[70].mxu1 }
 0xfeb   :  { %6268 = vrot.lane.b32.xlu1 %v6267_v15, %s6704_s11  ;;  %v5931_v21 = vpop.f32.mrb[71].mxu1  ;;  %v2500_v15 = vrot.slane %v7437_v54, %v7152_v36 }
 0xfef   :  { %2414 = vrot.lane.b32.xlu1 %v7198_v28, %s6703_s22 }
0x1055   :  { %v6259_v11 = vpop.permute.xlu1 %6258 }
0x1056   :  { %v6264_v22 = vpop.permute.xlu0 %6263  ;;  %v6261_v25 = vunpack.i.h.bf16 %v6259_v11  ;;  %v6260_v16 = vunpack.i.l.bf16 %v6259_v11 }
0x1057   :  { %v6266_v1 = vunpack.i.h.bf16 %v6264_v22  ;;  %v6265_v33 = vunpack.i.l.bf16 %v6264_v22  ;;  %v6313_v22 = vld [vmem:[#allocation11 + $0x18] sm:$0xff]  }
0x1058   :  { %v2389_v34 = vsel %vm236_vm2, %v2035_v23, %v6260_v16  ;;  %v2404_v13 = vsel %vm236_vm2, %v2227_v63, %v6261_v25  ;;  %v6311_v63 = vld [vmem:[%s8045_s4 + $0x18] sm:$0xff]   ;;  %v5443_v25 = vld [vmem:[#allocation10 + $0x1] ss:$0 sm:$0xff] }
0x1059   :  { %v2405_v40 = vsel %vm1120_vm4, %v2404_v13, %v6266_v1  ;;  %v2390_v28 = vsel %vm1120_vm4, %v2389_v34, %v6265_v33 }
0x105a   :  { %v2411_v18 = vpop.permute.xlu0 %2410 }
0x105b   :  { %5935 = vmatpush3.bf16.msra.mxu0 %v2411_v18 }
0x105c   :  { %5948 = vmatprep.subr.bf16.mxu0 %v6697_v0 }
0x105d   :  { %v6269_v35 = vpop.permute.xlu1 %6268 }
0x105e   :  { %v6271_v31 = vunpack.i.h.bf16 %v6269_v35  ;;  %v6270_v39 = vunpack.i.l.bf16 %v6269_v35 }
0x1060   :  { %v2391_v32 = vsel %vm1122_vm5, %v2390_v28, %v6270_v39  ;;  %v2406_v41 = vsel %vm1122_vm5, %v2405_v40, %v6271_v31  ;;  %v2584_v40 = vrot.slane %v7437_v54, %v7163_v50 }
0x1061   :  { %v2407_v42 = vpack.c.bf16 %v2406_v41, %v2391_v32  ;;  %v2415_v43 = vpop.permute.xlu1 %2414 }
0x1063   :  { %5937 = vmatmul.mubr.msk.bf16.vlgmr.msra.gmra.mrb[76].mxu0 %vm160_vm1, %v2407_v42 }
0x1064   :  { %5952 = vmatprep.mubr.msk.bf16.mxu0 %vm6698_vm0, %v6697_v0  ;;  %5949 = vmatpush3.bf16.xpose.msra.mxu0 %v6312_v3 }
0x1065   :  { %5950 = vmatprep.subr.bf16.mxu0 %v6697_v0 }
0x106c   :  { %5951 = vmatpush3.bf16.xpose.msra.mxu0 %v6313_v22 }
0x106d   :  { %5970 = vmatprep.subr.bf16.mxu0 %v6697_v0 }
0x1136   :  { %v2454_v44 = vpop.f32.mrb[76].mxu0 }
0x1137   :  { %v2455_v45 = vadd.f32 %v2454_v44, %v2415_v43  ;;  %v5938_v23 = vpop.f32.mrb[77].mxu0 }
0x1138   :  { %v2457_v49 = vpop.f32.mrb[78].mxu0 }
0x1139   :  { %v2458_v52 = vadd.f32 %v2457_v49, %v2415_v43  ;;  %v5939_v51 = vpop.f32.mrb[79].mxu0  ;;  %v2463_v2 = vadd.f32 %v2455_v45, %v7189_v37 }
0x113b   :  { %v2465_v30 = vsel %vm160_vm1, %v2463_v2, 0.0  ;;  %v2464_v53 = vadd.f32 %v2458_v52, %v7191_v38  ;;  %v6310_v38 = vld [vmem:[%s8045_s4 + $0x10] sm:$0xff]  }
0x113c   :  { %2466 = vadd.xlane.f32.xlu0 %v2465_v30  ;;  %5941 = vmatpush3.bf16.msra.mxu1 %v6310_v38 }
0x113d   :  { %v2468_v48 = vsel %vm160_vm1, %v2464_v53, 0.0  ;;  %5942 = vmatprep.subr.bf16.mxu1 %v6697_v0 }
0x113e   :  { %2469 = vadd.xlane.f32.xlu1 %v2468_v48 }
0x1140   :  { %5943 = vmatpush3.bf16.msra.mxu1 %v6311_v63  ;;  %v2669_v63 = vrot.slane %v7437_v54, %v7180_v17 }
0x1141   :  { %5956 = vmatprep.subr.bf16.mxu1 %v6697_v0 }
0x11c9   :  { %v2467_v47 = vpop.xlane.xlu0 %2466 }
0x11ca   :  { %v2471_v55 = vmul.f32 0.03125, %v2467_v47 }
0x11cb   :  { %v2470_v56 = vpop.xlane.xlu1 %2469 }
0x11cc   :  { %v2473_v57 = vsub.f32 %v2463_v2, %v2471_v55  ;;  %v2472_v58 = vmul.f32 0.03125, %v2470_v56 }
0x11ce   :  { %v2474_v59 = vsub.f32 %v2464_v53, %v2472_v58  ;;  %v2475_v60 = vmul.f32 %v2473_v57, %v2473_v57 }
0x11d0   :  { %v2477_v61 = vsel %vm160_vm1, %v2475_v60, 0.0  ;;  %v2476_v62 = vmul.f32 %v2474_v59, %v2474_v59 }
0x11d1   :  { %2478 = vadd.xlane.f32.xlu0 %v2477_v61 }
0x11d2   :  { %v2480_v37 = vsel %vm160_vm1, %v2476_v62, 0.0 }
0x11d5   :  { %2481 = vadd.xlane.f32.xlu0 %v2480_v37 }
0x125e   :  { %v2479_v4 = vpop.xlane.xlu0 %2478 }
0x125f   :  { %v2483_v5 = vmul.f32 0.03125, %v2479_v4 }
0x1261   :  { %v2485_v6 = vadd.f32 1e-05, %v2483_v5  ;;  %v2675_v5 = vrot.slane %v7437_v54, %v7185_v19 }
0x1262   :  { %v2482_v9 = vpop.xlane.xlu0 %2481 }
0x1263   :  { %6400 = vrsqrt.f32 %v2485_v6  ;;  %v2484_v12 = vmul.f32 0.03125, %v2482_v9 }
0x1265   :  { %v2486_v26 = vadd.f32 1e-05, %v2484_v12 }
0x1267   :  { %6402 = vrsqrt.f32 %v2486_v26 }
0x126d   :  { %v6401_v14 = vpop.eup %6400 }
0x126e   :  { %v2489_v27 = vmul.f32 %v6401_v14, %v2473_v57 }
0x1270   :  { %v2495_v24 = vmul.f32 %v2494_v10, %v2489_v27 }
0x1271   :  { %v6403_v7 = vpop.eup %6402 }
0x1272   :  { %v2490_v8 = vmul.f32 %v6403_v7, %v2474_v59  ;;  %v2501_v46 = vadd.f32 %v2500_v15, %v2495_v24 }
0x1274   :  { %v2496_v20 = vmul.f32 %v2494_v10, %v2490_v8 }
0x1276   :  { %v2502_v21 = vadd.f32 %v2500_v15, %v2496_v20 }
0x1278   :  { %v2503_v11 = vpack.c.bf16 %v2502_v21, %v2501_v46 }
0x127a   :  { %5945 = vmatmul.mubr.msk.bf16.vlgmr.msra.gmra.mrb[72].mxu1 %vm160_vm1, %v2503_v11 }
0x127b   :  { %5960 = vmatprep.mubr.msk.bf16.mxu1 %vm6698_vm0, %v6697_v0 }
0x134d   :  { %v2566_v16 = vpop.f32.mrb[72].mxu1 }
0x134e   :  { %v2567_v18 = vadd.f32 %v5443_v25, %v2566_v16  ;;  %v5946_v1 = vpop.f32.mrb[73].mxu1  ;;  %v7463_v16 = vld [vmem:[#allocation7 + $0x20] sm:$0xff]  }
0x134f   :  { %v2569_v33 = vpop.f32.mrb[74].mxu1  ;;  %5957 = vmatpush3.bf16.msra.mxu1 %v7463_v16 }
0x1350   :  { %v2570_v34 = vadd.f32 %v5443_v25, %v2569_v33  ;;  %v5947_v13 = vpop.f32.mrb[75].mxu1  ;;  %v2573_v35 = vmax.f32 %v2567_v18, 0.0  ;;  %v7466_v18 = vld [vmem:[#allocation7 + $0x28] sm:$0xff]   ;;  %5958 = vmatprep.subr.bf16.mxu1 %v6697_v0 }
0x1352   :  { %v2574_v31 = vmax.f32 %v2570_v34, 0.0 }
0x1353   :  { %5959 = vmatpush3.bf16.msra.mxu1 %v7466_v18 }
0x1354   :  { %v2575_v39 = vpack.c.bf16 %v2574_v31, %v2573_v35  ;;  %5964 = vmatprep.subr.bf16.mxu1 %v6697_v0 }
0x1356   :  { %5953 = vmatmul.mubr.bf16.vlgmr.msra.gmra.mrb[80].mxu0 %v2575_v39 }
0x1357   :  { %5972 = vmatprep.mubr.msk.bf16.mxu0 %vm6698_vm0, %v6697_v0 }
0x1429   :  { %v2631_v28 = vpop.f32.mrb[80].mxu0 }
0x142a   :  { %v2632_v32 = vadd.f32 %v2631_v28, %v2584_v40  ;;  %v5954_v41 = vpop.f32.mrb[81].mxu0 }
0x142b   :  { %v2634_v42 = vpop.f32.mrb[82].mxu0  ;;  %v5450_v41 = vld [vmem:[#allocation13 + $0x1] ss:$0 sm:$0xff] }
0x142c   :  { %v2638_v43 = vadd.f32 %v2632_v32, %v2501_v46  ;;  %v2635_v44 = vadd.f32 %v2634_v42, %v2584_v40  ;;  %v5955_v45 = vpop.f32.mrb[83].mxu0  ;;  %v5449_v40 = vld [vmem:[#allocation13] ss:$0 sm:$0xff] }
0x142e   :  { %v2639_v23 = vadd.f32 %v2635_v44, %v2502_v21  ;;  %v2640_v49 = vsel %vm160_vm1, %v2638_v43, 0.0 }
0x142f   :  { %2641 = vadd.xlane.f32.xlu1 %v2640_v49  ;;  %v6496_v49 = vld [vmem:[#allocation5] sm:$0xff] }
0x1430   :  { %v2643_v52 = vsel %vm160_vm1, %v2639_v23, 0.0 }
0x1431   :  { %2644 = vadd.xlane.f32.xlu0 %v2643_v52 }
0x14bc   :  { %v2642_v51 = vpop.xlane.xlu1 %2641 }
0x14bd   :  { %v2646_v2 = vmul.f32 0.03125, %v2642_v51  ;;  %v6497_v51 = vld [vmem:[#allocation5 + $0x8] sm:$0xff] }
0x14be   :  { %v2645_v30 = vpop.xlane.xlu0 %2644 }
0x14bf   :  { %v2648_v53 = vsub.f32 %v2638_v43, %v2646_v2  ;;  %v2647_v48 = vmul.f32 0.03125, %v2645_v30 }
0x14c1   :  { %v2649_v47 = vsub.f32 %v2639_v23, %v2647_v48  ;;  %v2650_v55 = vmul.f32 %v2648_v53, %v2648_v53 }
0x14c3   :  { %v2652_v56 = vsel %vm160_vm1, %v2650_v55, 0.0  ;;  %v2651_v57 = vmul.f32 %v2649_v47, %v2649_v47 }
0x14c4   :  { %2653 = vadd.xlane.f32.xlu1 %v2652_v56 }
0x14c5   :  { %v2655_v58 = vsel %vm160_vm1, %v2651_v57, 0.0 }
0x14c6   :  { %2656 = vadd.xlane.f32.xlu0 %v2655_v58 }
0x1551   :  { %v2654_v59 = vpop.xlane.xlu1 %2653 }
0x1552   :  { %v2658_v60 = vmul.f32 0.03125, %v2654_v59 }
0x1553   :  { %v2657_v61 = vpop.xlane.xlu0 %2656 }
0x1554   :  { %v2660_v62 = vadd.f32 1e-05, %v2658_v60  ;;  %v2659_v37 = vmul.f32 0.03125, %v2657_v61 }
0x1556   :  { %6404 = vrsqrt.f32 %v2660_v62  ;;  %v2661_v38 = vadd.f32 1e-05, %v2659_v37 }
0x1558   :  { %6406 = vrsqrt.f32 %v2661_v38 }
0x1560   :  { %v6405_v3 = vpop.eup %6404 }
0x1561   :  { %v2664_v4 = vmul.f32 %v6405_v3, %v2648_v53  ;;  %v7480_v53 = vld [vmem:[#allocation8 + $0x2] ss:$0 sm:$0xff] }
0x1562   :  { %v6407_v6 = vpop.eup %6406 }
0x1563   :  { %v2670_v9 = vmul.f32 %v2669_v63, %v2664_v4  ;;  %v2665_v12 = vmul.f32 %v6407_v6, %v2649_v47 }
0x1565   :  { %v2676_v26 = vadd.f32 %v2675_v5, %v2670_v9  ;;  %v2671_v14 = vmul.f32 %v2669_v63, %v2665_v12 }
0x1567   :  { %v2680_v10 = vsel %vm160_vm1, %v2676_v26, 0.0  ;;  %v2677_v27 = vadd.f32 %v2675_v5, %v2671_v14 }
0x1568   :  { %2681 = vadd.xlane.f32.xlu1 %v2680_v10 }
0x1569   :  { %v2683_v7 = vsel %vm160_vm1, %v2677_v27, 0.0 }
0x156a   :  { %2684 = vadd.xlane.f32.xlu0 %v2683_v7 }
0x15f5   :  { %v2682_v24 = vpop.xlane.xlu1 %2681 }
0x15f6   :  { %v2686_v8 = vmul.f32 0.03125, %v2682_v24 }
0x15f7   :  { %v2685_v15 = vpop.xlane.xlu0 %2684 }
0x15f8   :  { %v2688_v20 = vsub.f32 %v2676_v26, %v2686_v8  ;;  %v2687_v46 = vmul.f32 0.03125, %v2685_v15 }
0x15fa   :  { %v2689_v21 = vsub.f32 %v2677_v27, %v2687_v46  ;;  %v2690_v11 = vmul.f32 %v2688_v20, %v2688_v20 }
0x15fc   :  { %v2692_v54 = vsel %vm160_vm1, %v2690_v11, 0.0  ;;  %v2691_v22 = vmul.f32 %v2689_v21, %v2689_v21 }
0x15fd   :  { %2693 = vadd.xlane.f32.xlu1 %v2692_v54 }
0x15fe   :  { %v2695_v25 = vsel %vm160_vm1, %v2691_v22, 0.0 }
0x15ff   :  { %2696 = vadd.xlane.f32.xlu0 %v2695_v25 }
0x168a   :  { %v2694_v1 = vpop.xlane.xlu1 %2693 }
0x168b   :  { %v2698_v33 = vmul.f32 0.03125, %v2694_v1 }
0x168c   :  { %v2697_v34 = vpop.xlane.xlu0 %2696 }
0x168d   :  { %v2700_v13 = vadd.f32 1e-05, %v2698_v33  ;;  %v2699_v35 = vmul.f32 0.03125, %v2697_v34 }
0x168f   :  { %6408 = vrsqrt.f32 %v2700_v13  ;;  %v2701_v31 = vadd.f32 1e-05, %v2699_v35 }
0x1691   :  { %6410 = vrsqrt.f32 %v2701_v31 }
0x1699   :  { %v6409_v39 = vpop.eup %6408 }
0x169a   :  { %v2704_v28 = vmul.f32 %v6409_v39, %v2688_v20 }
0x169b   :  { %v6411_v32 = vpop.eup %6410 }
0x169c   :  { %v2710_v42 = vmul.f32 %v5449_v40, %v2704_v28  ;;  %v2705_v43 = vmul.f32 %v6411_v32, %v2689_v21 }
0x169e   :  { %v2711_v44 = vmul.f32 %v5449_v40, %v2705_v43  ;;  %v2716_v45 = vadd.f32 %v5450_v41, %v2710_v42 }
0x16a0   :  { %v2717_v23 = vadd.f32 %v5450_v41, %v2711_v44  ;;  %v7471_v52 = vadd.f32 %v6496_v49, %v2716_v45 }
0x16a2   :  { %v7473_v2 = vadd.f32 %v6497_v51, %v2717_v23 }
0x16a4   :  { %v2727_v30 = vpack.c.bf16 %v7473_v2, %v7471_v52 }
0x16a6   :  { %5961 = vmatmul.mubr.msk.bf16.vlgmr.msra.gmra.mrb[76].mxu1 %vm160_vm1, %v2727_v30 }
0x16a7   :  { %5966 = vmatprep.mubr.msk.bf16.mxu1 %vm6698_vm0, %v6697_v0 }
0x1779   :  { %v2783_v48 = vpop.f32.mrb[76].mxu1 }
0x177a   :  { %v2784_v47 = vadd.f32 %v7480_v53, %v2783_v48  ;;  %v5962_v55 = vpop.f32.mrb[77].mxu1 }
0x177b   :  { %v2786_v56 = vpop.f32.mrb[78].mxu1 }
0x177c   :  { %2794 = vrot.lane.b32.xlu0 %v2784_v47, %s6701_s30  ;;  %2791 = vrot.lane.b32.xlu1 %v2784_v47, %s6700_s3  ;;  %v5963_v57 = vpop.f32.mrb[79].mxu1  ;;  %v2787_v58 = vadd.f32 %v7480_v53, %v2786_v56  ;;  %v2810_v59 = vpack.c.bf16 %v2784_v47, %v2784_v47 }
0x177e   :  { %v7501_v4 = vpack.c.bf16 %v2787_v58, %v2787_v58 }
0x1780   :  { %2797 = vrot.lane.b32.xlu1 %v2784_v47, %s6699_s9  ;;  %2804 = vrot.lane.b32.xlu0 %v2787_v58, %s6701_s30 }
0x1784   :  { %2819 = vrot.lane.b32.xlu0 %v2810_v59, %s6702_s6  ;;  %2801 = vrot.lane.b32.xlu1 %v2787_v58, %s6700_s3 }
0x1788   :  { %2807 = vrot.lane.b32.xlu1 %v2787_v58, %s6699_s9 }
0x17ee   :  { %v2795_v60 = vpop.permute.xlu0 %2794  ;;  %v2792_v61 = vpop.permute.xlu1 %2791 }
0x17ef   :  { %v7491_v62 = vpack.c.bf16 %v2795_v60, %v2795_v60  ;;  %v7493_v37 = vpack.c.bf16 %v2792_v61, %v2792_v61 }
0x17f1   :  { %2917 = vrot.lane.b32.xlu0 %v7491_v62, %s6702_s6  ;;  %2868 = vrot.lane.b32.xlu1 %v7493_v37, %s6702_s6 }
0x17f2   :  { %v2798_v38 = vpop.permute.xlu1 %2797  ;;  %v2805_v63 = vpop.permute.xlu0 %2804 }
0x17f3   :  { %v7499_v3 = vpack.c.bf16 %v2798_v38, %v2798_v38  ;;  %v7507_v9 = vpack.c.bf16 %v2805_v63, %v2805_v63 }
0x17f5   :  { %2966 = vrot.lane.b32.xlu1 %v7499_v3, %s6702_s6  ;;  %3015 = vrot.lane.b32.xlu0 %v7501_v4, %s6702_s6 }
0x17f6   :  { %v2820_v5 = vpop.permute.xlu0 %2819  ;;  %v2802_v6 = vpop.permute.xlu1 %2801 }
0x17f7   :  { %v2825_v12 = vsel %vm236_vm2, %v2820_v5, 0  ;;  %v7510_v26 = vpack.c.bf16 %v2802_v6, %v2802_v6 }
0x17f8   :  { %5965 = vmatpush3.bf16.xpose.msra.mxu1 %v2825_v12 }
0x17f9   :  { %3064 = vrot.lane.b32.xlu1 %v7510_v26, %s6702_s6  ;;  %3113 = vrot.lane.b32.xlu0 %v7507_v9, %s6702_s6 }
0x17fa   :  { %v2808_v14 = vpop.permute.xlu1 %2807  ;;  %5976 = vmatprep.subr.bf16.mxu1 %v6697_v0 }
0x17fb   :  { %v7517_v10 = vpack.c.bf16 %v2808_v14, %v2808_v14 }
0x17fd   :  { %3162 = vrot.lane.b32.xlu1 %v7517_v10, %s6702_s6 }
0x17ff   :  { %5967 = vmatmul.mubr.msk.bf16.vlgmr.msra.gmra.mrb[80].mxu1 %vm236_vm2, %v2810_v59 }
0x1800   :  { %5978 = vmatprep.mubr.msk.bf16.mxu1 %vm6698_vm0, %v6697_v0 }
0x1801   :  { %3306 = vrot.lane.b32.xlu1 %v2810_v59, %s6692_s16 }
0x1863   :  { %v2918_v27 = vpop.permute.xlu0 %2917  ;;  %v2869_v7 = vpop.permute.xlu1 %2868 }
0x1864   :  { %v2923_v24 = vsel %vm236_vm2, %v2918_v27, 0  ;;  %v2874_v8 = vsel %vm236_vm2, %v2869_v7, 0 }
0x1865   :  { %5971 = vmatpush3.bf16.xpose.msra.mxu0 %v2874_v8  ;;  %5977 = vmatpush3.bf16.xpose.msra.mxu1 %v2923_v24 }
0x1866   :  { %5982 = vmatprep.subr.bf16.mxu0 %v6697_v0  ;;  %5988 = vmatprep.subr.bf16.mxu1 %v6697_v0 }
0x1867   :  { %v2967_v15 = vpop.permute.xlu1 %2966  ;;  %v3016_v20 = vpop.permute.xlu0 %3015 }
0x1868   :  { %v2972_v46 = vsel %vm236_vm2, %v2967_v15, 0  ;;  %v3021_v21 = vsel %vm236_vm2, %v3016_v20, 0 }
0x186b   :  { %v3065_v11 = vpop.permute.xlu1 %3064  ;;  %v3114_v54 = vpop.permute.xlu0 %3113 }
0x186c   :  { %5973 = vmatmul.mubr.msk.bf16.vlgmr.msra.gmra.mrb[84].mxu0 %vm236_vm2, %v7493_v37  ;;  %5979 = vmatmul.mubr.msk.bf16.vlgmr.msra.gmra.mrb[84].mxu1 %vm236_vm2, %v7491_v62  ;;  %v3070_v25 = vsel %vm236_vm2, %v3065_v11, 0  ;;  %v3119_v1 = vsel %vm236_vm2, %v3114_v54, 0 }
0x186d   :  { %5983 = vmatpush3.bf16.xpose.msra.mxu0 %v2972_v46  ;;  %5989 = vmatpush3.bf16.xpose.msra.mxu1 %v3021_v21 }
0x186e   :  { %5984 = vmatprep.mubr.msk.bf16.mxu0 %vm6698_vm0, %v6697_v0  ;;  %5990 = vmatprep.mubr.msk.bf16.mxu1 %vm6698_vm0, %v6697_v0 }
0x186f   :  { %5994 = vmatprep.subr.bf16.mxu0 %v6697_v0  ;;  %6000 = vmatprep.subr.bf16.mxu1 %v6697_v0  ;;  %v3163_v22 = vpop.permute.xlu1 %3162 }
0x1870   :  { %v3168_v34 = vsel %vm236_vm2, %v3163_v22, 0 }
0x1873   :  { %v3307_v33 = vpop.permute.xlu1 %3306 }
0x1874   :  { %5985 = vmatmul.mubr.msk.bf16.vlgmr.msra.gmra.mrb[88].mxu0 %vm236_vm2, %v7499_v3  ;;  %5991 = vmatmul.mubr.msk.bf16.vlgmr.msra.gmra.mrb[88].mxu1 %vm236_vm2, %v7501_v4  ;;  %v3312_v13 = vsel %vm727_vm3, %v3307_v33, 0 }
0x1875   :  { %5995 = vmatpush3.bf16.xpose.msra.mxu0 %v3070_v25  ;;  %6001 = vmatpush3.bf16.xpose.msra.mxu1 %v3119_v1 }
0x1876   :  { %5996 = vmatprep.mubr.msk.bf16.mxu0 %vm6698_vm0, %v6697_v0  ;;  %6002 = vmatprep.mubr.msk.bf16.mxu1 %vm6698_vm0, %v6697_v0 }
0x1877   :  { %6006 = vmatprep.subr.bf16.mxu0 %v6697_v0  ;;  %6012 = vmatprep.subr.bf16.mxu1 %v6697_v0 }
0x187c   :  { %5997 = vmatmul.mubr.msk.bf16.vlgmr.msra.gmra.mrb[92].mxu0 %vm236_vm2, %v7510_v26  ;;  %6003 = vmatmul.mubr.msk.bf16.vlgmr.msra.gmra.mrb[92].mxu1 %vm236_vm2, %v7507_v9 }
0x187d   :  { %6007 = vmatpush3.bf16.xpose.msra.mxu0 %v3168_v34  ;;  %6013 = vmatpush3.bf16.msra.mxu1 %v3312_v13 }
0x187e   :  { %6008 = vmatprep.mubr.msk.bf16.mxu0 %vm6698_vm0, %v6697_v0  ;;  %6018 = vmatprep.subr.bf16.mxu0 %v6697_v0 }
0x187f   :  { %6014 = vmatprep.mubr.msk.bf16.mxu1 %vm6698_vm0, %v6697_v0  ;;  %6024 = vmatprep.subr.bf16.mxu1 %v6697_v0 }
0x1884   :  { %6009 = vmatmul.mubr.msk.bf16.vlgmr.msra.gmra.mrb[96].mxu0 %vm236_vm2, %v7517_v10 }
0x1885   :  { %6020 = vmatprep.mubr.msk.bf16.mxu0 %vm6698_vm0, %v6697_v0 }
0x18d2   :  { %v2861_v35 = vpop.f32.mrb[80].mxu1 }
0x18d3   :  { %v5968_v31 = vpop.f32.mrb[81].mxu1  ;;  %v3210_v39 = vsel %vm236_vm2, %v2861_v35, -inf }
0x18d4   :  { %3211 = vmax.xlane.f32.xlu0 %v3210_v39  ;;  %v2864_v40 = vpop.f32.mrb[82].mxu1 }
0x18d5   :  { %v5969_v28 = vpop.f32.mrb[83].mxu1 }
0x193f   :  { %v2910_v32 = vpop.f32.mrb[84].mxu0  ;;  %v2959_v41 = vpop.f32.mrb[84].mxu1 }
0x1940   :  { %v5974_v42 = vpop.f32.mrb[85].mxu0  ;;  %v5980_v43 = vpop.f32.mrb[85].mxu1  ;;  %v3216_v44 = vsel %vm236_vm2, %v2959_v41, -inf  ;;  %v3213_v45 = vsel %vm236_vm2, %v2910_v32, -inf }
0x1941   :  { %3217 = vmax.xlane.f32.xlu0 %v3216_v44  ;;  %v2962_v23 = vpop.f32.mrb[86].mxu1  ;;  %3214 = vmax.xlane.f32.xlu1 %v3213_v45  ;;  %v2913_v49 = vpop.f32.mrb[86].mxu0 }
0x1942   :  { %v5975_v51 = vpop.f32.mrb[87].mxu0  ;;  %v5981_v30 = vpop.f32.mrb[87].mxu1 }
0x1947   :  { %v3008_v48 = vpop.f32.mrb[88].mxu0  ;;  %v7572_v47 = vpop.f32.mrb[88].mxu1 }
0x1948   :  { %v5986_v55 = vpop.f32.mrb[89].mxu0  ;;  %v5992_v56 = vpop.f32.mrb[89].mxu1  ;;  %v3222_v57 = vsel %vm236_vm2, %v7572_v47, -inf  ;;  %v3219_v58 = vsel %vm236_vm2, %v3008_v48, -inf }
0x1949   :  { %v3060_v59 = vpop.f32.mrb[90].mxu1  ;;  %3223 = vmax.xlane.f32.xlu1 %v3222_v57  ;;  %3220 = vmax.xlane.f32.xlu0 %v3219_v58  ;;  %v3011_v60 = vpop.f32.mrb[90].mxu0 }
0x194a   :  { %v5987_v61 = vpop.f32.mrb[91].mxu0  ;;  %v5993_v38 = vpop.f32.mrb[91].mxu1 }
0x194f   :  { %v7577_v63 = vpop.f32.mrb[92].mxu0  ;;  %v3155_v5 = vpop.f32.mrb[92].mxu1 }
0x1950   :  { %v5998_v6 = vpop.f32.mrb[93].mxu0  ;;  %v6004_v12 = vpop.f32.mrb[93].mxu1  ;;  %v3228_v14 = vsel %vm236_vm2, %v3155_v5, -inf  ;;  %v3225_v27 = vsel %vm236_vm2, %v7577_v63, -inf }
0x1951   :  { %v3158_v7 = vpop.f32.mrb[94].mxu1  ;;  %3229 = vmax.xlane.f32.xlu1 %v3228_v14  ;;  %3226 = vmax.xlane.f32.xlu0 %v3225_v27  ;;  %v3109_v24 = vpop.f32.mrb[94].mxu0 }
0x1952   :  { %v5999_v8 = vpop.f32.mrb[95].mxu0  ;;  %v6005_v15 = vpop.f32.mrb[95].mxu1 }
0x1957   :  { %v3204_v20 = vpop.f32.mrb[96].mxu0 }
0x1958   :  { %v6010_v46 = vpop.f32.mrb[97].mxu0  ;;  %v3231_v21 = vsel %vm236_vm2, %v3204_v20, -inf }
0x1959   :  { %3232 = vmax.xlane.f32.xlu0 %v3231_v21  ;;  %v3207_v11 = vpop.f32.mrb[98].mxu0 }
0x195a   :  { %v6011_v54 = vpop.f32.mrb[99].mxu0 }
0x1961   :  { %v3212_v22 = vpop.xlane.xlu0 %3211 }
0x1962   :  { %3402 = vrot.lane.b32.xlu1 %v7491_v62, %s6692_s16  ;;  %v3234_v25 = vsub.f32 %v2861_v35, %v3212_v22 }
0x1964   :  { %v3242_v1 = vmul.f32 1.442695, %v3234_v25 }
0x1966   :  { %3450 = vrot.lane.b32.xlu1 %v7499_v3, %s6692_s16  ;;  %6412 = vpow2.f32 %v3242_v1 }
0x196f   :  { %3354 = vrot.lane.b32.xlu0 %v7493_v37, %s6692_s16 }
0x1970   :  { %v7589_v33 = vpop.eup %6412 }
0x1971   :  { %v3258_v34 = vsel %vm236_vm2, %v7589_v33, 0.0 }
0x198a   :  { %3259 = vadd.xlane.f32.xlu1 %v3258_v34 }
0x19ce   :  { %v3218_v13 = vpop.xlane.xlu0 %3217  ;;  %v3215_v31 = vpop.xlane.xlu1 %3214 }
0x19cf   :  { %v3236_v39 = vsub.f32 %v2959_v41, %v3218_v13  ;;  %v3235_v62 = vsub.f32 %v2910_v32, %v3215_v31 }
0x19d1   :  { %v3246_v40 = vmul.f32 1.442695, %v3236_v39  ;;  %v3244_v28 = vmul.f32 1.442695, %v3235_v62 }
0x19d3   :  { %6414 = vpow2.f32 %v3246_v40 }
0x19d4   :  { %6416 = vpow2.f32 %v3244_v28 }
0x19d6   :  { %v3221_v3 = vpop.xlane.xlu0 %3220 }
0x19d7   :  { %v3237_v37 = vsub.f32 %v3008_v48, %v3221_v3  ;;  %v3224_v48 = vpop.xlane.xlu1 %3223 }
0x19d8   :  { %v3238_v55 = vsub.f32 %v7572_v47, %v3224_v48 }
0x19d9   :  { %v3248_v42 = vmul.f32 1.442695, %v3237_v37 }
0x19da   :  { %v3250_v57 = vmul.f32 1.442695, %v3238_v55 }
0x19db   :  { %6418 = vpow2.f32 %v3248_v42 }
0x19dc   :  { %6420 = vpow2.f32 %v3250_v57 }
0x19dd   :  { %v7593_v35 = vpop.eup %6414 }
0x19de   :  { %v7595_v43 = vpop.eup %6416  ;;  %v3264_v44 = vsel %vm236_vm2, %v7593_v35, 0.0  ;;  %v3227_v32 = vpop.xlane.xlu0 %3226 }
0x19df   :  { %3265 = vadd.xlane.f32.xlu1 %v3264_v44  ;;  %v3261_v41 = vsel %vm236_vm2, %v7595_v43, 0.0  ;;  %v3230_v56 = vpop.xlane.xlu1 %3229  ;;  %v3239_v60 = vsub.f32 %v7577_v63, %v3227_v32 }
0x19e0   :  { %3262 = vadd.xlane.f32.xlu0 %v3261_v41  ;;  %v3240_v58 = vsub.f32 %v3155_v5, %v3230_v56 }
0x19e1   :  { %v3252_v61 = vmul.f32 1.442695, %v3239_v60 }
0x19e2   :  { %v3254_v59 = vmul.f32 1.442695, %v3240_v58 }
0x19e3   :  { %v3403_v6 = vpop.permute.xlu1 %3402 }
0x19e4   :  { %6422 = vpow2.f32 %v3254_v59  ;;  %v3408_v21 = vsel %vm727_vm3, %v3403_v6, 0 }
0x19e5   :  { %v7601_v45 = vpop.eup %6418  ;;  %6424 = vpow2.f32 %v3252_v61 }
0x19e6   :  { %v3233_v23 = vpop.xlane.xlu0 %3232  ;;  %v3267_v49 = vsel %vm236_vm2, %v7601_v45, 0.0 }
0x19e7   :  { %3268 = vadd.xlane.f32.xlu0 %v3267_v49  ;;  %v3241_v38 = vsub.f32 %v3204_v20, %v3233_v23  ;;  %v3451_v14 = vpop.permute.xlu1 %3450 }
0x19e9   :  { %v3256_v12 = vmul.f32 1.442695, %v3241_v38 }
0x19ea   :  { %v3355_v51 = vpop.permute.xlu0 %3354 }
0x19eb   :  { %v3360_v30 = vsel %vm727_vm3, %v3355_v51, 0  ;;  %6426 = vpow2.f32 %v3256_v12 }
0x19ec   :  { %6019 = vmatpush3.bf16.msra.mxu0 %v3360_v30 }
0x19ed   :  { %6030 = vmatprep.subr.bf16.mxu0 %v6697_v0 }
0x19f0   :  { %3546 = vrot.lane.b32.xlu1 %v7510_v26, %s6692_s16  ;;  %v7613_v26 = vpop.eup %6420 }
0x19f1   :  { %v7617_v47 = vpop.eup %6422 }
0x19f2   :  { %v3276_v63 = vsel %vm236_vm2, %v7617_v47, 0.0  ;;  %v7621_v27 = vpop.eup %6424 }
0x19f3   :  { %v3273_v7 = vsel %vm236_vm2, %v7621_v27, 0.0 }
0x19f5   :  { %v7625_v24 = vpop.eup %6426 }
0x19f6   :  { %v3279_v8 = vsel %vm236_vm2, %v7625_v24, 0.0 }
0x19fd   :  { %3498 = vrot.lane.b32.xlu0 %v7501_v4, %s6692_s16  ;;  %v3270_v4 = vsel %vm236_vm2, %v7613_v26, 0.0 }
0x1a14   :  { %3271 = vadd.xlane.f32.xlu1 %v3270_v4 }
0x1a17   :  { %v3260_v5 = vpop.xlane.xlu1 %3259 }
0x1a18   :  { %6428 = vrcp.f32 %v3260_v5  ;;  %3277 = vadd.xlane.f32.xlu1 %v3276_v63 }
0x1a1c   :  { %3274 = vadd.xlane.f32.xlu0 %v3273_v7 }
0x1a20   :  { %3280 = vadd.xlane.f32.xlu0 %v3279_v8 }
0x1a22   :  { %v6429_v15 = vpop.eup %6428 }
0x1a23   :  { %v3290_v20 = vmul.f32 %v6429_v15, %v7589_v33 }
0x1a25   :  { %v3298_v46 = vpack.c.bf16 %v3290_v20, %v3290_v20 }
0x1a27   :  { %6015 = vmatmul.mubr.msk.bf16.vlgmr.msra.gmra.mrb[96].mxu1 %vm236_vm2, %v3298_v46 }
0x1a28   :  { %6025 = vmatpush3.bf16.msra.mxu1 %v3408_v21  ;;  %6026 = vmatprep.mubr.msk.bf16.mxu1 %vm6698_vm0, %v6697_v0 }
0x1a29   :  { %3642 = vrot.lane.b32.xlu1 %v7517_v10, %s6692_s16  ;;  %6036 = vmatprep.subr.bf16.mxu1 %v6697_v0 }
0x1a36   :  { %3594 = vrot.lane.b32.xlu0 %v7507_v9, %s6692_s16 }
0x1a3a   :  { %3721 = vrot.lane.b32.xlu0 %v7463_v16, %s6703_s22  ;;  %v3456_v16 = vsel %vm727_vm3, %v3451_v14, 0 }
0x1a6c   :  { %v3266_v11 = vpop.xlane.xlu1 %3265 }
0x1a6d   :  { %6430 = vrcp.f32 %v3266_v11  ;;  %v3263_v54 = vpop.xlane.xlu0 %3262 }
0x1a6e   :  { %6432 = vrcp.f32 %v3263_v54 }
0x1a70   :  { %v3547_v40 = vpop.permute.xlu1 %3546 }
0x1a71   :  { %v3552_v3 = vsel %vm727_vm3, %v3547_v40, 0 }
0x1a74   :  { %v3269_v22 = vpop.xlane.xlu0 %3268 }
0x1a75   :  { %6434 = vrcp.f32 %v3269_v22 }
0x1a77   :  { %v6431_v25 = vpop.eup %6430 }
0x1a78   :  { %v6433_v1 = vpop.eup %6432  ;;  %v3292_v33 = vmul.f32 %v6431_v25, %v7593_v35  ;;  %v3499_v34 = vpop.permute.xlu0 %3498 }
0x1a79   :  { %v3291_v10 = vmul.f32 %v6433_v1, %v7595_v43  ;;  %v3504_v9 = vsel %vm727_vm3, %v3499_v34, 0 }
0x1a7a   :  { %v3300_v13 = vpack.c.bf16 %v3292_v33, %v3292_v33 }
0x1a7b   :  { %v3299_v31 = vpack.c.bf16 %v3291_v10, %v3291_v10 }
0x1a7c   :  { %6027 = vmatmul.mubr.msk.bf16.vlgmr.msra.gmra.mrb[100].mxu1 %vm236_vm2, %v3300_v13 }
0x1a7d   :  { %6021 = vmatmul.mubr.msk.bf16.vlgmr.msra.gmra.mrb[100].mxu0 %vm236_vm2, %v3299_v31  ;;  %6037 = vmatpush3.bf16.msra.mxu1 %v3504_v9 }
0x1a7e   :  { %6031 = vmatpush3.bf16.msra.mxu0 %v3456_v16  ;;  %6032 = vmatprep.mubr.msk.bf16.mxu0 %vm6698_vm0, %v6697_v0 }
0x1a7f   :  { %6042 = vmatprep.subr.bf16.mxu0 %v6697_v0  ;;  %6038 = vmatprep.mubr.msk.bf16.mxu1 %vm6698_vm0, %v6697_v0  ;;  %v6435_v39 = vpop.eup %6434 }
0x1a80   :  { %6048 = vmatprep.subr.bf16.mxu1 %v6697_v0  ;;  %v3293_v62 = vmul.f32 %v6435_v39, %v7601_v45 }
0x1a82   :  { %v3301_v28 = vpack.c.bf16 %v3293_v62, %v3293_v62 }
0x1a85   :  { %6033 = vmatmul.mubr.msk.bf16.vlgmr.msra.gmra.mrb[104].mxu0 %vm236_vm2, %v3301_v28 }
0x1a86   :  { %6043 = vmatpush3.bf16.msra.mxu0 %v3552_v3  ;;  %6044 = vmatprep.mubr.msk.bf16.mxu0 %vm6698_vm0, %v6697_v0 }
0x1a87   :  { %6054 = vmatprep.subr.bf16.mxu0 %v6697_v0 }
0x1aa1   :  { %v3272_v37 = vpop.xlane.xlu1 %3271 }
0x1aa2   :  { %6436 = vrcp.f32 %v3272_v37 }
0x1aa5   :  { %v3278_v42 = vpop.xlane.xlu1 %3277 }
0x1aa6   :  { %6438 = vrcp.f32 %v3278_v42 }
0x1aa9   :  { %v3275_v35 = vpop.xlane.xlu0 %3274  ;;  %v3643_v55 = vpop.permute.xlu1 %3642 }
0x1aaa   :  { %6440 = vrcp.f32 %v3275_v35  ;;  %v3648_v59 = vsel %vm727_vm3, %v3643_v55, 0 }
0x1aac   :  { %v6437_v43 = vpop.eup %6436 }
0x1aad   :  { %v3294_v44 = vmul.f32 %v6437_v43, %v7613_v26  ;;  %v3281_v41 = vpop.xlane.xlu0 %3280 }
0x1aae   :  { %6442 = vrcp.f32 %v3281_v41 }
0x1aaf   :  { %v3302_v32 = vpack.c.bf16 %v3294_v44, %v3294_v44 }
0x1ab0   :  { %v6439_v45 = vpop.eup %6438 }
0x1ab1   :  { %6039 = vmatmul.mubr.msk.bf16.vlgmr.msra.gmra.mrb[104].mxu1 %vm236_vm2, %v3302_v32  ;;  %v3595_v23 = vpop.permute.xlu0 %3594  ;;  %v3296_v49 = vmul.f32 %v6439_v45, %v7617_v47 }
0x1ab2   :  { %6050 = vmatprep.mubr.msk.bf16.mxu1 %vm6698_vm0, %v6697_v0  ;;  %v3600_v51 = vsel %vm727_vm3, %v3595_v23, 0 }
0x1ab3   :  { %6049 = vmatpush3.bf16.msra.mxu1 %v3600_v51  ;;  %v3304_v56 = vpack.c.bf16 %v3296_v49, %v3296_v49 }
0x1ab4   :  { %v6441_v30 = vpop.eup %6440  ;;  %6060 = vmatprep.subr.bf16.mxu1 %v6697_v0 }
0x1ab5   :  { %v3295_v48 = vmul.f32 %v6441_v30, %v7621_v27  ;;  %v3722_v14 = vpop.permute.xlu0 %3721 }
0x1ab7   :  { %v3303_v57 = vpack.c.bf16 %v3295_v48, %v3295_v48 }
0x1ab8   :  { %v6443_v58 = vpop.eup %6442 }
0x1ab9   :  { %6051 = vmatmul.mubr.msk.bf16.vlgmr.msra.gmra.mrb[108].mxu1 %vm236_vm2, %v3304_v56  ;;  %6045 = vmatmul.mubr.msk.bf16.vlgmr.msra.gmra.mrb[108].mxu0 %vm236_vm2, %v3303_v57  ;;  %v3297_v60 = vmul.f32 %v6443_v58, %v7625_v24 }
0x1aba   :  { %6064 = vmatprep.mubr.msk.bf16.mxu1 %vm6698_vm0, %v6697_v0  ;;  %6055 = vmatpush3.bf16.msra.mxu0 %v3648_v59 }
0x1abb   :  { %6056 = vmatprep.mubr.msk.bf16.mxu0 %vm6698_vm0, %v6697_v0  ;;  %6068 = vmatprep.subr.bf16.mxu0 %v6697_v0  ;;  %v3305_v61 = vpack.c.bf16 %v3297_v60, %v3297_v60 }
0x1abc   :  { %6061 = vmatpush3.bf16.msra.mxu1 %v3722_v14 }
0x1abd   :  { %6062 = vmatprep.subr.bf16.mxu1 %v6697_v0 }
0x1ac1   :  { %6057 = vmatmul.mubr.msk.bf16.vlgmr.msra.gmra.mrb[112].mxu0 %vm236_vm2, %v3305_v61 }
0x1ac2   :  { %6072 = vmatprep.mubr.msk.bf16.mxu0 %vm6698_vm0, %v6697_v0 }
0x1afa   :  { %v3348_v38 = vpop.f32.mrb[96].mxu1 }
0x1afb   :  { %v6016_v6 = vpop.f32.mrb[97].mxu1 }
0x1afc   :  { %v3351_v12 = vpop.f32.mrb[98].mxu1 }
0x1afd   :  { %v6017_v26 = vpop.f32.mrb[99].mxu1 }
0x1b4f   :  { %v3444_v4 = vpop.f32.mrb[100].mxu1 }
0x1b50   :  { %v3396_v47 = vpop.f32.mrb[100].mxu0  ;;  %v6028_v5 = vpop.f32.mrb[101].mxu1 }
0x1b51   :  { %v6022_v63 = vpop.f32.mrb[101].mxu0  ;;  %v3447_v27 = vpop.f32.mrb[102].mxu1 }
0x1b52   :  { %v3399_v7 = vpop.f32.mrb[102].mxu0  ;;  %v6029_v24 = vpop.f32.mrb[103].mxu1 }
0x1b53   :  { %v6023_v8 = vpop.f32.mrb[103].mxu0 }
0x1b58   :  { %v3492_v15 = vpop.f32.mrb[104].mxu0 }
0x1b59   :  { %v6034_v20 = vpop.f32.mrb[105].mxu0 }
0x1b5a   :  { %v3495_v46 = vpop.f32.mrb[106].mxu0 }
0x1b5b   :  { %v6035_v21 = vpop.f32.mrb[107].mxu0 }
0x1b84   :  { %v3540_v11 = vpop.f32.mrb[104].mxu1 }
0x1b85   :  { %v6040_v54 = vpop.f32.mrb[105].mxu1 }
0x1b86   :  { %v3543_v22 = vpop.f32.mrb[106].mxu1  ;;  %v6318_v54 = vld [vmem:[#allocation11 + $0x20] sm:$0xff]  }
0x1b87   :  { %v6041_v25 = vpop.f32.mrb[107].mxu1 }
0x1b8c   :  { %v3636_v1 = vpop.f32.mrb[108].mxu1  ;;  %v3588_v33 = vpop.f32.mrb[108].mxu0 }
0x1b8d   :  { %v6277_v10 = vpack.i.bf16 %v3636_v1, %v3444_v4  ;;  %v6052_v34 = vpop.f32.mrb[109].mxu1  ;;  %v6272_v13 = vpack.i.bf16 %v3588_v33, %v3396_v47  ;;  %v6046_v31 = vpop.f32.mrb[109].mxu0 }
0x1b8e   :  { %v3639_v9 = vpop.f32.mrb[110].mxu1  ;;  %v3591_v16 = vpop.f32.mrb[110].mxu0 }
0x1b8f   :  { %6278 = vrot.lane.b32.xlu0 %v6277_v10, %s6688_s1  ;;  %v6053_v39 = vpop.f32.mrb[111].mxu1  ;;  %6273 = vrot.lane.b32.xlu1 %v6272_v13, %s6687_s26  ;;  %v6047_v62 = vpop.f32.mrb[111].mxu0  ;;  %v7715_v13 = vld [vmem:[%s8048_s7 + $0x10] sm:$0x1f] }
0x1b90   :  { %v3807_v9 = vrot.slane %v7715_v13, %v7142_v29 }
0x1b93   :  { %3723 = vrot.lane.b32.xlu0 %v7466_v18, %s6703_s22 }
0x1b94   :  { %v3684_v40 = vpop.f32.mrb[112].mxu0 }
0x1b95   :  { %v6282_v28 = vpack.i.bf16 %v3684_v40, %v3492_v15  ;;  %v6058_v3 = vpop.f32.mrb[113].mxu0 }
0x1b96   :  { %v3687_v37 = vpop.f32.mrb[114].mxu0 }
0x1b97   :  { %6283 = vrot.lane.b32.xlu1 %v6282_v28, %s6704_s11  ;;  %v6059_v42 = vpop.f32.mrb[115].mxu0  ;;  %v3813_v28 = vrot.slane %v7715_v13, %v7152_v36 }
0x1b9b   :  { %3727 = vrot.lane.b32.xlu1 %v7480_v53, %s6703_s22 }
0x1c01   :  { %v6279_v35 = vpop.permute.xlu0 %6278  ;;  %v6274_v43 = vpop.permute.xlu1 %6273 }
0x1c02   :  { %v6276_v44 = vunpack.i.h.bf16 %v6274_v43  ;;  %v6275_v41 = vunpack.i.l.bf16 %v6274_v43  ;;  %v6281_v45 = vunpack.i.h.bf16 %v6279_v35  ;;  %v6280_v18 = vunpack.i.l.bf16 %v6279_v35  ;;  %v6319_v43 = vld [vmem:[#allocation11 + $0x28] sm:$0xff]  }
0x1c04   :  { %v3717_v23 = vsel %vm236_vm2, %v3540_v11, %v6276_v44  ;;  %v3702_v49 = vsel %vm236_vm2, %v3348_v38, %v6275_v41  ;;  %v6317_v11 = vld [vmem:[%s8045_s4 + $0x28] sm:$0xff]   ;;  %v5477_v44 = vld [vmem:[#allocation10 + $0x2] ss:$0 sm:$0xff] }
0x1c05   :  { %v3724_v32 = vpop.permute.xlu0 %3723  ;;  %v3703_v55 = vsel %vm1120_vm4, %v3702_v49, %v6280_v18  ;;  %v3718_v53 = vsel %vm1120_vm4, %v3717_v23, %v6281_v45 }
0x1c06   :  { %6063 = vmatpush3.bf16.msra.mxu1 %v3724_v32 }
0x1c07   :  { %6076 = vmatprep.subr.bf16.mxu1 %v6697_v0 }
0x1c09   :  { %v6284_v51 = vpop.permute.xlu1 %6283 }
0x1c0a   :  { %v6286_v30 = vunpack.i.h.bf16 %v6284_v51  ;;  %v6285_v48 = vunpack.i.l.bf16 %v6284_v51 }
0x1c0c   :  { %v3719_v56 = vsel %vm1122_vm5, %v3718_v53, %v6286_v30  ;;  %v3704_v57 = vsel %vm1122_vm5, %v3703_v55, %v6285_v48  ;;  %v3897_v55 = vrot.slane %v7715_v13, %v7163_v50 }
0x1c0d   :  { %v3720_v58 = vpack.c.bf16 %v3719_v56, %v3704_v57  ;;  %v3728_v59 = vpop.permute.xlu1 %3727 }
0x1c0f   :  { %6065 = vmatmul.mubr.msk.bf16.vlgmr.msra.gmra.mrb[112].mxu1 %vm160_vm1, %v3720_v58 }
0x1c10   :  { %6080 = vmatprep.mubr.msk.bf16.mxu1 %vm6698_vm0, %v6697_v0  ;;  %6077 = vmatpush3.bf16.xpose.msra.mxu1 %v6318_v54 }
0x1c11   :  { %6078 = vmatprep.subr.bf16.mxu1 %v6697_v0 }
0x1c18   :  { %6079 = vmatpush3.bf16.xpose.msra.mxu1 %v6319_v43 }
0x1c19   :  { %6098 = vmatprep.subr.bf16.mxu1 %v6697_v0 }
0x1ce2   :  { %v3767_v60 = vpop.f32.mrb[112].mxu1 }
0x1ce3   :  { %v3768_v61 = vadd.f32 %v3767_v60, %v3728_v59  ;;  %v6066_v38 = vpop.f32.mrb[113].mxu1 }
0x1ce4   :  { %v3770_v6 = vpop.f32.mrb[114].mxu1 }
0x1ce5   :  { %v3776_v12 = vadd.f32 %v3768_v61, %v7471_v52  ;;  %v3771_v26 = vadd.f32 %v3770_v6, %v3728_v59  ;;  %v6067_v14 = vpop.f32.mrb[115].mxu1 }
0x1ce7   :  { %v3777_v4 = vadd.f32 %v3771_v26, %v7473_v2  ;;  %v3778_v47 = vsel %vm160_vm1, %v3776_v12, 0.0  ;;  %v6316_v2 = vld [vmem:[%s8045_s4 + $0x20] sm:$0xff]  }
0x1ce8   :  { %3779 = vadd.xlane.f32.xlu0 %v3778_v47  ;;  %6069 = vmatpush3.bf16.msra.mxu0 %v6316_v2 }
0x1ce9   :  { %v3781_v5 = vsel %vm160_vm1, %v3777_v4, 0.0  ;;  %6070 = vmatprep.subr.bf16.mxu0 %v6697_v0 }
0x1cea   :  { %3782 = vadd.xlane.f32.xlu1 %v3781_v5 }
0x1cec   :  { %6071 = vmatpush3.bf16.msra.mxu0 %v6317_v11 }
0x1ced   :  { %6084 = vmatprep.subr.bf16.mxu0 %v6697_v0 }
0x1d75   :  { %v3780_v63 = vpop.xlane.xlu0 %3779 }
0x1d76   :  { %v3784_v27 = vmul.f32 0.03125, %v3780_v63 }
0x1d77   :  { %v3783_v7 = vpop.xlane.xlu1 %3782 }
0x1d78   :  { %v3786_v24 = vsub.f32 %v3776_v12, %v3784_v27  ;;  %v3785_v8 = vmul.f32 0.03125, %v3783_v7 }
0x1d7a   :  { %v3787_v15 = vsub.f32 %v3777_v4, %v3785_v8  ;;  %v3788_v20 = vmul.f32 %v3786_v24, %v3786_v24 }
0x1d7c   :  { %v3790_v46 = vsel %vm160_vm1, %v3788_v20, 0.0  ;;  %v3789_v52 = vmul.f32 %v3787_v15, %v3787_v15  ;;  %v7736_v20 = vld [vmem:[#allocation7 + $0x38] sm:$0xff]  }
0x1d7d   :  { %3791 = vadd.xlane.f32.xlu0 %v3790_v46 }
0x1d7e   :  { %v3793_v21 = vsel %vm160_vm1, %v3789_v52, 0.0 }
0x1d81   :  { %3794 = vadd.xlane.f32.xlu0 %v3793_v21 }
0x1e0a   :  { %v3792_v22 = vpop.xlane.xlu0 %3791 }
0x1e0b   :  { %v3796_v25 = vmul.f32 0.03125, %v3792_v22  ;;  %v3982_v22 = vrot.slane %v7715_v13, %v7180_v17 }
0x1e0d   :  { %v3798_v1 = vadd.f32 1e-05, %v3796_v25 }
0x1e0e   :  { %v3795_v33 = vpop.xlane.xlu0 %3794 }
0x1e0f   :  { %6444 = vrsqrt.f32 %v3798_v1  ;;  %v3797_v10 = vmul.f32 0.03125, %v3795_v33 }
0x1e11   :  { %v3799_v34 = vadd.f32 1e-05, %v3797_v10 }
0x1e13   :  { %6446 = vrsqrt.f32 %v3799_v34 }
0x1e19   :  { %v6445_v31 = vpop.eup %6444 }
0x1e1a   :  { %v3802_v16 = vmul.f32 %v6445_v31, %v3786_v24  ;;  %v3988_v31 = vrot.slane %v7715_v13, %v7185_v19 }
0x1e1c   :  { %v3808_v62 = vmul.f32 %v3807_v9, %v3802_v16 }
0x1e1d   :  { %v6447_v39 = vpop.eup %6446 }
0x1e1e   :  { %v3803_v40 = vmul.f32 %v6447_v39, %v3787_v15  ;;  %v3814_v37 = vadd.f32 %v3813_v28, %v3808_v62  ;;  %v7733_v15 = vld [vmem:[#allocation7 + $0x30] sm:$0xff]  }
0x1e20   :  { %v3809_v3 = vmul.f32 %v3807_v9, %v3803_v40  ;;  %v7754_v40 = vld [vmem:[#allocation8 + $0x3] ss:$0 sm:$0xff] }
0x1e22   :  { %v3815_v42 = vadd.f32 %v3813_v28, %v3809_v3 }
0x1e24   :  { %v3816_v35 = vpack.c.bf16 %v3815_v42, %v3814_v37 }
0x1e26   :  { %6073 = vmatmul.mubr.msk.bf16.vlgmr.msra.gmra.mrb[116].mxu0 %vm160_vm1, %v3816_v35 }
0x1e27   :  { %6088 = vmatprep.mubr.msk.bf16.mxu0 %vm6698_vm0, %v6697_v0  ;;  %6085 = vmatpush3.bf16.msra.mxu0 %v7733_v15 }
0x1e28   :  { %6086 = vmatprep.subr.bf16.mxu0 %v6697_v0 }
0x1e2b   :  { %6087 = vmatpush3.bf16.msra.mxu0 %v7736_v20 }
0x1e2c   :  { %6092 = vmatprep.subr.bf16.mxu0 %v6697_v0 }
0x1ef9   :  { %v3879_v41 = vpop.f32.mrb[116].mxu0 }
0x1efa   :  { %v3880_v32 = vadd.f32 %v5477_v44, %v3879_v41  ;;  %v6074_v45 = vpop.f32.mrb[117].mxu0 }
0x1efb   :  { %v3882_v18 = vpop.f32.mrb[118].mxu0 }
0x1efc   :  { %v3883_v23 = vadd.f32 %v5477_v44, %v3882_v18  ;;  %v6075_v49 = vpop.f32.mrb[119].mxu0  ;;  %v3886_v51 = vmax.f32 %v3880_v32, 0.0 }
0x1efe   :  { %v3887_v30 = vmax.f32 %v3883_v23, 0.0 }
0x1f00   :  { %v3888_v48 = vpack.c.bf16 %v3887_v30, %v3886_v51 }
0x1f02   :  { %6081 = vmatmul.mubr.bf16.vlgmr.msra.gmra.mrb[116].mxu1 %v3888_v48 }
0x1f03   :  { %6100 = vmatprep.mubr.msk.bf16.mxu1 %vm6698_vm0, %v6697_v0 }
0x1fd5   :  { %v3944_v53 = vpop.f32.mrb[116].mxu1 }
0x1fd6   :  { %v3945_v56 = vadd.f32 %v3944_v53, %v3897_v55  ;;  %v6082_v57 = vpop.f32.mrb[117].mxu1 }
0x1fd7   :  { %v3947_v58 = vpop.f32.mrb[118].mxu1 }
0x1fd8   :  { %v3951_v59 = vadd.f32 %v3945_v56, %v3814_v37  ;;  %v3948_v60 = vadd.f32 %v3947_v58, %v3897_v55  ;;  %v6083_v61 = vpop.f32.mrb[119].mxu1 }
0x1fda   :  { %v3952_v38 = vadd.f32 %v3948_v60, %v3815_v42  ;;  %v3953_v6 = vsel %vm160_vm1, %v3951_v59, 0.0 }
0x1fdb   :  { %3954 = vadd.xlane.f32.xlu1 %v3953_v6 }
0x1fdc   :  { %v3956_v12 = vsel %vm160_vm1, %v3952_v38, 0.0 }
0x1fdd   :  { %3957 = vadd.xlane.f32.xlu0 %v3956_v12 }
0x2068   :  { %v3955_v26 = vpop.xlane.xlu1 %3954 }
0x2069   :  { %v3959_v14 = vmul.f32 0.03125, %v3955_v26 }
0x206a   :  { %v3958_v4 = vpop.xlane.xlu0 %3957 }
0x206b   :  { %v3961_v47 = vsub.f32 %v3951_v59, %v3959_v14  ;;  %v3960_v5 = vmul.f32 0.03125, %v3958_v4 }
0x206d   :  { %v3962_v63 = vsub.f32 %v3952_v38, %v3960_v5  ;;  %v3963_v27 = vmul.f32 %v3961_v47, %v3961_v47 }
0x206f   :  { %v3965_v7 = vsel %vm160_vm1, %v3963_v27, 0.0  ;;  %v3964_v24 = vmul.f32 %v3962_v63, %v3962_v63 }
0x2070   :  { %3966 = vadd.xlane.f32.xlu1 %v3965_v7 }
0x2071   :  { %v3968_v8 = vsel %vm160_vm1, %v3964_v24, 0.0 }
0x2072   :  { %3969 = vadd.xlane.f32.xlu0 %v3968_v8 }
0x20fd   :  { %v3967_v46 = vpop.xlane.xlu1 %3966 }
0x20fe   :  { %v3971_v52 = vmul.f32 0.03125, %v3967_v46 }
0x20ff   :  { %v3970_v21 = vpop.xlane.xlu0 %3969 }
0x2100   :  { %v3973_v2 = vadd.f32 1e-05, %v3971_v52  ;;  %v3972_v11 = vmul.f32 0.03125, %v3970_v21 }
0x2102   :  { %6448 = vrsqrt.f32 %v3973_v2  ;;  %v3974_v54 = vadd.f32 1e-05, %v3972_v11 }
0x2104   :  { %6450 = vrsqrt.f32 %v3974_v54 }
0x210c   :  { %v6449_v25 = vpop.eup %6448 }
0x210d   :  { %v3977_v1 = vmul.f32 %v6449_v25, %v3961_v47 }
0x210e   :  { %v6451_v33 = vpop.eup %6450 }
0x210f   :  { %v3983_v10 = vmul.f32 %v3982_v22, %v3977_v1  ;;  %v3978_v34 = vmul.f32 %v6451_v33, %v3962_v63 }
0x2111   :  { %v3984_v9 = vmul.f32 %v3982_v22, %v3978_v34  ;;  %v7745_v16 = vadd.f32 %v3988_v31, %v3983_v10 }
0x2113   :  { %v7747_v39 = vadd.f32 %v3988_v31, %v3984_v9 }
0x2115   :  { %v3998_v62 = vpack.c.bf16 %v7747_v39, %v7745_v16 }
0x2117   :  { %6089 = vmatmul.mubr.msk.bf16.vlgmr.msra.gmra.mrb[120].mxu0 %vm160_vm1, %v3998_v62 }
0x2118   :  { %6094 = vmatprep.mubr.msk.bf16.mxu0 %vm6698_vm0, %v6697_v0 }
0x21ea   :  { %v4054_v28 = vpop.f32.mrb[120].mxu0 }
0x21eb   :  { %v4055_v3 = vadd.f32 %v7754_v40, %v4054_v28  ;;  %v6090_v37 = vpop.f32.mrb[121].mxu0 }
0x21ec   :  { %v4057_v13 = vpop.f32.mrb[122].mxu0 }
0x21ed   :  { %4065 = vrot.lane.b32.xlu0 %v4055_v3, %s6701_s30  ;;  %4062 = vrot.lane.b32.xlu1 %v4055_v3, %s6700_s3  ;;  %v6091_v42 = vpop.f32.mrb[123].mxu0  ;;  %v4058_v35 = vadd.f32 %v7754_v40, %v4057_v13  ;;  %v4081_v43 = vpack.c.bf16 %v4055_v3, %v4055_v3 }
0x21ef   :  { %v7775_v51 = vpack.c.bf16 %v4058_v35, %v4058_v35 }
0x21f1   :  { %4068 = vrot.lane.b32.xlu1 %v4055_v3, %s6699_s9  ;;  %4075 = vrot.lane.b32.xlu0 %v4058_v35, %s6701_s30 }
0x21f5   :  { %4090 = vrot.lane.b32.xlu0 %v4081_v43, %s6702_s6  ;;  %4072 = vrot.lane.b32.xlu1 %v4058_v35, %s6700_s3 }
0x21f9   :  { %4078 = vrot.lane.b32.xlu1 %v4058_v35, %s6699_s9 }
0x225f   :  { %v4066_v44 = vpop.permute.xlu0 %4065  ;;  %v4063_v41 = vpop.permute.xlu1 %4062 }
0x2260   :  { %v7765_v32 = vpack.c.bf16 %v4066_v44, %v4066_v44  ;;  %v7767_v45 = vpack.c.bf16 %v4063_v41, %v4063_v41 }
0x2262   :  { %4188 = vrot.lane.b32.xlu0 %v7765_v32, %s6702_s6  ;;  %4139 = vrot.lane.b32.xlu1 %v7767_v45, %s6702_s6 }
0x2263   :  { %v4069_v18 = vpop.permute.xlu1 %4068  ;;  %v4076_v23 = vpop.permute.xlu0 %4075 }
0x2264   :  { %v7773_v49 = vpack.c.bf16 %v4069_v18, %v4069_v18  ;;  %v7781_v55 = vpack.c.bf16 %v4076_v23, %v4076_v23 }
0x2266   :  { %4237 = vrot.lane.b32.xlu1 %v7773_v49, %s6702_s6  ;;  %4286 = vrot.lane.b32.xlu0 %v7775_v51, %s6702_s6 }
0x2267   :  { %v4091_v30 = vpop.permute.xlu0 %4090  ;;  %v4073_v48 = vpop.permute.xlu1 %4072 }
0x2268   :  { %v4096_v53 = vsel %vm236_vm2, %v4091_v30, 0  ;;  %v7784_v56 = vpack.c.bf16 %v4073_v48, %v4073_v48 }
0x2269   :  { %6093 = vmatpush3.bf16.xpose.msra.mxu0 %v4096_v53 }
0x226a   :  { %4335 = vrot.lane.b32.xlu1 %v7784_v56, %s6702_s6  ;;  %4384 = vrot.lane.b32.xlu0 %v7781_v55, %s6702_s6 }
0x226b   :  { %v4079_v57 = vpop.permute.xlu1 %4078  ;;  %6104 = vmatprep.subr.bf16.mxu0 %v6697_v0 }
0x226c   :  { %v7791_v58 = vpack.c.bf16 %v4079_v57, %v4079_v57 }
0x226e   :  { %4433 = vrot.lane.b32.xlu1 %v7791_v58, %s6702_s6 }
0x2270   :  { %6095 = vmatmul.mubr.msk.bf16.vlgmr.msra.gmra.mrb[124].mxu0 %vm236_vm2, %v4081_v43 }
0x2271   :  { %6106 = vmatprep.mubr.msk.bf16.mxu0 %vm6698_vm0, %v6697_v0 }
0x2272   :  { %4577 = vrot.lane.b32.xlu1 %v4081_v43, %s6692_s16 }
0x22d4   :  { %v4189_v59 = vpop.permute.xlu0 %4188  ;;  %v4140_v60 = vpop.permute.xlu1 %4139 }
0x22d5   :  { %v4194_v61 = vsel %vm236_vm2, %v4189_v59, 0  ;;  %v4145_v38 = vsel %vm236_vm2, %v4140_v60, 0 }
0x22d6   :  { %6099 = vmatpush3.bf16.xpose.msra.mxu1 %v4145_v38  ;;  %6105 = vmatpush3.bf16.xpose.msra.mxu0 %v4194_v61 }
0x22d7   :  { %6110 = vmatprep.subr.bf16.mxu1 %v6697_v0  ;;  %6116 = vmatprep.subr.bf16.mxu0 %v6697_v0 }
0x22d8   :  { %v4238_v6 = vpop.permute.xlu1 %4237  ;;  %v4287_v12 = vpop.permute.xlu0 %4286 }
0x22d9   :  { %v4243_v26 = vsel %vm236_vm2, %v4238_v6, 0  ;;  %v4292_v14 = vsel %vm236_vm2, %v4287_v12, 0 }
0x22dc   :  { %v4336_v4 = vpop.permute.xlu1 %4335  ;;  %v4385_v47 = vpop.permute.xlu0 %4384 }
0x22dd   :  { %6101 = vmatmul.mubr.msk.bf16.vlgmr.msra.gmra.mrb[120].mxu1 %vm236_vm2, %v7767_v45  ;;  %6107 = vmatmul.mubr.msk.bf16.vlgmr.msra.gmra.mrb[128].mxu0 %vm236_vm2, %v7765_v32  ;;  %v4341_v63 = vsel %vm236_vm2, %v4336_v4, 0  ;;  %v4390_v27 = vsel %vm236_vm2, %v4385_v47, 0 }
0x22de   :  { %6111 = vmatpush3.bf16.xpose.msra.mxu1 %v4243_v26  ;;  %6117 = vmatpush3.bf16.xpose.msra.mxu0 %v4292_v14 }
0x22df   :  { %6112 = vmatprep.mubr.msk.bf16.mxu1 %vm6698_vm0, %v6697_v0  ;;  %6118 = vmatprep.mubr.msk.bf16.mxu0 %vm6698_vm0, %v6697_v0 }
0x22e0   :  { %6122 = vmatprep.subr.bf16.mxu1 %v6697_v0  ;;  %6128 = vmatprep.subr.bf16.mxu0 %v6697_v0  ;;  %v4434_v5 = vpop.permute.xlu1 %4433 }
0x22e1   :  { %v4439_v24 = vsel %vm236_vm2, %v4434_v5, 0 }
0x22e4   :  { %v4578_v7 = vpop.permute.xlu1 %4577 }
0x22e5   :  { %6113 = vmatmul.mubr.msk.bf16.vlgmr.msra.gmra.mrb[124].mxu1 %vm236_vm2, %v7773_v49  ;;  %6119 = vmatmul.mubr.msk.bf16.vlgmr.msra.gmra.mrb[132].mxu0 %vm236_vm2, %v7775_v51  ;;  %v4583_v8 = vsel %vm727_vm3, %v4578_v7, 0 }
0x22e6   :  { %6123 = vmatpush3.bf16.xpose.msra.mxu1 %v4341_v63  ;;  %6129 = vmatpush3.bf16.xpose.msra.mxu0 %v4390_v27 }
0x22e7   :  { %6124 = vmatprep.mubr.msk.bf16.mxu1 %vm6698_vm0, %v6697_v0  ;;  %6130 = vmatprep.mubr.msk.bf16.mxu0 %vm6698_vm0, %v6697_v0 }
0x22e8   :  { %6134 = vmatprep.subr.bf16.mxu1 %v6697_v0  ;;  %6140 = vmatprep.subr.bf16.mxu0 %v6697_v0 }
0x22ed   :  { %6125 = vmatmul.mubr.msk.bf16.vlgmr.msra.gmra.mrb[128].mxu1 %vm236_vm2, %v7784_v56  ;;  %6131 = vmatmul.mubr.msk.bf16.vlgmr.msra.gmra.mrb[136].mxu0 %vm236_vm2, %v7781_v55 }
0x22ee   :  { %6135 = vmatpush3.bf16.xpose.msra.mxu1 %v4439_v24  ;;  %6141 = vmatpush3.bf16.msra.mxu0 %v4583_v8 }
0x22ef   :  { %6136 = vmatprep.mubr.msk.bf16.mxu1 %vm6698_vm0, %v6697_v0  ;;  %6146 = vmatprep.subr.bf16.mxu1 %v6697_v0 }
0x22f0   :  { %6142 = vmatprep.mubr.msk.bf16.mxu0 %vm6698_vm0, %v6697_v0  ;;  %6152 = vmatprep.subr.bf16.mxu0 %v6697_v0 }
0x22f5   :  { %6137 = vmatmul.mubr.msk.bf16.vlgmr.msra.gmra.mrb[132].mxu1 %vm236_vm2, %v7791_v58 }
0x22f6   :  { %6148 = vmatprep.mubr.msk.bf16.mxu1 %vm6698_vm0, %v6697_v0 }
0x2343   :  { %v4132_v46 = vpop.f32.mrb[124].mxu0 }
0x2344   :  { %v6096_v52 = vpop.f32.mrb[125].mxu0  ;;  %v4481_v21 = vsel %vm236_vm2, %v4132_v46, -inf }
0x2345   :  { %4482 = vmax.xlane.f32.xlu0 %v4481_v21  ;;  %v4135_v2 = vpop.f32.mrb[126].mxu0 }
0x2346   :  { %v6097_v11 = vpop.f32.mrb[127].mxu0 }
0x23b0   :  { %v4181_v54 = vpop.f32.mrb[120].mxu1  ;;  %v4230_v22 = vpop.f32.mrb[128].mxu0 }
0x23b1   :  { %v6102_v25 = vpop.f32.mrb[121].mxu1  ;;  %v6108_v1 = vpop.f32.mrb[129].mxu0  ;;  %v4484_v33 = vsel %vm236_vm2, %v4181_v54, -inf  ;;  %v4487_v10 = vsel %vm236_vm2, %v4230_v22, -inf }
0x23b2   :  { %4485 = vmax.xlane.f32.xlu1 %v4484_v33  ;;  %v4184_v34 = vpop.f32.mrb[122].mxu1  ;;  %4488 = vmax.xlane.f32.xlu0 %v4487_v10  ;;  %v4233_v31 = vpop.f32.mrb[130].mxu0 }
0x23b3   :  { %v6103_v9 = vpop.f32.mrb[123].mxu1  ;;  %v6109_v62 = vpop.f32.mrb[131].mxu0 }
0x23b8   :  { %v4279_v28 = vpop.f32.mrb[124].mxu1  ;;  %v7846_v3 = vpop.f32.mrb[132].mxu0 }
0x23b9   :  { %v6114_v37 = vpop.f32.mrb[125].mxu1  ;;  %v6120_v13 = vpop.f32.mrb[133].mxu0  ;;  %v4490_v42 = vsel %vm236_vm2, %v4279_v28, -inf  ;;  %v4493_v35 = vsel %vm236_vm2, %v7846_v3, -inf }
0x23ba   :  { %v4282_v43 = vpop.f32.mrb[126].mxu1  ;;  %4491 = vmax.xlane.f32.xlu0 %v4490_v42  ;;  %4494 = vmax.xlane.f32.xlu1 %v4493_v35  ;;  %v4331_v44 = vpop.f32.mrb[134].mxu0 }
0x23bb   :  { %v6115_v41 = vpop.f32.mrb[127].mxu1  ;;  %v6121_v18 = vpop.f32.mrb[135].mxu0 }
0x23c0   :  { %v7851_v23 = vpop.f32.mrb[128].mxu1  ;;  %v7853_v30 = vpop.f32.mrb[136].mxu0 }
0x23c1   :  { %v6126_v48 = vpop.f32.mrb[129].mxu1  ;;  %v6132_v53 = vpop.f32.mrb[137].mxu0  ;;  %v4496_v57 = vsel %vm236_vm2, %v7851_v23, -inf  ;;  %v4499_v59 = vsel %vm236_vm2, %v7853_v30, -inf }
0x23c2   :  { %v4380_v60 = vpop.f32.mrb[130].mxu1  ;;  %4497 = vmax.xlane.f32.xlu0 %v4496_v57  ;;  %4500 = vmax.xlane.f32.xlu1 %v4499_v59  ;;  %v4429_v61 = vpop.f32.mrb[138].mxu0 }
0x23c3   :  { %v6127_v38 = vpop.f32.mrb[131].mxu1  ;;  %v6133_v6 = vpop.f32.mrb[139].mxu0 }
0x23c8   :  { %v4475_v12 = vpop.f32.mrb[132].mxu1 }
0x23c9   :  { %v6138_v26 = vpop.f32.mrb[133].mxu1  ;;  %v4502_v14 = vsel %vm236_vm2, %v4475_v12, -inf }
0x23ca   :  { %v4478_v4 = vpop.f32.mrb[134].mxu1  ;;  %4503 = vmax.xlane.f32.xlu0 %v4502_v14 }
0x23cb   :  { %v6139_v47 = vpop.f32.mrb[135].mxu1 }
0x23d2   :  { %v4483_v5 = vpop.xlane.xlu0 %4482 }
0x23d3   :  { %4673 = vrot.lane.b32.xlu1 %v7765_v32, %s6692_s16  ;;  %v4505_v63 = vsub.f32 %v4132_v46, %v4483_v5 }
0x23d5   :  { %v4513_v27 = vmul.f32 1.442695, %v4505_v63 }
0x23d7   :  { %4721 = vrot.lane.b32.xlu1 %v7773_v49, %s6692_s16  ;;  %6452 = vpow2.f32 %v4513_v27 }
0x23e0   :  { %4625 = vrot.lane.b32.xlu0 %v7767_v45, %s6692_s16 }
0x23e1   :  { %v7866_v7 = vpop.eup %6452 }
0x23e2   :  { %v4529_v24 = vsel %vm236_vm2, %v7866_v7, 0.0 }
0x23fb   :  { %4530 = vadd.xlane.f32.xlu1 %v4529_v24 }
0x243f   :  { %v4486_v8 = vpop.xlane.xlu1 %4485  ;;  %v4489_v52 = vpop.xlane.xlu0 %4488 }
0x2440   :  { %v4506_v21 = vsub.f32 %v4181_v54, %v4486_v8  ;;  %v4507_v32 = vsub.f32 %v4230_v22, %v4489_v52 }
0x2442   :  { %v4515_v2 = vmul.f32 1.442695, %v4506_v21  ;;  %v4517_v11 = vmul.f32 1.442695, %v4507_v32 }
0x2444   :  { %6454 = vpow2.f32 %v4515_v2 }
0x2445   :  { %6456 = vpow2.f32 %v4517_v11 }
0x2447   :  { %v4492_v49 = vpop.xlane.xlu0 %4491 }
0x2448   :  { %v4508_v45 = vsub.f32 %v4279_v28, %v4492_v49  ;;  %v4495_v28 = vpop.xlane.xlu1 %4494 }
0x2449   :  { %v4509_v37 = vsub.f32 %v7846_v3, %v4495_v28 }
0x244a   :  { %v4519_v25 = vmul.f32 1.442695, %v4508_v45 }
0x244b   :  { %v4521_v42 = vmul.f32 1.442695, %v4509_v37 }
0x244c   :  { %6458 = vpow2.f32 %v4519_v25 }
0x244d   :  { %6460 = vpow2.f32 %v4521_v42 }
0x244e   :  { %v7870_v46 = vpop.eup %6454 }
0x244f   :  { %v7872_v1 = vpop.eup %6456  ;;  %v4532_v33 = vsel %vm236_vm2, %v7870_v46, 0.0  ;;  %v4498_v22 = vpop.xlane.xlu0 %4497 }
0x2450   :  { %4533 = vadd.xlane.f32.xlu0 %v4532_v33  ;;  %v4535_v54 = vsel %vm236_vm2, %v7872_v1, 0.0  ;;  %v4501_v13 = vpop.xlane.xlu1 %4500  ;;  %v4510_v43 = vsub.f32 %v7851_v23, %v4498_v22 }
0x2451   :  { %4536 = vadd.xlane.f32.xlu1 %v4535_v54  ;;  %v4511_v35 = vsub.f32 %v7853_v30, %v4501_v13 }
0x2452   :  { %v4523_v41 = vmul.f32 1.442695, %v4510_v43 }
0x2453   :  { %v4525_v44 = vmul.f32 1.442695, %v4511_v35 }
0x2454   :  { %v4674_v48 = vpop.permute.xlu1 %4673 }
0x2455   :  { %6462 = vpow2.f32 %v4525_v44  ;;  %v4679_v14 = vsel %vm727_vm3, %v4674_v48, 0 }
0x2456   :  { %v7878_v10 = vpop.eup %6458  ;;  %6464 = vpow2.f32 %v4523_v41 }
0x2457   :  { %v4504_v34 = vpop.xlane.xlu0 %4503  ;;  %v4538_v31 = vsel %vm236_vm2, %v7878_v10, 0.0  ;;  %v7891_v53 = vpop.eup %6460 }
0x2458   :  { %4539 = vadd.xlane.f32.xlu0 %v4538_v31  ;;  %v4512_v18 = vsub.f32 %v4475_v12, %v4504_v34  ;;  %v4541_v3 = vsel %vm236_vm2, %v7891_v53, 0.0 }
0x245b   :  { %v4626_v9 = vpop.permute.xlu0 %4625 }
0x245c   :  { %v4631_v62 = vsel %vm727_vm3, %v4626_v9, 0 }
0x245d   :  { %6147 = vmatpush3.bf16.msra.mxu1 %v4631_v62 }
0x245e   :  { %6158 = vmatprep.subr.bf16.mxu1 %v6697_v0 }
0x245f   :  { %v7895_v57 = vpop.eup %6462 }
0x2460   :  { %v7897_v23 = vpop.eup %6464  ;;  %v4547_v59 = vsel %vm236_vm2, %v7895_v57, 0.0 }
0x2461   :  { %v4544_v60 = vsel %vm236_vm2, %v7897_v23, 0.0 }
0x2462   :  { %4817 = vrot.lane.b32.xlu1 %v7784_v56, %s6692_s16  ;;  %v4527_v56 = vmul.f32 1.442695, %v4512_v18 }
0x2464   :  { %6466 = vpow2.f32 %v4527_v56 }
0x246e   :  { %4769 = vrot.lane.b32.xlu0 %v7775_v51, %s6692_s16  ;;  %v4722_v51 = vpop.permute.xlu1 %4721  ;;  %v7903_v61 = vpop.eup %6466 }
0x246f   :  { %v4550_v38 = vsel %vm236_vm2, %v7903_v61, 0.0 }
0x2486   :  { %4542 = vadd.xlane.f32.xlu1 %v4541_v3 }
0x2488   :  { %v4531_v30 = vpop.xlane.xlu1 %4530 }
0x2489   :  { %6468 = vrcp.f32 %v4531_v30 }
0x248a   :  { %4548 = vadd.xlane.f32.xlu1 %v4547_v59 }
0x248d   :  { %4545 = vadd.xlane.f32.xlu0 %v4544_v60 }
0x2491   :  { %4551 = vadd.xlane.f32.xlu0 %v4550_v38 }
0x2493   :  { %v6469_v6 = vpop.eup %6468 }
0x2494   :  { %v4561_v12 = vmul.f32 %v6469_v6, %v7866_v7 }
0x2496   :  { %v4569_v26 = vpack.c.bf16 %v4561_v12, %v4561_v12 }
0x2498   :  { %6143 = vmatmul.mubr.msk.bf16.vlgmr.msra.gmra.mrb[140].mxu0 %vm236_vm2, %v4569_v26 }
0x2499   :  { %6153 = vmatpush3.bf16.msra.mxu0 %v4679_v14  ;;  %6154 = vmatprep.mubr.msk.bf16.mxu0 %vm6698_vm0, %v6697_v0 }
0x249a   :  { %6164 = vmatprep.subr.bf16.mxu0 %v6697_v0 }
0x249b   :  { %4913 = vrot.lane.b32.xlu1 %v7791_v58, %s6692_s16 }
0x24a7   :  { %4865 = vrot.lane.b32.xlu0 %v7781_v55, %s6692_s16  ;;  %v4727_v55 = vsel %vm727_vm3, %v4722_v51, 0 }
0x24ab   :  { %4992 = vrot.lane.b32.xlu0 %v7733_v15, %s6703_s22 }
0x24dd   :  { %v4534_v4 = vpop.xlane.xlu0 %4533 }
0x24de   :  { %6470 = vrcp.f32 %v4534_v4  ;;  %v4537_v47 = vpop.xlane.xlu1 %4536 }
0x24df   :  { %6472 = vrcp.f32 %v4537_v47 }
0x24e2   :  { %v4818_v2 = vpop.permute.xlu1 %4817 }
0x24e3   :  { %v4823_v49 = vsel %vm727_vm3, %v4818_v2, 0 }
0x24e5   :  { %v4540_v5 = vpop.xlane.xlu0 %4539 }
0x24e6   :  { %6474 = vrcp.f32 %v4540_v5 }
0x24e8   :  { %v6471_v63 = vpop.eup %6470 }
0x24e9   :  { %v6473_v27 = vpop.eup %6472  ;;  %v4562_v7 = vmul.f32 %v6471_v63, %v7870_v46  ;;  %v4770_v8 = vpop.permute.xlu0 %4769 }
0x24ea   :  { %v4563_v24 = vmul.f32 %v6473_v27, %v7872_v1  ;;  %v4775_v15 = vsel %vm727_vm3, %v4770_v8, 0 }
0x24eb   :  { %v4570_v58 = vpack.c.bf16 %v4562_v7, %v4562_v7 }
0x24ec   :  { %v4571_v52 = vpack.c.bf16 %v4563_v24, %v4563_v24 }
0x24ed   :  { %6149 = vmatmul.mubr.msk.bf16.vlgmr.msra.gmra.mrb[136].mxu1 %vm236_vm2, %v4570_v58 }
0x24ee   :  { %6155 = vmatmul.mubr.msk.bf16.vlgmr.msra.gmra.mrb[144].mxu0 %vm236_vm2, %v4571_v52  ;;  %6159 = vmatpush3.bf16.msra.mxu1 %v4727_v55 }
0x24ef   :  { %6165 = vmatpush3.bf16.msra.mxu0 %v4775_v15  ;;  %6160 = vmatprep.mubr.msk.bf16.mxu1 %vm6698_vm0, %v6697_v0 }
0x24f0   :  { %v6475_v21 = vpop.eup %6474  ;;  %6170 = vmatprep.subr.bf16.mxu1 %v6697_v0  ;;  %6166 = vmatprep.mubr.msk.bf16.mxu0 %vm6698_vm0, %v6697_v0 }
0x24f1   :  { %v4564_v32 = vmul.f32 %v6475_v21, %v7878_v10  ;;  %6176 = vmatprep.subr.bf16.mxu0 %v6697_v0 }
0x24f3   :  { %v4572_v11 = vpack.c.bf16 %v4564_v32, %v4564_v32 }
0x24f5   :  { %6161 = vmatmul.mubr.msk.bf16.vlgmr.msra.gmra.mrb[140].mxu1 %vm236_vm2, %v4572_v11 }
0x24f6   :  { %6171 = vmatpush3.bf16.msra.mxu1 %v4823_v49  ;;  %6172 = vmatprep.mubr.msk.bf16.mxu1 %vm6698_vm0, %v6697_v0 }
0x24f7   :  { %6182 = vmatprep.subr.bf16.mxu1 %v6697_v0 }
0x2513   :  { %v4543_v45 = vpop.xlane.xlu1 %4542 }
0x2514   :  { %6476 = vrcp.f32 %v4543_v45 }
0x2517   :  { %v4549_v25 = vpop.xlane.xlu1 %4548 }
0x2518   :  { %6478 = vrcp.f32 %v4549_v25 }
0x251a   :  { %v4546_v46 = vpop.xlane.xlu0 %4545 }
0x251b   :  { %6480 = vrcp.f32 %v4546_v46  ;;  %v4914_v37 = vpop.permute.xlu1 %4913 }
0x251c   :  { %v4919_v43 = vsel %vm727_vm3, %v4914_v37, 0 }
0x251e   :  { %v6477_v1 = vpop.eup %6476  ;;  %v4552_v33 = vpop.xlane.xlu0 %4551 }
0x251f   :  { %v4565_v54 = vmul.f32 %v6477_v1, %v7891_v53  ;;  %6482 = vrcp.f32 %v4552_v33 }
0x2521   :  { %v4573_v22 = vpack.c.bf16 %v4565_v54, %v4565_v54 }
0x2522   :  { %v6479_v10 = vpop.eup %6478  ;;  %v4866_v34 = vpop.permute.xlu0 %4865 }
0x2523   :  { %v4871_v31 = vsel %vm727_vm3, %v4866_v34, 0  ;;  %6167 = vmatmul.mubr.msk.bf16.vlgmr.msra.gmra.mrb[148].mxu0 %vm236_vm2, %v4573_v22  ;;  %v4567_v62 = vmul.f32 %v6479_v10, %v7895_v57 }
0x2524   :  { %6177 = vmatpush3.bf16.msra.mxu0 %v4871_v31  ;;  %6178 = vmatprep.mubr.msk.bf16.mxu0 %vm6698_vm0, %v6697_v0 }
0x2525   :  { %v6481_v9 = vpop.eup %6480  ;;  %6188 = vmatprep.subr.bf16.mxu0 %v6697_v0  ;;  %v4575_v35 = vpack.c.bf16 %v4567_v62, %v4567_v62 }
0x2526   :  { %v4566_v28 = vmul.f32 %v6481_v9, %v7897_v23  ;;  %v4993_v51 = vpop.permute.xlu0 %4992 }
0x2528   :  { %v4574_v13 = vpack.c.bf16 %v4566_v28, %v4566_v28 }
0x2529   :  { %v6483_v42 = vpop.eup %6482 }
0x252a   :  { %6173 = vmatmul.mubr.msk.bf16.vlgmr.msra.gmra.mrb[144].mxu1 %vm236_vm2, %v4574_v13  ;;  %v4568_v44 = vmul.f32 %v6483_v42, %v7903_v61 }
0x252b   :  { %6179 = vmatmul.mubr.msk.bf16.vlgmr.msra.gmra.mrb[152].mxu0 %vm236_vm2, %v4575_v35  ;;  %6183 = vmatpush3.bf16.msra.mxu1 %v4919_v43 }
0x252c   :  { %6184 = vmatprep.mubr.msk.bf16.mxu1 %vm6698_vm0, %v6697_v0  ;;  %6192 = vmatprep.mubr.msk.bf16.mxu0 %vm6698_vm0, %v6697_v0  ;;  %v4576_v41 = vpack.c.bf16 %v4568_v44, %v4568_v44 }
0x252d   :  { %6196 = vmatprep.subr.bf16.mxu1 %v6697_v0  ;;  %6189 = vmatpush3.bf16.msra.mxu0 %v4993_v51 }
0x252e   :  { %6190 = vmatprep.subr.bf16.mxu0 %v6697_v0 }
0x2532   :  { %6185 = vmatmul.mubr.msk.bf16.vlgmr.msra.gmra.mrb[148].mxu1 %vm236_vm2, %v4576_v41 }
0x2533   :  { %6200 = vmatprep.mubr.msk.bf16.mxu1 %vm6698_vm0, %v6697_v0 }
0x256b   :  { %v4619_v18 = vpop.f32.mrb[140].mxu0 }
0x256c   :  { %v6144_v48 = vpop.f32.mrb[141].mxu0 }
0x256d   :  { %v4622_v56 = vpop.f32.mrb[142].mxu0 }
0x256e   :  { %v6145_v53 = vpop.f32.mrb[143].mxu0 }
0x25c0   :  { %v4667_v3 = vpop.f32.mrb[136].mxu1 }
0x25c1   :  { %v4715_v57 = vpop.f32.mrb[144].mxu0  ;;  %v6150_v30 = vpop.f32.mrb[137].mxu1 }
0x25c2   :  { %v6156_v23 = vpop.f32.mrb[145].mxu0  ;;  %v4670_v59 = vpop.f32.mrb[138].mxu1 }
0x25c3   :  { %v4718_v60 = vpop.f32.mrb[146].mxu0  ;;  %v6151_v61 = vpop.f32.mrb[139].mxu1 }
0x25c4   :  { %v6157_v38 = vpop.f32.mrb[147].mxu0 }
0x25c8   :  { %v4763_v6 = vpop.f32.mrb[140].mxu1 }
0x25c9   :  { %v6162_v12 = vpop.f32.mrb[141].mxu1 }
0x25ca   :  { %v4766_v26 = vpop.f32.mrb[142].mxu1 }
0x25cb   :  { %v6163_v14 = vpop.f32.mrb[143].mxu1 }
0x25f6   :  { %v4811_v4 = vpop.f32.mrb[148].mxu0 }
0x25f7   :  { %v6168_v47 = vpop.f32.mrb[149].mxu0 }
0x25f8   :  { %v4814_v5 = vpop.f32.mrb[150].mxu0  ;;  %v6324_v47 = vld [vmem:[#allocation11 + $0x30] sm:$0xff]  }
0x25f9   :  { %v6169_v63 = vpop.f32.mrb[151].mxu0 }
0x25fd   :  { %v4859_v27 = vpop.f32.mrb[144].mxu1 }
0x25fe   :  { %v6287_v7 = vpack.i.bf16 %v4859_v27, %v4667_v3  ;;  %v4907_v24 = vpop.f32.mrb[152].mxu0  ;;  %v6174_v8 = vpop.f32.mrb[145].mxu1 }
0x25ff   :  { %v6292_v58 = vpack.i.bf16 %v4907_v24, %v4715_v57  ;;  %v6180_v52 = vpop.f32.mrb[153].mxu0  ;;  %v4862_v55 = vpop.f32.mrb[146].mxu1 }
0x2600   :  { %v4910_v15 = vpop.f32.mrb[154].mxu0  ;;  %6288 = vrot.lane.b32.xlu1 %v6287_v7, %s6687_s26  ;;  %v6175_v21 = vpop.f32.mrb[147].mxu1 }
0x2601   :  { %6293 = vrot.lane.b32.xlu0 %v6292_v58, %s6688_s1  ;;  %v6181_v32 = vpop.f32.mrb[155].mxu0  ;;  %v7993_v58 = vld [vmem:[%s8048_s7 + $0x18] sm:$0x1f] }
0x2602   :  { %v5078_v55 = vrot.slane %v7993_v58, %v7142_v29 }
0x2605   :  { %v4955_v2 = vpop.f32.mrb[148].mxu1  ;;  %4994 = vrot.lane.b32.xlu0 %v7736_v20, %s6703_s22 }
0x2606   :  { %v6297_v11 = vpack.i.bf16 %v4955_v2, %v4763_v6  ;;  %v6186_v49 = vpop.f32.mrb[149].mxu1 }
0x2607   :  { %v4958_v45 = vpop.f32.mrb[150].mxu1 }
0x2608   :  { %6298 = vrot.lane.b32.xlu1 %v6297_v11, %s6704_s11  ;;  %v6187_v25 = vpop.f32.mrb[151].mxu1  ;;  %v5084_v11 = vrot.slane %v7993_v58, %v7152_v36 }
0x260c   :  { %4998 = vrot.lane.b32.xlu1 %v7754_v40, %s6703_s22 }
0x2672   :  { %v6289_v46 = vpop.permute.xlu1 %6288 }
0x2673   :  { %v6294_v1 = vpop.permute.xlu0 %6293  ;;  %v6291_v33 = vunpack.i.h.bf16 %v6289_v46  ;;  %v6290_v54 = vunpack.i.l.bf16 %v6289_v46 }
0x2674   :  { %v6296_v10 = vunpack.i.h.bf16 %v6294_v1  ;;  %v6295_v34 = vunpack.i.l.bf16 %v6294_v1  ;;  %v6325_v1 = vld [vmem:[#allocation11 + $0x38] sm:$0xff]  }
0x2675   :  { %v4973_v31 = vsel %vm236_vm2, %v4619_v18, %v6290_v54  ;;  %v4988_v20 = vsel %vm236_vm2, %v4811_v4, %v6291_v33  ;;  %v6323_v4 = vld [vmem:[%s8045_s4 + $0x38] sm:$0xff]   ;;  %v5509_v33 = vld [vmem:[#allocation10 + $0x3] ss:$0 sm:$0xff] }
0x2676   :  { %v4989_v37 = vsel %vm1120_vm4, %v4988_v20, %v6296_v10  ;;  %v4974_v40 = vsel %vm1120_vm4, %v4973_v31, %v6295_v34 }
0x2677   :  { %v4995_v22 = vpop.permute.xlu0 %4994 }
0x2678   :  { %6191 = vmatpush3.bf16.msra.mxu0 %v4995_v22 }
0x2679   :  { %6204 = vmatprep.subr.bf16.mxu0 %v6697_v0 }
0x267a   :  { %v6299_v9 = vpop.permute.xlu1 %6298 }
0x267b   :  { %v6301_v62 = vunpack.i.h.bf16 %v6299_v9  ;;  %v6300_v28 = vunpack.i.l.bf16 %v6299_v9 }
0x267d   :  { %v4975_v13 = vsel %vm1122_vm5, %v4974_v40, %v6300_v28  ;;  %v4990_v42 = vsel %vm1122_vm5, %v4989_v37, %v6301_v62  ;;  %v5168_v62 = vrot.slane %v7993_v58, %v7163_v50 }
0x267e   :  { %v4991_v35 = vpack.c.bf16 %v4990_v42, %v4975_v13  ;;  %v4999_v43 = vpop.permute.xlu1 %4998 }
0x2680   :  { %6193 = vmatmul.mubr.msk.bf16.vlgmr.msra.gmra.mrb[156].mxu0 %vm160_vm1, %v4991_v35 }
0x2681   :  { %6208 = vmatprep.mubr.msk.bf16.mxu0 %vm6698_vm0, %v6697_v0  ;;  %6205 = vmatpush3.bf16.xpose.msra.mxu0 %v6324_v47 }
0x2682   :  { %6206 = vmatprep.subr.bf16.mxu0 %v6697_v0 }
0x2689   :  { %6207 = vmatpush3.bf16.xpose.msra.mxu0 %v6325_v1 }
0x2753   :  { %v5038_v44 = vpop.f32.mrb[156].mxu0 }
0x2754   :  { %v5039_v41 = vadd.f32 %v5038_v44, %v4999_v43  ;;  %v6194_v18 = vpop.f32.mrb[157].mxu0 }
0x2755   :  { %v5041_v48 = vpop.f32.mrb[158].mxu0 }
0x2756   :  { %v5047_v56 = vadd.f32 %v5039_v41, %v7745_v16  ;;  %v5042_v53 = vadd.f32 %v5041_v48, %v4999_v43  ;;  %v6195_v51 = vpop.f32.mrb[159].mxu0 }
0x2758   :  { %v5048_v3 = vadd.f32 %v5042_v53, %v7747_v39  ;;  %v5049_v57 = vsel %vm160_vm1, %v5047_v56, 0.0  ;;  %v6322_v39 = vld [vmem:[%s8045_s4 + $0x30] sm:$0xff]  }
0x2759   :  { %5050 = vadd.xlane.f32.xlu0 %v5049_v57  ;;  %6197 = vmatpush3.bf16.msra.mxu1 %v6322_v39 }
0x275a   :  { %v5052_v30 = vsel %vm160_vm1, %v5048_v3, 0.0  ;;  %6198 = vmatprep.subr.bf16.mxu1 %v6697_v0 }
0x275b   :  { %5053 = vadd.xlane.f32.xlu1 %v5052_v30 }
0x275d   :  { %6199 = vmatpush3.bf16.msra.mxu1 %v6323_v4  ;;  %v5259_v4 = vrot.slane %v7993_v58, %v7185_v19 }
0x275e   :  { %6212 = vmatprep.subr.bf16.mxu1 %v6697_v0 }
0x27e6   :  { %v5051_v23 = vpop.xlane.xlu0 %5050 }
0x27e7   :  { %v5055_v59 = vmul.f32 0.03125, %v5051_v23 }
0x27e8   :  { %v5054_v60 = vpop.xlane.xlu1 %5053 }
0x27e9   :  { %v5057_v61 = vsub.f32 %v5047_v56, %v5055_v59  ;;  %v5056_v38 = vmul.f32 0.03125, %v5054_v60 }
0x27eb   :  { %v5058_v6 = vsub.f32 %v5048_v3, %v5056_v38  ;;  %v5059_v12 = vmul.f32 %v5057_v61, %v5057_v61 }
0x27ed   :  { %v5061_v26 = vsel %vm160_vm1, %v5059_v12, 0.0  ;;  %v5060_v16 = vmul.f32 %v5058_v6, %v5058_v6 }
0x27ee   :  { %5062 = vadd.xlane.f32.xlu0 %v5061_v26 }
0x27ef   :  { %v5064_v14 = vsel %vm160_vm1, %v5060_v16, 0.0  ;;  %v5253_v16 = vrot.slane %v7993_v58, %v7180_v17 }
0x27f2   :  { %5065 = vadd.xlane.f32.xlu0 %v5064_v14 }
0x287b   :  { %v5063_v5 = vpop.xlane.xlu0 %5062 }
0x287c   :  { %v5067_v63 = vmul.f32 0.03125, %v5063_v5 }
0x287e   :  { %v5069_v27 = vadd.f32 1e-05, %v5067_v63 }
0x287f   :  { %v5066_v7 = vpop.xlane.xlu0 %5065 }
0x2880   :  { %6484 = vrsqrt.f32 %v5069_v27  ;;  %v5068_v24 = vmul.f32 0.03125, %v5066_v7 }
0x2882   :  { %v5070_v8 = vadd.f32 1e-05, %v5068_v24 }
0x2884   :  { %6486 = vrsqrt.f32 %v5070_v8 }
0x288a   :  { %v6485_v52 = vpop.eup %6484 }
0x288b   :  { %v5073_v15 = vmul.f32 %v6485_v52, %v5057_v61 }
0x288d   :  { %v5079_v32 = vmul.f32 %v5078_v55, %v5073_v15 }
0x288e   :  { %v6487_v21 = vpop.eup %6486 }
0x288f   :  { %v5074_v2 = vmul.f32 %v6487_v21, %v5058_v6  ;;  %v5085_v45 = vadd.f32 %v5084_v11, %v5079_v32 }
0x2891   :  { %v5080_v49 = vmul.f32 %v5078_v55, %v5074_v2 }
0x2893   :  { %v5086_v25 = vadd.f32 %v5084_v11, %v5080_v49 }
0x2895   :  { %v5087_v46 = vpack.c.bf16 %v5086_v25, %v5085_v45 }
0x2897   :  { %6201 = vmatmul.mubr.msk.bf16.vlgmr.msra.gmra.mrb[152].mxu1 %vm160_vm1, %v5087_v46 }
0x2898   :  { %6216 = vmatprep.mubr.msk.bf16.mxu1 %vm6698_vm0, %v6697_v0 }
0x296a   :  { %v5150_v29 = vpop.f32.mrb[152].mxu1 }
0x296b   :  { %v5151_v54 = vadd.f32 %v5509_v33, %v5150_v29  ;;  %v6202_v22 = vpop.f32.mrb[153].mxu1 }
0x296c   :  { %v5153_v10 = vpop.f32.mrb[154].mxu1 }
0x296d   :  { %v5154_v34 = vadd.f32 %v5509_v33, %v5153_v10  ;;  %v6203_v31 = vpop.f32.mrb[155].mxu1  ;;  %v5157_v20 = vmax.f32 %v5151_v54, 0.0 }
0x296f   :  { %v5158_v36 = vmax.f32 %v5154_v34, 0.0  ;;  %v5515_v34 = vld [vmem:[#allocation13 + $0x2] ss:$0 sm:$0xff] }
0x2971   :  { %v5159_v9 = vpack.c.bf16 %v5158_v36, %v5157_v20 }
0x2973   :  { %6209 = vmatmul.mubr.bf16.vlgmr.msra.gmra.mrb[160].mxu0 %v5159_v9 }
0x2a46   :  { %v5215_v28 = vpop.f32.mrb[160].mxu0 }
0x2a47   :  { %v5216_v37 = vadd.f32 %v5215_v28, %v5168_v62  ;;  %v6210_v40 = vpop.f32.mrb[161].mxu0 }
0x2a48   :  { %v5218_v13 = vpop.f32.mrb[162].mxu0 }
0x2a49   :  { %v5222_v42 = vadd.f32 %v5216_v37, %v5085_v45  ;;  %v5219_v35 = vadd.f32 %v5218_v13, %v5168_v62  ;;  %v6211_v43 = vpop.f32.mrb[163].mxu0  ;;  %v6326_v45 = vld [vmem:[%s8049_s8] sm:$0xff]   ;;  %v5516_v62 = vld [vmem:[#allocation13 + $0x3] ss:$0 sm:$0xff]  ;;  %v5517_v13 = vld [vmem:[#allocation13 + $0x4] ss:$0 sm:$0xff] }
0x2a4a   :  { %6213 = vmatpush3.bf16.msra.mxu1 %v6326_v45 }
0x2a4b   :  { %v5223_v44 = vadd.f32 %v5219_v35, %v5086_v25  ;;  %v5224_v41 = vsel %vm160_vm1, %v5222_v42, 0.0  ;;  %v6327_v25 = vld [vmem:[%s8049_s8 + $0x8] sm:$0xff]   ;;  %6214 = vmatprep.subr.bf16.mxu1 %v6697_v0  ;;  %s6705_s8 = smov [#allocation14]  }
0x2a4c   :  { %5225 = vadd.xlane.f32.xlu1 %v5224_v41  ;;  %s5375_s17 = sshll.u32 %s6705_s8, 4  ;;  %s5376_s17 = int_to_ptr.vmem [resolvable:$true] %s5375_s17 }
0x2a4d   :  { %v5227_v18 = vsel %vm160_vm1, %v5223_v44, 0.0  ;;  %s6652_s18 = scalar_lea.vmem %s5376_s17, 256  ;;  %p6657_p1 = scmp.lt.s32.totalorder %s5376_s17, %s5376_s17 }
0x2a4e   :  { %5228 = vadd.xlane.f32.xlu0 %v5227_v18  ;;  %6215 = vmatpush3.bf16.msra.mxu1 %v6327_v25  ;;  %p6653_p0 = scmp.ne.s32.totalorder %s5376_s17, %s6652_s18  ;;  %p6658_p2 = scmp.lt.s32.totalorder %s6652_s18, %s6652_s18 }
0x2a50   :  { %p6659_p3 = por %p6658_p2, %p6657_p1 }
0x2a52   :  { %p6660_p4 = pnand %p6659_p3, %p6653_p0 }
0x2ad9   :  { %v5226_v48 = vpop.xlane.xlu1 %5225 }
0x2ada   :  { %v5230_v56 = vmul.f32 0.03125, %v5226_v48 }
0x2adb   :  { %v5229_v53 = vpop.xlane.xlu0 %5228 }
0x2adc   :  { %v5232_v51 = vsub.f32 %v5222_v42, %v5230_v56  ;;  %v5231_v3 = vmul.f32 0.03125, %v5229_v53 }
0x2ade   :  { %v5233_v50 = vsub.f32 %v5223_v44, %v5231_v3  ;;  %v5234_v57 = vmul.f32 %v5232_v51, %v5232_v51 }
0x2ae0   :  { %v5236_v30 = vsel %vm160_vm1, %v5234_v57, 0.0  ;;  %v5235_v23 = vmul.f32 %v5233_v50, %v5233_v50 }
0x2ae1   :  { %5237 = vadd.xlane.f32.xlu1 %v5236_v30 }
0x2ae2   :  { %v5239_v59 = vsel %vm160_vm1, %v5235_v23, 0.0 }
0x2ae3   :  { %5240 = vadd.xlane.f32.xlu0 %v5239_v59 }
0x2b6e   :  { %v5238_v60 = vpop.xlane.xlu1 %5237 }
0x2b6f   :  { %v5242_v61 = vmul.f32 0.03125, %v5238_v60 }
0x2b70   :  { %v5241_v38 = vpop.xlane.xlu0 %5240 }
0x2b71   :  { %v5244_v6 = vadd.f32 1e-05, %v5242_v61  ;;  %v5243_v12 = vmul.f32 0.03125, %v5241_v38 }
0x2b73   :  { %6488 = vrsqrt.f32 %v5244_v6  ;;  %v5245_v26 = vadd.f32 1e-05, %v5243_v12 }
0x2b75   :  { %6490 = vrsqrt.f32 %v5245_v26 }
0x2b7d   :  { %v6489_v14 = vpop.eup %6488 }
0x2b7e   :  { %v5248_v39 = vmul.f32 %v6489_v14, %v5232_v51 }
0x2b7f   :  { %v6491_v47 = vpop.eup %6490 }
0x2b80   :  { %v5254_v5 = vmul.f32 %v5253_v16, %v5248_v39  ;;  %v5249_v63 = vmul.f32 %v6491_v47, %v5233_v50 }
0x2b82   :  { %v5260_v27 = vadd.f32 %v5259_v4, %v5254_v5  ;;  %v5255_v7 = vmul.f32 %v5253_v16, %v5249_v63 }
0x2b84   :  { %v5264_v24 = vsel %vm160_vm1, %v5260_v27, 0.0  ;;  %v5261_v8 = vadd.f32 %v5259_v4, %v5255_v7 }
0x2b85   :  { %5265 = vadd.xlane.f32.xlu1 %v5264_v24 }
0x2b86   :  { %v5267_v52 = vsel %vm160_vm1, %v5261_v8, 0.0 }
0x2b87   :  { %5268 = vadd.xlane.f32.xlu0 %v5267_v52 }
0x2c12   :  { %v5266_v55 = vpop.xlane.xlu1 %5265 }
0x2c13   :  { %v5270_v15 = vmul.f32 0.03125, %v5266_v55 }
0x2c14   :  { %v5269_v17 = vpop.xlane.xlu0 %5268 }
0x2c15   :  { %v5272_v21 = vsub.f32 %v5260_v27, %v5270_v15  ;;  %v5271_v32 = vmul.f32 0.03125, %v5269_v17 }
0x2c17   :  { %v5273_v2 = vsub.f32 %v5261_v8, %v5271_v32  ;;  %v5274_v11 = vmul.f32 %v5272_v21, %v5272_v21 }
0x2c19   :  { %v5276_v19 = vsel %vm160_vm1, %v5274_v11, 0.0  ;;  %v5275_v58 = vmul.f32 %v5273_v2, %v5273_v2 }
0x2c1a   :  { %5277 = vadd.xlane.f32.xlu1 %v5276_v19 }
0x2c1b   :  { %v5279_v49 = vsel %vm160_vm1, %v5275_v58, 0.0 }
0x2c1c   :  { %5280 = vadd.xlane.f32.xlu0 %v5279_v49 }
0x2ca7   :  { %v5278_v46 = vpop.xlane.xlu1 %5277 }
0x2ca8   :  { %v5282_v1 = vmul.f32 0.03125, %v5278_v46 }
0x2ca9   :  { %v5281_v33 = vpop.xlane.xlu0 %5280 }
0x2caa   :  { %v5284_v29 = vadd.f32 1e-05, %v5282_v1  ;;  %v5283_v54 = vmul.f32 0.03125, %v5281_v33 }
0x2cac   :  { %6492 = vrsqrt.f32 %v5284_v29  ;;  %v5285_v22 = vadd.f32 1e-05, %v5283_v54 }
0x2cae   :  { %6494 = vrsqrt.f32 %v5285_v22 }
0x2cb6   :  { %v6493_v10 = vpop.eup %6492 }
0x2cb7   :  { %v5288_v31 = vmul.f32 %v6493_v10, %v5272_v21 }
0x2cb8   :  { %v6495_v20 = vpop.eup %6494 }
0x2cb9   :  { %v5294_v36 = vmul.f32 %v5515_v34, %v5288_v31  ;;  %v5289_v9 = vmul.f32 %v6495_v20, %v5273_v2 }
0x2cbb   :  { %v5295_v28 = vmul.f32 %v5515_v34, %v5289_v9  ;;  %v5300_v37 = vadd.f32 %v5516_v62, %v5294_v36 }
0x2cbd   :  { %v5301_v40 = vadd.f32 %v5516_v62, %v5295_v28 }
0x2cbf   :  { %v5302_v0 = vpack.c.bf16 %v5301_v40, %v5300_v37 }
0x2cc1   :  { %6217 = vmatmul.mubr.msk.bf16.vlgmr.msra.gmra.mrb[156].mxu1 %vm160_vm1, %v5302_v0 }
0x2d94   :  { %v5361_v42 = vpop.f32.mrb[156].mxu1 }
0x2d95   :  { %v5362_v35 = vadd.f32 %v5517_v13, %v5361_v42  ;;  %v6218_v43 = vpop.f32.mrb[157].mxu1 }
0x2d96   :  { %v5364_v44 = vpop.f32.mrb[158].mxu1 }
0x2d97   :  { %5368 = vst.msk [vmem:[#allocation14] sm:$0xff] %vm160_vm1, %v5362_v35  ;;  %v5365_v41 = vadd.f32 %v5517_v13, %v5364_v44  ;;  %v6219_v18 = vpop.f32.mrb[159].mxu1 }
0x2d99   :  { %5369 = vst.msk [vmem:[#allocation14 + $0x8] sm:$0xff] %vm160_vm1, %v5365_v41 }
0x2d9a   :  { %6663 = shalt.err (!%p6660_p4)
}
0x2d9b   :  { %s6664_s12 = scalar_lea.hbm %s8051_s10, 256 }
0x2d9c   :  { %p6665_p5 = scmp.ne.s32.totalorder %s8051_s10, %s6664_s12  ;;  %p6668_p6 = scmp.lt.u32.totalorder %s6664_s12, %s8051_s10 }
0x2d9e   :  { %p6670_p7 = pnand %p6668_p6, %p6665_p5 }
0x2da0   :  { %6673 = shalt.err (!%p6670_p7)
}
0x2da1   :  { %5381 = dma.vmem_to_hbm [thread:$0]  %s5376_s17, 256, %s8051_s10, [#allocation4], %s6686_s25, %s6686_s25, %s6687_s26  }
0x2da2   :  { %6682 = dma.done.wait [#allocation4], 256  }
0x2da3   :  { %6683 = vsyncadd [#allocation4], 4294967040 }
0x2da4   :  { %5385 = vsyncpa [#allocation3], 1 }
0x2da5   :  { %5386 = vsyncpa [#allocation6], 1 }
0x2da6   :  { %5387 = vsyncpa [#allocation9], 1 }
0x2da7   :  { %5388 = vsyncpa [#allocation12], 1 }
0x2da8   :  { %5389 = vsyncpa [#allocation4], 1 }

</bundles_post_ra>
